<compile_context>
chip_gen: v6e
topology: v6e:2x2x1
jax: 0.10.0
libtpu: 0.0.40
codegen_flags: <defaults>
</compile_context>

<pallas_src>
import math

import jax
import jax.numpy as jnp
from jax.experimental import pallas as pl

# ----- hyper-parameters (small, consistent with the module's __init__) -----
NUM_LAYERS = 2
D_MODEL = 32
D_FFN = 64
NHEAD = 4
KERNEL_SIZE = 31          # SpeechBrain ConformerEncoder default depthwise kernel
BATCH = 2
SEQ = 8

# Slots of the packed input-side weight slab: (L * N_WSLOT, D, 64) bf16.
# D-wide matrices live in lanes [0:32]; the two FFN up-projections use all 64.
S_Q, S_K, S_V, S_WO, S_GA, S_GB, S_PW2, S_F1, S_F2, N_WSLOT = range(10)

# Rows of the packed per-layer vector slab: (L, N_VEC, 64) f32 (lanes [0:32] or
# [0:64] used depending on the row).
(FFN1_LN_G, FFN1_LN_B, FFN1_B1, FFN1_B2,
 NORM1_G, NORM1_B, BIAS_U, BIAS_V, ATT_BO,
 CONV_LN_G, CONV_LN_B, GLU_BA, GLU_BB, DW_B, CONV_LN2_G, CONV_LN2_B, PW2_B,
 FFN2_LN_G, FFN2_LN_B, FFN2_B1, FFN2_B2,
 NORM2_G, NORM2_B, FINAL_G, FINAL_B, N_VEC) = range(26)


# ---------------------------------------------------------------------------
# Positional-encoding table (RelPosEncXL) -- plain JAX, computed outside the
# kernel (input-independent).
# ---------------------------------------------------------------------------
def rel_pos_enc_xl(T, D):
    """RelPosEncXL: returns pe of shape (2T-1, D)."""
    inv_freq = jnp.exp(jnp.arange(0, D, 2, dtype=jnp.float32)
                       * (-(math.log(10000.0) / D)))
    pos = jnp.arange(T, dtype=jnp.float32)[:, None]
    ang = pos * inv_freq[None, :]
    s, c = jnp.sin(ang), jnp.cos(ang)
    pe_past = jnp.zeros((T, D), jnp.float32).at[:, 0::2].set(s).at[:, 1::2].set(c)
    pe_future = jnp.zeros((T, D), jnp.float32).at[:, 0::2].set(s).at[:, 1::2].set(-c)
    pe_past = jnp.flip(pe_past, axis=0)
    return jnp.concatenate([pe_past, pe_future[1:]], axis=0)


# ---------------------------------------------------------------------------
# Fused encoder forward: ONE pallas_call for the whole module.
# ---------------------------------------------------------------------------
def cus_encoder_forward(src, params):
    B, T, D = src.shape
    H = NHEAD
    hd = D // H
    F = D_FFN
    L = NUM_LAYERS
    K = KERNEL_SIZE
    BT = B * T
    pad = (K - 1) // 2

    # ---- input-independent per-layer tensors, computed OUTSIDE the kernel ----
    pe = rel_pos_enc_xl(T, D)                                          # (2T-1, D)
    pk = jnp.einsum('pd,lde->lpe', pe, params['wpos'])                 # (L, 2T-1, D)
    q_idx = jnp.arange(T)[:, None]
    k_idx = jnp.arange(T)[None, :]
    # rel-shift applied here: pk_rel[l, q, k, :] = pk[l, (T-1)+k-q, :]
    pk_rel = pk[:, (T - 1) + k_idx - q_idx, :]                         # (L, T, T, D)

    # depthwise conv as a (T, T, D) Toeplitz tap tensor: dwT[l,s,t,d]=dw[l,pad+s-t,d]
    conv_idx = pad + jnp.arange(T)[:, None] - jnp.arange(T)[None, :]   # (T, T)
    valid = (conv_idx >= 0) & (conv_idx < K)
    dwT = jnp.where(valid[None, :, :, None],
                    params['dw'][:, jnp.clip(conv_idx, 0, K - 1), :],
                    0.0)                                               # (L, T, T, D)

    ttd = jnp.stack([pk_rel, dwT], axis=1).reshape(2 * L, T, T, D)     # (2L, T, T, D)

    def kernel(x_ref, w_in_ref, w_f_ref, ttd_ref, vec_ref, o_ref):
        f32 = jnp.float32
        bf16 = jnp.bfloat16

        def wmat(l, s, cols=D):
            # (D, cols) bf16 weight, loaded straight from the packed slab.
            return w_in_ref[l * N_WSLOT + s, :, 0:cols]

        def vrow(l, r, width=D):
            # (1, width) f32 vector parameter.
            return vec_ref[l, r:r + 1, 0:width]

        def ln(v, g, b, eps=1e-5):
            mu = jnp.mean(v, axis=-1, keepdims=True)
            var = jnp.mean((v - mu) ** 2, axis=-1, keepdims=True)
            return (v - mu) * jax.lax.rsqrt(var + eps) * g + b

        def swish(v):
            return v * jax.nn.sigmoid(v)

        def dot(a, w):
            return jnp.dot(a.astype(bf16), w, preferred_element_type=f32)

        def ffn(l, v, w1_slot, w2_idx, g_row, b_row, b1_row, b2_row):
            h = ln(v, vrow(l, g_row), vrow(l, b_row))
            h = dot(h, wmat(l, w1_slot, F)) + vrow(l, b1_row, F)
            h = swish(h)
            return dot(h, w_f_ref[2 * l + w2_idx]) + vrow(l, b2_row)

        x = x_ref[...]                                           # (BT, D) f32

        for l in range(L):                                       # static unroll
            # ---------------- FFN module 1 (half-step residual) ----------------
            x = x + 0.5 * ffn(l, x, S_F1, 0,
                              FFN1_LN_G, FFN1_LN_B, FFN1_B1, FFN1_B2)

            # ---------------- RelPosMHAXL self-attention ----------------
            skip = x
            xn = ln(x, vrow(l, NORM1_G), vrow(l, NORM1_B))
            xb = xn.astype(bf16)
            q = jnp.dot(xb, wmat(l, S_Q), preferred_element_type=f32)  # scale folded
            k = jnp.dot(xb, wmat(l, S_K), preferred_element_type=f32)
            v = jnp.dot(xb, wmat(l, S_V), preferred_element_type=f32)
            qu = q + vrow(l, BIAS_U)                             # bias_u (scaled)
            qv = q + vrow(l, BIAS_V)                             # bias_v (scaled)
            pkr = ttd_ref[2 * l]                                 # (T, T, D) rel-shifted pos keys

            ctx_heads = []
            for hh in range(H):                                  # heads: static 8-lane slices
                cs = slice(hh * hd, (hh + 1) * hd)
                qu_h = qu[:, cs].reshape(B, T, hd)
                qv_h = qv[:, cs].reshape(B, T, hd)
                k_h = k[:, cs].reshape(B, T, hd)
                v_h = v[:, cs].reshape(B, T, hd)

                ac = jnp.einsum('bqd,bkd->bqk', qu_h, k_h,
                                preferred_element_type=f32)      # (B, T, T)
                # content->position term against the pre-shifted pos keys
                bd = jnp.sum(qv_h[:, :, None, :] * pkr[:, :, cs], axis=-1)
                s = ac + bd
                m = jnp.max(s, axis=-1, keepdims=True)
                e = jnp.exp(s - m)
                p = e * pl.reciprocal(jnp.sum(e, axis=-1, keepdims=True),
                                      approx=True)
                ctx = jnp.einsum('bqk,bkd->bqd', p, v_h,
                                 preferred_element_type=f32)     # (B, T, hd)
                ctx_heads.append(ctx.reshape(BT, hd))

            ctx = jnp.concatenate(ctx_heads, axis=1)             # (BT, D)
            att = dot(ctx, wmat(l, S_WO)) + vrow(l, ATT_BO)
            x = skip + att

            # ---------------- Convolution module ----------------
            h = ln(x, vrow(l, CONV_LN_G), vrow(l, CONV_LN_B))
            hb = h.astype(bf16)
            ga = jnp.dot(hb, wmat(l, S_GA), preferred_element_type=f32) + vrow(l, GLU_BA)
            gb = jnp.dot(hb, wmat(l, S_GB), preferred_element_type=f32) + vrow(l, GLU_BB)
            hg = (ga * jax.nn.sigmoid(gb)).reshape(B, T, D)      # GLU, (B, T, D)
            # depthwise conv: single broadcast-mul + reduce against Toeplitz taps
            acc = jnp.sum(hg[:, :, None, :] * ttd_ref[2 * l + 1], axis=1) \
                + vrow(l, DW_B)                                  # (B, T, D)
            h2 = swish(ln(acc.reshape(BT, D),
                          vrow(l, CONV_LN2_G), vrow(l, CONV_LN2_B)))
            h2 = dot(h2, wmat(l, S_PW2)) + vrow(l, PW2_B)
            x = x + h2

            # ---------------- FFN module 2 + per-layer LayerNorm ----------------
            x = x + 0.5 * ffn(l, x, S_F2, 1,
                              FFN2_LN_G, FFN2_LN_B, FFN2_B1, FFN2_B2)
            x = ln(x, vrow(l, NORM2_G), vrow(l, NORM2_B))

        # final ConformerEncoder LayerNorm (eps = 1e-6)
        o_ref[...] = ln(x, vrow(0, FINAL_G), vrow(0, FINAL_B), eps=1e-6)

    out = pl.pallas_call(
        kernel,
        out_shape=jax.ShapeDtypeStruct((BT, D), jnp.float32),
    )(src.reshape(BT, D), params['w_in'], params['w_f'], ttd, params['vec'])
    return out.reshape(B, T, D)


# ---------------------------------------------------------------------------
# Deterministic synthetic parameters, packed once at init time into a handful
# of lane-dense slabs (bf16 matmul weights, f32 vectors).
# ---------------------------------------------------------------------------
def init_params(seed=0):
    D, F, H, K, L = D_MODEL, D_FFN, NHEAD, KERNEL_SIZE, NUM_LAYERS
    hd = D // H
    # SpeechBrain RelPosMHAXL scales scores by 1/sqrt(embed_dim); fold it here.
    scale = 1.0 / math.sqrt(D)
    keys = iter(jax.random.split(jax.random.PRNGKey(seed), 64 * L))

    def w(shape, scl=0.1):
        return scl * jax.random.normal(next(keys), shape, dtype=jnp.float32)

    ones = jnp.ones((D,), jnp.float32)
    zeros = jnp.zeros((D,), jnp.float32)

    def slot(m):                    # pad a (D, c) matrix to a (D, 64) slab slot
        return jnp.pad(m, ((0, 0), (0, 64 - m.shape[1])))

    def row64(v):                   # pad a vector to a 64-lane row
        return jnp.pad(v, (0, 64 - v.shape[0]))

    w_in, w_f, vec, wpos, dw = [], [], [], [], []
    for _ in range(L):
        wq = w((D, D)) * scale      # attention score scale folded into wq
        wk, wv, wo = w((D, D)), w((D, D)), w((D, D))
        ga, gb = w((D, D)), w((D, D))           # pointwise conv halves (GLU)
        pw2 = w((D, D))
        f1_w1, f2_w1 = w((D, F)), w((D, F))
        f1_w2, f2_w2 = w((F, D)), w((F, D))

        w_in.append(jnp.stack([slot(wq), slot(wk), slot(wv), slot(wo),
                               slot(ga), slot(gb), slot(pw2),
                               f1_w1, f2_w1]))                  # (N_WSLOT, D, 64)
        w_f.append(jnp.stack([f1_w2, f2_w2]))                   # (2, F, D)
        wpos.append(w((D, D)))
        dw.append(w((K, D)))

        rows = [None] * N_VEC
        rows[FFN1_LN_G] = row64(ones);  rows[FFN1_LN_B] = row64(zeros)
        rows[FFN1_B1] = row64(w((F,), 0.01)); rows[FFN1_B2] = row64(w((D,), 0.01))
        rows[NORM1_G] = row64(ones);    rows[NORM1_B] = row64(zeros)
        rows[BIAS_U] = row64(w((H, hd)).reshape(D) * scale)     # head-major, scaled
        rows[BIAS_V] = row64(w((H, hd)).reshape(D) * scale)
        rows[ATT_BO] = row64(w((D,), 0.01))
        rows[CONV_LN_G] = row64(ones);  rows[CONV_LN_B] = row64(zeros)
        rows[GLU_BA] = row64(w((D,), 0.01)); rows[GLU_BB] = row64(w((D,), 0.01))
        rows[DW_B] = row64(w((D,), 0.01))
        rows[CONV_LN2_G] = row64(ones); rows[CONV_LN2_B] = row64(zeros)
        rows[PW2_B] = row64(w((D,), 0.01))
        rows[FFN2_LN_G] = row64(ones);  rows[FFN2_LN_B] = row64(zeros)
        rows[FFN2_B1] = row64(w((F,), 0.01)); rows[FFN2_B2] = row64(w((D,), 0.01))
        rows[NORM2_G] = row64(ones);    rows[NORM2_B] = row64(zeros)
        rows[FINAL_G] = row64(ones);    rows[FINAL_B] = row64(zeros)
        vec.append(jnp.stack(rows))                             # (N_VEC, 64)

    return dict(
        w_in=jnp.stack(w_in).reshape(L * N_WSLOT, D, 64).astype(jnp.bfloat16),
        w_f=jnp.stack(w_f).reshape(2 * L, F, D).astype(jnp.bfloat16),
        vec=jnp.stack(vec),                                     # (L, N_VEC, 64) f32
        wpos=jnp.stack(wpos),                                   # (L, D, D) f32
        dw=jnp.stack(dw),                                       # (L, K, D) f32
    )


# ---------------------------------------------------------------------------
if __name__ == "__main__":
    params = init_params(seed=0)
    src = jax.random.normal(jax.random.PRNGKey(0), (BATCH, SEQ, D_MODEL),
                            dtype=jnp.float32)

    forward = jax.jit(cus_encoder_forward)
    out = jax.block_until_ready(forward(src, params))

    assert out.shape == (BATCH, SEQ, D_MODEL), out.shape
    assert bool(jnp.all(jnp.isfinite(out)))
    print("KERNEL_OK")
</pallas_src>

<mosaic_0001>
module attributes {stable_mosaic.version = 11 : i64} {
  func.func @kernel(%arg0: memref<16x32xf32, #tpu.memory_space<vmem>>, %arg1: memref<18x32x64xbf16, #tpu.memory_space<vmem>>, %arg2: memref<4x64x32xbf16, #tpu.memory_space<vmem>>, %arg3: memref<4x8x8x32xf32, #tpu.memory_space<vmem>>, %arg4: memref<2x25x64xf32, #tpu.memory_space<vmem>>, %arg5: memref<16x32xf32, #tpu.memory_space<vmem>>) attributes {dimension_semantics = [], scalar_prefetch = 0 : i64, scratch_operands = 0 : i64, tpu.core_type = #tpu.core_type<tc>} {
    %c0 = arith.constant 0 : index
    %c0_0 = arith.constant 0 : index
    %0 = vector.load %arg0[%c0, %c0_0] : memref<16x32xf32, #tpu.memory_space<vmem>>, vector<16x32xf32>
    %c0_1 = arith.constant 0 : index
    %c0_2 = arith.constant 0 : index
    %c0_3 = arith.constant 0 : index
    %1 = vector.load %arg4[%c0_1, %c0_2, %c0_3] : memref<2x25x64xf32, #tpu.memory_space<vmem>>, vector<1x1x32xf32>
    %2 = vector.shape_cast %1 : vector<1x1x32xf32> to vector<1x32xf32>
    %c0_4 = arith.constant 0 : index
    %c1 = arith.constant 1 : index
    %c0_5 = arith.constant 0 : index
    %3 = vector.load %arg4[%c0_4, %c1, %c0_5] : memref<2x25x64xf32, #tpu.memory_space<vmem>>, vector<1x1x32xf32>
    %4 = vector.shape_cast %3 : vector<1x1x32xf32> to vector<1x32xf32>
    %cst = arith.constant dense<0.000000e+00> : vector<16xf32>
    %5 = vector.multi_reduction <add>, %0, %cst [1] : vector<16x32xf32> to vector<16xf32>
    %6 = vector.shape_cast %5 : vector<16xf32> to vector<16x1xf32>
    %cst_6 = arith.constant 3.200000e+01 : f32
    %7 = vector.broadcast %cst_6 : f32 to vector<16x1xf32>
    %8 = arith.divf %6, %7 : vector<16x1xf32>
    %9 = vector.broadcast %8 : vector<16x1xf32> to vector<16x32xf32>
    %10 = arith.subf %0, %9 : vector<16x32xf32>
    %11 = arith.mulf %10, %10 : vector<16x32xf32>
    %cst_7 = arith.constant dense<0.000000e+00> : vector<16xf32>
    %12 = vector.multi_reduction <add>, %11, %cst_7 [1] : vector<16x32xf32> to vector<16xf32>
    %13 = vector.shape_cast %12 : vector<16xf32> to vector<16x1xf32>
    %cst_8 = arith.constant 3.200000e+01 : f32
    %14 = vector.broadcast %cst_8 : f32 to vector<16x1xf32>
    %15 = arith.divf %13, %14 : vector<16x1xf32>
    %16 = vector.broadcast %8 : vector<16x1xf32> to vector<16x32xf32>
    %17 = arith.subf %0, %16 : vector<16x32xf32>
    %cst_9 = arith.constant 9.99999974E-6 : f32
    %18 = vector.broadcast %cst_9 : f32 to vector<16x1xf32>
    %19 = arith.addf %15, %18 : vector<16x1xf32>
    %20 = math.rsqrt %19 : vector<16x1xf32>
    %21 = vector.broadcast %20 : vector<16x1xf32> to vector<16x32xf32>
    %22 = arith.mulf %17, %21 : vector<16x32xf32>
    %23 = vector.broadcast %2 : vector<1x32xf32> to vector<16x32xf32>
    %24 = arith.mulf %22, %23 : vector<16x32xf32>
    %25 = vector.broadcast %4 : vector<1x32xf32> to vector<16x32xf32>
    %26 = arith.addf %24, %25 : vector<16x32xf32>
    %c7 = arith.constant 7 : index
    %c0_10 = arith.constant 0 : index
    %c0_11 = arith.constant 0 : index
    %27 = vector.load %arg1[%c7, %c0_10, %c0_11] : memref<18x32x64xbf16, #tpu.memory_space<vmem>>, vector<1x32x64xbf16>
    %28 = vector.shape_cast %27 : vector<1x32x64xbf16> to vector<32x64xbf16>
    %29 = arith.truncf %26 : vector<16x32xf32> to vector<16x32xbf16>
    %cst_12 = arith.constant dense<0.000000e+00> : vector<16x64xf32>
    %30 = tpu.matmul %29, %28, %cst_12 {dimension_numbers = #tpu.dot_dimension_numbers<[1], [0], [0], [1], [0, 0, 1, 1], [], []>} : vector<16x32xbf16>, vector<32x64xbf16>, vector<16x64xf32> -> vector<16x64xf32>
    %c0_13 = arith.constant 0 : index
    %c2 = arith.constant 2 : index
    %c0_14 = arith.constant 0 : index
    %31 = vector.load %arg4[%c0_13, %c2, %c0_14] : memref<2x25x64xf32, #tpu.memory_space<vmem>>, vector<1x1x64xf32>
    %32 = vector.shape_cast %31 : vector<1x1x64xf32> to vector<1x64xf32>
    %33 = vector.broadcast %32 : vector<1x64xf32> to vector<16x64xf32>
    %34 = arith.addf %30, %33 : vector<16x64xf32>
    %35 = arith.negf %34 : vector<16x64xf32>
    %36 = math.exp %35 : vector<16x64xf32>
    %cst_15 = arith.constant 1.000000e+00 : f32
    %37 = vector.broadcast %cst_15 : f32 to vector<16x64xf32>
    %38 = arith.addf %37, %36 : vector<16x64xf32>
    %39 = arith.divf %37, %38 : vector<16x64xf32>
    %40 = arith.mulf %34, %39 : vector<16x64xf32>
    %c0_16 = arith.constant 0 : index
    %c0_17 = arith.constant 0 : index
    %c0_18 = arith.constant 0 : index
    %41 = vector.load %arg2[%c0_16, %c0_17, %c0_18] : memref<4x64x32xbf16, #tpu.memory_space<vmem>>, vector<1x64x32xbf16>
    %42 = vector.shape_cast %41 : vector<1x64x32xbf16> to vector<64x32xbf16>
    %43 = arith.truncf %40 : vector<16x64xf32> to vector<16x64xbf16>
    %cst_19 = arith.constant dense<0.000000e+00> : vector<16x32xf32>
    %44 = tpu.matmul %43, %42, %cst_19 {dimension_numbers = #tpu.dot_dimension_numbers<[1], [0], [0], [1], [0, 0, 1, 1], [], []>} : vector<16x64xbf16>, vector<64x32xbf16>, vector<16x32xf32> -> vector<16x32xf32>
    %c0_20 = arith.constant 0 : index
    %c3 = arith.constant 3 : index
    %c0_21 = arith.constant 0 : index
    %45 = vector.load %arg4[%c0_20, %c3, %c0_21] : memref<2x25x64xf32, #tpu.memory_space<vmem>>, vector<1x1x32xf32>
    %46 = vector.shape_cast %45 : vector<1x1x32xf32> to vector<1x32xf32>
    %47 = vector.broadcast %46 : vector<1x32xf32> to vector<16x32xf32>
    %48 = arith.addf %44, %47 : vector<16x32xf32>
    %cst_22 = arith.constant 5.000000e-01 : f32
    %49 = vector.broadcast %cst_22 : f32 to vector<16x32xf32>
    %50 = arith.mulf %49, %48 : vector<16x32xf32>
    %51 = arith.addf %0, %50 : vector<16x32xf32>
    %c0_23 = arith.constant 0 : index
    %c4 = arith.constant 4 : index
    %c0_24 = arith.constant 0 : index
    %52 = vector.load %arg4[%c0_23, %c4, %c0_24] : memref<2x25x64xf32, #tpu.memory_space<vmem>>, vector<1x1x32xf32>
    %53 = vector.shape_cast %52 : vector<1x1x32xf32> to vector<1x32xf32>
    %c0_25 = arith.constant 0 : index
    %c5 = arith.constant 5 : index
    %c0_26 = arith.constant 0 : index
    %54 = vector.load %arg4[%c0_25, %c5, %c0_26] : memref<2x25x64xf32, #tpu.memory_space<vmem>>, vector<1x1x32xf32>
    %55 = vector.shape_cast %54 : vector<1x1x32xf32> to vector<1x32xf32>
    %cst_27 = arith.constant dense<0.000000e+00> : vector<16xf32>
    %56 = vector.multi_reduction <add>, %51, %cst_27 [1] : vector<16x32xf32> to vector<16xf32>
    %57 = vector.shape_cast %56 : vector<16xf32> to vector<16x1xf32>
    %cst_28 = arith.constant 3.200000e+01 : f32
    %58 = vector.broadcast %cst_28 : f32 to vector<16x1xf32>
    %59 = arith.divf %57, %58 : vector<16x1xf32>
    %60 = vector.broadcast %59 : vector<16x1xf32> to vector<16x32xf32>
    %61 = arith.subf %51, %60 : vector<16x32xf32>
    %62 = arith.mulf %61, %61 : vector<16x32xf32>
    %cst_29 = arith.constant dense<0.000000e+00> : vector<16xf32>
    %63 = vector.multi_reduction <add>, %62, %cst_29 [1] : vector<16x32xf32> to vector<16xf32>
    %64 = vector.shape_cast %63 : vector<16xf32> to vector<16x1xf32>
    %cst_30 = arith.constant 3.200000e+01 : f32
    %65 = vector.broadcast %cst_30 : f32 to vector<16x1xf32>
    %66 = arith.divf %64, %65 : vector<16x1xf32>
    %67 = vector.broadcast %59 : vector<16x1xf32> to vector<16x32xf32>
    %68 = arith.subf %51, %67 : vector<16x32xf32>
    %cst_31 = arith.constant 9.99999974E-6 : f32
    %69 = vector.broadcast %cst_31 : f32 to vector<16x1xf32>
    %70 = arith.addf %66, %69 : vector<16x1xf32>
    %71 = math.rsqrt %70 : vector<16x1xf32>
    %72 = vector.broadcast %71 : vector<16x1xf32> to vector<16x32xf32>
    %73 = arith.mulf %68, %72 : vector<16x32xf32>
    %74 = vector.broadcast %53 : vector<1x32xf32> to vector<16x32xf32>
    %75 = arith.mulf %73, %74 : vector<16x32xf32>
    %76 = vector.broadcast %55 : vector<1x32xf32> to vector<16x32xf32>
    %77 = arith.addf %75, %76 : vector<16x32xf32>
    %78 = arith.truncf %77 : vector<16x32xf32> to vector<16x32xbf16>
    %c0_32 = arith.constant 0 : index
    %c0_33 = arith.constant 0 : index
    %c0_34 = arith.constant 0 : index
    %79 = vector.load %arg1[%c0_32, %c0_33, %c0_34] : memref<18x32x64xbf16, #tpu.memory_space<vmem>>, vector<1x32x32xbf16>
    %80 = vector.shape_cast %79 : vector<1x32x32xbf16> to vector<32x32xbf16>
    %cst_35 = arith.constant dense<0.000000e+00> : vector<16x32xf32>
    %81 = tpu.matmul %78, %80, %cst_35 {dimension_numbers = #tpu.dot_dimension_numbers<[1], [0], [0], [1], [0, 0, 1, 1], [], []>} : vector<16x32xbf16>, vector<32x32xbf16>, vector<16x32xf32> -> vector<16x32xf32>
    %c1_36 = arith.constant 1 : index
    %c0_37 = arith.constant 0 : index
    %c0_38 = arith.constant 0 : index
    %82 = vector.load %arg1[%c1_36, %c0_37, %c0_38] : memref<18x32x64xbf16, #tpu.memory_space<vmem>>, vector<1x32x32xbf16>
    %83 = vector.shape_cast %82 : vector<1x32x32xbf16> to vector<32x32xbf16>
    %cst_39 = arith.constant dense<0.000000e+00> : vector<16x32xf32>
    %84 = tpu.matmul %78, %83, %cst_39 {dimension_numbers = #tpu.dot_dimension_numbers<[1], [0], [0], [1], [0, 0, 1, 1], [], []>} : vector<16x32xbf16>, vector<32x32xbf16>, vector<16x32xf32> -> vector<16x32xf32>
    %c2_40 = arith.constant 2 : index
    %c0_41 = arith.constant 0 : index
    %c0_42 = arith.constant 0 : index
    %85 = vector.load %arg1[%c2_40, %c0_41, %c0_42] : memref<18x32x64xbf16, #tpu.memory_space<vmem>>, vector<1x32x32xbf16>
    %86 = vector.shape_cast %85 : vector<1x32x32xbf16> to vector<32x32xbf16>
    %cst_43 = arith.constant dense<0.000000e+00> : vector<16x32xf32>
    %87 = tpu.matmul %78, %86, %cst_43 {dimension_numbers = #tpu.dot_dimension_numbers<[1], [0], [0], [1], [0, 0, 1, 1], [], []>} : vector<16x32xbf16>, vector<32x32xbf16>, vector<16x32xf32> -> vector<16x32xf32>
    %c0_44 = arith.constant 0 : index
    %c6 = arith.constant 6 : index
    %c0_45 = arith.constant 0 : index
    %88 = vector.load %arg4[%c0_44, %c6, %c0_45] : memref<2x25x64xf32, #tpu.memory_space<vmem>>, vector<1x1x32xf32>
    %89 = vector.shape_cast %88 : vector<1x1x32xf32> to vector<1x32xf32>
    %90 = vector.broadcast %89 : vector<1x32xf32> to vector<16x32xf32>
    %91 = arith.addf %81, %90 : vector<16x32xf32>
    %c0_46 = arith.constant 0 : index
    %c7_47 = arith.constant 7 : index
    %c0_48 = arith.constant 0 : index
    %92 = vector.load %arg4[%c0_46, %c7_47, %c0_48] : memref<2x25x64xf32, #tpu.memory_space<vmem>>, vector<1x1x32xf32>
    %93 = vector.shape_cast %92 : vector<1x1x32xf32> to vector<1x32xf32>
    %94 = vector.broadcast %93 : vector<1x32xf32> to vector<16x32xf32>
    %95 = arith.addf %81, %94 : vector<16x32xf32>
    %c0_49 = arith.constant 0 : index
    %c0_50 = arith.constant 0 : index
    %c0_51 = arith.constant 0 : index
    %c0_52 = arith.constant 0 : index
    %96 = vector.load %arg3[%c0_49, %c0_50, %c0_51, %c0_52] : memref<4x8x8x32xf32, #tpu.memory_space<vmem>>, vector<1x8x8x32xf32>
    %97 = vector.shape_cast %96 : vector<1x8x8x32xf32> to vector<8x8x32xf32>
    %98 = vector.extract_strided_slice %91 {offsets = [0, 0], sizes = [16, 8], strides = [1, 1]} : vector<16x32xf32> to vector<16x8xf32>
    %99 = vector.shape_cast %98 : vector<16x8xf32> to vector<2x8x8xf32>
    %100 = vector.extract_strided_slice %95 {offsets = [0, 0], sizes = [16, 8], strides = [1, 1]} : vector<16x32xf32> to vector<16x8xf32>
    %101 = vector.shape_cast %100 : vector<16x8xf32> to vector<2x8x8xf32>
    %102 = vector.extract_strided_slice %84 {offsets = [0, 0], sizes = [16, 8], strides = [1, 1]} : vector<16x32xf32> to vector<16x8xf32>
    %103 = vector.shape_cast %102 : vector<16x8xf32> to vector<2x8x8xf32>
    %104 = vector.extract_strided_slice %87 {offsets = [0, 0], sizes = [16, 8], strides = [1, 1]} : vector<16x32xf32> to vector<16x8xf32>
    %105 = vector.shape_cast %104 : vector<16x8xf32> to vector<2x8x8xf32>
    "tpu.trace_start"() <{level = 10 : i32, message = "bqd,bkd->bqk"}> : () -> ()
    %cst_53 = arith.constant dense<0.000000e+00> : vector<2x8x8xf32>
    %106 = tpu.matmul %99, %103, %cst_53 {dimension_numbers = #tpu.dot_dimension_numbers<[2], [2], [1], [1], [0, 0, 0, 1, 1, 1], [0], [0]>} : vector<2x8x8xf32>, vector<2x8x8xf32>, vector<2x8x8xf32> -> vector<2x8x8xf32>
    "tpu.trace_stop"() : () -> ()
    %107 = vector.shape_cast %101 : vector<2x8x8xf32> to vector<2x8x1x8xf32>
    %108 = vector.extract_strided_slice %97 {offsets = [0, 0, 0], sizes = [8, 8, 8], strides = [1, 1, 1]} : vector<8x8x32xf32> to vector<8x8x8xf32>
    %109 = vector.shape_cast %108 : vector<8x8x8xf32> to vector<1x8x8x8xf32>
    %110 = vector.broadcast %107 : vector<2x8x1x8xf32> to vector<2x8x8x8xf32>
    %111 = vector.broadcast %109 : vector<1x8x8x8xf32> to vector<2x8x8x8xf32>
    %112 = arith.mulf %110, %111 : vector<2x8x8x8xf32>
    %cst_54 = arith.constant dense<0.000000e+00> : vector<2x8x8xf32>
    %113 = vector.multi_reduction <add>, %112, %cst_54 [3] : vector<2x8x8x8xf32> to vector<2x8x8xf32>
    %114 = arith.addf %106, %113 : vector<2x8x8xf32>
    %cst_55 = arith.constant dense<0xFF800000> : vector<2x8xf32>
    %115 = vector.multi_reduction <maximumf>, %114, %cst_55 [2] : vector<2x8x8xf32> to vector<2x8xf32>
    %116 = vector.shape_cast %115 : vector<2x8xf32> to vector<2x8x1xf32>
    %117 = vector.broadcast %116 : vector<2x8x1xf32> to vector<2x8x8xf32>
    %118 = arith.subf %114, %117 : vector<2x8x8xf32>
    %119 = math.exp %118 : vector<2x8x8xf32>
    %cst_56 = arith.constant dense<0.000000e+00> : vector<2x8xf32>
    %120 = vector.multi_reduction <add>, %119, %cst_56 [2] : vector<2x8x8xf32> to vector<2x8xf32>
    %121 = vector.shape_cast %120 : vector<2x8xf32> to vector<2x8x1xf32>
    %122 = tpu.reciprocal %121 {approx = true} : vector<2x8x1xf32> -> vector<2x8x1xf32>
    %123 = vector.broadcast %122 : vector<2x8x1xf32> to vector<2x8x8xf32>
    %124 = arith.mulf %119, %123 : vector<2x8x8xf32>
    "tpu.trace_start"() <{level = 10 : i32, message = "bqk,bkd->bqd"}> : () -> ()
    %cst_57 = arith.constant dense<0.000000e+00> : vector<2x8x8xf32>
    %125 = tpu.matmul %124, %105, %cst_57 {dimension_numbers = #tpu.dot_dimension_numbers<[2], [1], [1], [2], [0, 0, 0, 1, 1, 2], [0], [0]>} : vector<2x8x8xf32>, vector<2x8x8xf32>, vector<2x8x8xf32> -> vector<2x8x8xf32>
    "tpu.trace_stop"() : () -> ()
    %126 = vector.shape_cast %125 : vector<2x8x8xf32> to vector<16x8xf32>
    %127 = vector.extract_strided_slice %91 {offsets = [0, 8], sizes = [16, 8], strides = [1, 1]} : vector<16x32xf32> to vector<16x8xf32>
    %128 = vector.shape_cast %127 : vector<16x8xf32> to vector<2x8x8xf32>
    %129 = vector.extract_strided_slice %95 {offsets = [0, 8], sizes = [16, 8], strides = [1, 1]} : vector<16x32xf32> to vector<16x8xf32>
    %130 = vector.shape_cast %129 : vector<16x8xf32> to vector<2x8x8xf32>
    %131 = vector.extract_strided_slice %84 {offsets = [0, 8], sizes = [16, 8], strides = [1, 1]} : vector<16x32xf32> to vector<16x8xf32>
    %132 = vector.shape_cast %131 : vector<16x8xf32> to vector<2x8x8xf32>
    %133 = vector.extract_strided_slice %87 {offsets = [0, 8], sizes = [16, 8], strides = [1, 1]} : vector<16x32xf32> to vector<16x8xf32>
    %134 = vector.shape_cast %133 : vector<16x8xf32> to vector<2x8x8xf32>
    "tpu.trace_start"() <{level = 10 : i32, message = "bqd,bkd->bqk"}> : () -> ()
    %cst_58 = arith.constant dense<0.000000e+00> : vector<2x8x8xf32>
    %135 = tpu.matmul %128, %132, %cst_58 {dimension_numbers = #tpu.dot_dimension_numbers<[2], [2], [1], [1], [0, 0, 0, 1, 1, 1], [0], [0]>} : vector<2x8x8xf32>, vector<2x8x8xf32>, vector<2x8x8xf32> -> vector<2x8x8xf32>
    "tpu.trace_stop"() : () -> ()
    %136 = vector.shape_cast %130 : vector<2x8x8xf32> to vector<2x8x1x8xf32>
    %137 = vector.extract_strided_slice %97 {offsets = [0, 0, 8], sizes = [8, 8, 8], strides = [1, 1, 1]} : vector<8x8x32xf32> to vector<8x8x8xf32>
    %138 = vector.shape_cast %137 : vector<8x8x8xf32> to vector<1x8x8x8xf32>
    %139 = vector.broadcast %136 : vector<2x8x1x8xf32> to vector<2x8x8x8xf32>
    %140 = vector.broadcast %138 : vector<1x8x8x8xf32> to vector<2x8x8x8xf32>
    %141 = arith.mulf %139, %140 : vector<2x8x8x8xf32>
    %cst_59 = arith.constant dense<0.000000e+00> : vector<2x8x8xf32>
    %142 = vector.multi_reduction <add>, %141, %cst_59 [3] : vector<2x8x8x8xf32> to vector<2x8x8xf32>
    %143 = arith.addf %135, %142 : vector<2x8x8xf32>
    %cst_60 = arith.constant dense<0xFF800000> : vector<2x8xf32>
    %144 = vector.multi_reduction <maximumf>, %143, %cst_60 [2] : vector<2x8x8xf32> to vector<2x8xf32>
    %145 = vector.shape_cast %144 : vector<2x8xf32> to vector<2x8x1xf32>
    %146 = vector.broadcast %145 : vector<2x8x1xf32> to vector<2x8x8xf32>
    %147 = arith.subf %143, %146 : vector<2x8x8xf32>
    %148 = math.exp %147 : vector<2x8x8xf32>
    %cst_61 = arith.constant dense<0.000000e+00> : vector<2x8xf32>
    %149 = vector.multi_reduction <add>, %148, %cst_61 [2] : vector<2x8x8xf32> to vector<2x8xf32>
    %150 = vector.shape_cast %149 : vector<2x8xf32> to vector<2x8x1xf32>
    %151 = tpu.reciprocal %150 {approx = true} : vector<2x8x1xf32> -> vector<2x8x1xf32>
    %152 = vector.broadcast %151 : vector<2x8x1xf32> to vector<2x8x8xf32>
    %153 = arith.mulf %148, %152 : vector<2x8x8xf32>
    "tpu.trace_start"() <{level = 10 : i32, message = "bqk,bkd->bqd"}> : () -> ()
    %cst_62 = arith.constant dense<0.000000e+00> : vector<2x8x8xf32>
    %154 = tpu.matmul %153, %134, %cst_62 {dimension_numbers = #tpu.dot_dimension_numbers<[2], [1], [1], [2], [0, 0, 0, 1, 1, 2], [0], [0]>} : vector<2x8x8xf32>, vector<2x8x8xf32>, vector<2x8x8xf32> -> vector<2x8x8xf32>
    "tpu.trace_stop"() : () -> ()
    %155 = vector.shape_cast %154 : vector<2x8x8xf32> to vector<16x8xf32>
    %156 = vector.extract_strided_slice %91 {offsets = [0, 16], sizes = [16, 8], strides = [1, 1]} : vector<16x32xf32> to vector<16x8xf32>
    %157 = vector.shape_cast %156 : vector<16x8xf32> to vector<2x8x8xf32>
    %158 = vector.extract_strided_slice %95 {offsets = [0, 16], sizes = [16, 8], strides = [1, 1]} : vector<16x32xf32> to vector<16x8xf32>
    %159 = vector.shape_cast %158 : vector<16x8xf32> to vector<2x8x8xf32>
    %160 = vector.extract_strided_slice %84 {offsets = [0, 16], sizes = [16, 8], strides = [1, 1]} : vector<16x32xf32> to vector<16x8xf32>
    %161 = vector.shape_cast %160 : vector<16x8xf32> to vector<2x8x8xf32>
    %162 = vector.extract_strided_slice %87 {offsets = [0, 16], sizes = [16, 8], strides = [1, 1]} : vector<16x32xf32> to vector<16x8xf32>
    %163 = vector.shape_cast %162 : vector<16x8xf32> to vector<2x8x8xf32>
    "tpu.trace_start"() <{level = 10 : i32, message = "bqd,bkd->bqk"}> : () -> ()
    %cst_63 = arith.constant dense<0.000000e+00> : vector<2x8x8xf32>
    %164 = tpu.matmul %157, %161, %cst_63 {dimension_numbers = #tpu.dot_dimension_numbers<[2], [2], [1], [1], [0, 0, 0, 1, 1, 1], [0], [0]>} : vector<2x8x8xf32>, vector<2x8x8xf32>, vector<2x8x8xf32> -> vector<2x8x8xf32>
    "tpu.trace_stop"() : () -> ()
    %165 = vector.shape_cast %159 : vector<2x8x8xf32> to vector<2x8x1x8xf32>
    %166 = vector.extract_strided_slice %97 {offsets = [0, 0, 16], sizes = [8, 8, 8], strides = [1, 1, 1]} : vector<8x8x32xf32> to vector<8x8x8xf32>
    %167 = vector.shape_cast %166 : vector<8x8x8xf32> to vector<1x8x8x8xf32>
    %168 = vector.broadcast %165 : vector<2x8x1x8xf32> to vector<2x8x8x8xf32>
    %169 = vector.broadcast %167 : vector<1x8x8x8xf32> to vector<2x8x8x8xf32>
    %170 = arith.mulf %168, %169 : vector<2x8x8x8xf32>
    %cst_64 = arith.constant dense<0.000000e+00> : vector<2x8x8xf32>
    %171 = vector.multi_reduction <add>, %170, %cst_64 [3] : vector<2x8x8x8xf32> to vector<2x8x8xf32>
    %172 = arith.addf %164, %171 : vector<2x8x8xf32>
    %cst_65 = arith.constant dense<0xFF800000> : vector<2x8xf32>
    %173 = vector.multi_reduction <maximumf>, %172, %cst_65 [2] : vector<2x8x8xf32> to vector<2x8xf32>
    %174 = vector.shape_cast %173 : vector<2x8xf32> to vector<2x8x1xf32>
    %175 = vector.broadcast %174 : vector<2x8x1xf32> to vector<2x8x8xf32>
    %176 = arith.subf %172, %175 : vector<2x8x8xf32>
    %177 = math.exp %176 : vector<2x8x8xf32>
    %cst_66 = arith.constant dense<0.000000e+00> : vector<2x8xf32>
    %178 = vector.multi_reduction <add>, %177, %cst_66 [2] : vector<2x8x8xf32> to vector<2x8xf32>
    %179 = vector.shape_cast %178 : vector<2x8xf32> to vector<2x8x1xf32>
    %180 = tpu.reciprocal %179 {approx = true} : vector<2x8x1xf32> -> vector<2x8x1xf32>
    %181 = vector.broadcast %180 : vector<2x8x1xf32> to vector<2x8x8xf32>
    %182 = arith.mulf %177, %181 : vector<2x8x8xf32>
    "tpu.trace_start"() <{level = 10 : i32, message = "bqk,bkd->bqd"}> : () -> ()
    %cst_67 = arith.constant dense<0.000000e+00> : vector<2x8x8xf32>
    %183 = tpu.matmul %182, %163, %cst_67 {dimension_numbers = #tpu.dot_dimension_numbers<[2], [1], [1], [2], [0, 0, 0, 1, 1, 2], [0], [0]>} : vector<2x8x8xf32>, vector<2x8x8xf32>, vector<2x8x8xf32> -> vector<2x8x8xf32>
    "tpu.trace_stop"() : () -> ()
    %184 = vector.shape_cast %183 : vector<2x8x8xf32> to vector<16x8xf32>
    %185 = vector.extract_strided_slice %91 {offsets = [0, 24], sizes = [16, 8], strides = [1, 1]} : vector<16x32xf32> to vector<16x8xf32>
    %186 = vector.shape_cast %185 : vector<16x8xf32> to vector<2x8x8xf32>
    %187 = vector.extract_strided_slice %95 {offsets = [0, 24], sizes = [16, 8], strides = [1, 1]} : vector<16x32xf32> to vector<16x8xf32>
    %188 = vector.shape_cast %187 : vector<16x8xf32> to vector<2x8x8xf32>
    %189 = vector.extract_strided_slice %84 {offsets = [0, 24], sizes = [16, 8], strides = [1, 1]} : vector<16x32xf32> to vector<16x8xf32>
    %190 = vector.shape_cast %189 : vector<16x8xf32> to vector<2x8x8xf32>
    %191 = vector.extract_strided_slice %87 {offsets = [0, 24], sizes = [16, 8], strides = [1, 1]} : vector<16x32xf32> to vector<16x8xf32>
    %192 = vector.shape_cast %191 : vector<16x8xf32> to vector<2x8x8xf32>
    "tpu.trace_start"() <{level = 10 : i32, message = "bqd,bkd->bqk"}> : () -> ()
    %cst_68 = arith.constant dense<0.000000e+00> : vector<2x8x8xf32>
    %193 = tpu.matmul %186, %190, %cst_68 {dimension_numbers = #tpu.dot_dimension_numbers<[2], [2], [1], [1], [0, 0, 0, 1, 1, 1], [0], [0]>} : vector<2x8x8xf32>, vector<2x8x8xf32>, vector<2x8x8xf32> -> vector<2x8x8xf32>
    "tpu.trace_stop"() : () -> ()
    %194 = vector.shape_cast %188 : vector<2x8x8xf32> to vector<2x8x1x8xf32>
    %195 = vector.extract_strided_slice %97 {offsets = [0, 0, 24], sizes = [8, 8, 8], strides = [1, 1, 1]} : vector<8x8x32xf32> to vector<8x8x8xf32>
    %196 = vector.shape_cast %195 : vector<8x8x8xf32> to vector<1x8x8x8xf32>
    %197 = vector.broadcast %194 : vector<2x8x1x8xf32> to vector<2x8x8x8xf32>
    %198 = vector.broadcast %196 : vector<1x8x8x8xf32> to vector<2x8x8x8xf32>
    %199 = arith.mulf %197, %198 : vector<2x8x8x8xf32>
    %cst_69 = arith.constant dense<0.000000e+00> : vector<2x8x8xf32>
    %200 = vector.multi_reduction <add>, %199, %cst_69 [3] : vector<2x8x8x8xf32> to vector<2x8x8xf32>
    %201 = arith.addf %193, %200 : vector<2x8x8xf32>
    %cst_70 = arith.constant dense<0xFF800000> : vector<2x8xf32>
    %202 = vector.multi_reduction <maximumf>, %201, %cst_70 [2] : vector<2x8x8xf32> to vector<2x8xf32>
    %203 = vector.shape_cast %202 : vector<2x8xf32> to vector<2x8x1xf32>
    %204 = vector.broadcast %203 : vector<2x8x1xf32> to vector<2x8x8xf32>
    %205 = arith.subf %201, %204 : vector<2x8x8xf32>
    %206 = math.exp %205 : vector<2x8x8xf32>
    %cst_71 = arith.constant dense<0.000000e+00> : vector<2x8xf32>
    %207 = vector.multi_reduction <add>, %206, %cst_71 [2] : vector<2x8x8xf32> to vector<2x8xf32>
    %208 = vector.shape_cast %207 : vector<2x8xf32> to vector<2x8x1xf32>
    %209 = tpu.reciprocal %208 {approx = true} : vector<2x8x1xf32> -> vector<2x8x1xf32>
    %210 = vector.broadcast %209 : vector<2x8x1xf32> to vector<2x8x8xf32>
    %211 = arith.mulf %206, %210 : vector<2x8x8xf32>
    "tpu.trace_start"() <{level = 10 : i32, message = "bqk,bkd->bqd"}> : () -> ()
    %cst_72 = arith.constant dense<0.000000e+00> : vector<2x8x8xf32>
    %212 = tpu.matmul %211, %192, %cst_72 {dimension_numbers = #tpu.dot_dimension_numbers<[2], [1], [1], [2], [0, 0, 0, 1, 1, 2], [0], [0]>} : vector<2x8x8xf32>, vector<2x8x8xf32>, vector<2x8x8xf32> -> vector<2x8x8xf32>
    "tpu.trace_stop"() : () -> ()
    %213 = vector.shape_cast %212 : vector<2x8x8xf32> to vector<16x8xf32>
    %214 = tpu.concatenate %126, %155, %184, %213 in 1 : vector<16x8xf32>, vector<16x8xf32>, vector<16x8xf32>, vector<16x8xf32> -> vector<16x32xf32>
    %c3_73 = arith.constant 3 : index
    %c0_74 = arith.constant 0 : index
    %c0_75 = arith.constant 0 : index
    %215 = vector.load %arg1[%c3_73, %c0_74, %c0_75] : memref<18x32x64xbf16, #tpu.memory_space<vmem>>, vector<1x32x32xbf16>
    %216 = vector.shape_cast %215 : vector<1x32x32xbf16> to vector<32x32xbf16>
    %217 = arith.truncf %214 : vector<16x32xf32> to vector<16x32xbf16>
    %cst_76 = arith.constant dense<0.000000e+00> : vector<16x32xf32>
    %218 = tpu.matmul %217, %216, %cst_76 {dimension_numbers = #tpu.dot_dimension_numbers<[1], [0], [0], [1], [0, 0, 1, 1], [], []>} : vector<16x32xbf16>, vector<32x32xbf16>, vector<16x32xf32> -> vector<16x32xf32>
    %c0_77 = arith.constant 0 : index
    %c8 = arith.constant 8 : index
    %c0_78 = arith.constant 0 : index
    %219 = vector.load %arg4[%c0_77, %c8, %c0_78] : memref<2x25x64xf32, #tpu.memory_space<vmem>>, vector<1x1x32xf32>
    %220 = vector.shape_cast %219 : vector<1x1x32xf32> to vector<1x32xf32>
    %221 = vector.broadcast %220 : vector<1x32xf32> to vector<16x32xf32>
    %222 = arith.addf %218, %221 : vector<16x32xf32>
    %223 = arith.addf %51, %222 : vector<16x32xf32>
    %c0_79 = arith.constant 0 : index
    %c9 = arith.constant 9 : index
    %c0_80 = arith.constant 0 : index
    %224 = vector.load %arg4[%c0_79, %c9, %c0_80] : memref<2x25x64xf32, #tpu.memory_space<vmem>>, vector<1x1x32xf32>
    %225 = vector.shape_cast %224 : vector<1x1x32xf32> to vector<1x32xf32>
    %c0_81 = arith.constant 0 : index
    %c10 = arith.constant 10 : index
    %c0_82 = arith.constant 0 : index
    %226 = vector.load %arg4[%c0_81, %c10, %c0_82] : memref<2x25x64xf32, #tpu.memory_space<vmem>>, vector<1x1x32xf32>
    %227 = vector.shape_cast %226 : vector<1x1x32xf32> to vector<1x32xf32>
    %cst_83 = arith.constant dense<0.000000e+00> : vector<16xf32>
    %228 = vector.multi_reduction <add>, %223, %cst_83 [1] : vector<16x32xf32> to vector<16xf32>
    %229 = vector.shape_cast %228 : vector<16xf32> to vector<16x1xf32>
    %cst_84 = arith.constant 3.200000e+01 : f32
    %230 = vector.broadcast %cst_84 : f32 to vector<16x1xf32>
    %231 = arith.divf %229, %230 : vector<16x1xf32>
    %232 = vector.broadcast %231 : vector<16x1xf32> to vector<16x32xf32>
    %233 = arith.subf %223, %232 : vector<16x32xf32>
    %234 = arith.mulf %233, %233 : vector<16x32xf32>
    %cst_85 = arith.constant dense<0.000000e+00> : vector<16xf32>
    %235 = vector.multi_reduction <add>, %234, %cst_85 [1] : vector<16x32xf32> to vector<16xf32>
    %236 = vector.shape_cast %235 : vector<16xf32> to vector<16x1xf32>
    %cst_86 = arith.constant 3.200000e+01 : f32
    %237 = vector.broadcast %cst_86 : f32 to vector<16x1xf32>
    %238 = arith.divf %236, %237 : vector<16x1xf32>
    %239 = vector.broadcast %231 : vector<16x1xf32> to vector<16x32xf32>
    %240 = arith.subf %223, %239 : vector<16x32xf32>
    %cst_87 = arith.constant 9.99999974E-6 : f32
    %241 = vector.broadcast %cst_87 : f32 to vector<16x1xf32>
    %242 = arith.addf %238, %241 : vector<16x1xf32>
    %243 = math.rsqrt %242 : vector<16x1xf32>
    %244 = vector.broadcast %243 : vector<16x1xf32> to vector<16x32xf32>
    %245 = arith.mulf %240, %244 : vector<16x32xf32>
    %246 = vector.broadcast %225 : vector<1x32xf32> to vector<16x32xf32>
    %247 = arith.mulf %245, %246 : vector<16x32xf32>
    %248 = vector.broadcast %227 : vector<1x32xf32> to vector<16x32xf32>
    %249 = arith.addf %247, %248 : vector<16x32xf32>
    %250 = arith.truncf %249 : vector<16x32xf32> to vector<16x32xbf16>
    %c4_88 = arith.constant 4 : index
    %c0_89 = arith.constant 0 : index
    %c0_90 = arith.constant 0 : index
    %251 = vector.load %arg1[%c4_88, %c0_89, %c0_90] : memref<18x32x64xbf16, #tpu.memory_space<vmem>>, vector<1x32x32xbf16>
    %252 = vector.shape_cast %251 : vector<1x32x32xbf16> to vector<32x32xbf16>
    %cst_91 = arith.constant dense<0.000000e+00> : vector<16x32xf32>
    %253 = tpu.matmul %250, %252, %cst_91 {dimension_numbers = #tpu.dot_dimension_numbers<[1], [0], [0], [1], [0, 0, 1, 1], [], []>} : vector<16x32xbf16>, vector<32x32xbf16>, vector<16x32xf32> -> vector<16x32xf32>
    %c0_92 = arith.constant 0 : index
    %c11 = arith.constant 11 : index
    %c0_93 = arith.constant 0 : index
    %254 = vector.load %arg4[%c0_92, %c11, %c0_93] : memref<2x25x64xf32, #tpu.memory_space<vmem>>, vector<1x1x32xf32>
    %255 = vector.shape_cast %254 : vector<1x1x32xf32> to vector<1x32xf32>
    %256 = vector.broadcast %255 : vector<1x32xf32> to vector<16x32xf32>
    %257 = arith.addf %253, %256 : vector<16x32xf32>
    %c5_94 = arith.constant 5 : index
    %c0_95 = arith.constant 0 : index
    %c0_96 = arith.constant 0 : index
    %258 = vector.load %arg1[%c5_94, %c0_95, %c0_96] : memref<18x32x64xbf16, #tpu.memory_space<vmem>>, vector<1x32x32xbf16>
    %259 = vector.shape_cast %258 : vector<1x32x32xbf16> to vector<32x32xbf16>
    %cst_97 = arith.constant dense<0.000000e+00> : vector<16x32xf32>
    %260 = tpu.matmul %250, %259, %cst_97 {dimension_numbers = #tpu.dot_dimension_numbers<[1], [0], [0], [1], [0, 0, 1, 1], [], []>} : vector<16x32xbf16>, vector<32x32xbf16>, vector<16x32xf32> -> vector<16x32xf32>
    %c0_98 = arith.constant 0 : index
    %c12 = arith.constant 12 : index
    %c0_99 = arith.constant 0 : index
    %261 = vector.load %arg4[%c0_98, %c12, %c0_99] : memref<2x25x64xf32, #tpu.memory_space<vmem>>, vector<1x1x32xf32>
    %262 = vector.shape_cast %261 : vector<1x1x32xf32> to vector<1x32xf32>
    %263 = vector.broadcast %262 : vector<1x32xf32> to vector<16x32xf32>
    %264 = arith.addf %260, %263 : vector<16x32xf32>
    %265 = arith.negf %264 : vector<16x32xf32>
    %266 = math.exp %265 : vector<16x32xf32>
    %cst_100 = arith.constant 1.000000e+00 : f32
    %267 = vector.broadcast %cst_100 : f32 to vector<16x32xf32>
    %268 = arith.addf %267, %266 : vector<16x32xf32>
    %269 = arith.divf %267, %268 : vector<16x32xf32>
    %270 = arith.mulf %257, %269 : vector<16x32xf32>
    %271 = vector.shape_cast %270 : vector<16x32xf32> to vector<2x8x32xf32>
    %272 = vector.shape_cast %271 : vector<2x8x32xf32> to vector<2x8x1x32xf32>
    %c1_101 = arith.constant 1 : index
    %c0_102 = arith.constant 0 : index
    %c0_103 = arith.constant 0 : index
    %c0_104 = arith.constant 0 : index
    %273 = vector.load %arg3[%c1_101, %c0_102, %c0_103, %c0_104] : memref<4x8x8x32xf32, #tpu.memory_space<vmem>>, vector<1x8x8x32xf32>
    %274 = vector.shape_cast %273 : vector<1x8x8x32xf32> to vector<8x8x32xf32>
    %275 = vector.shape_cast %274 : vector<8x8x32xf32> to vector<1x8x8x32xf32>
    %276 = vector.broadcast %272 : vector<2x8x1x32xf32> to vector<2x8x8x32xf32>
    %277 = vector.broadcast %275 : vector<1x8x8x32xf32> to vector<2x8x8x32xf32>
    %278 = arith.mulf %276, %277 : vector<2x8x8x32xf32>
    %cst_105 = arith.constant dense<0.000000e+00> : vector<2x8x32xf32>
    %279 = vector.multi_reduction <add>, %278, %cst_105 [1] : vector<2x8x8x32xf32> to vector<2x8x32xf32>
    %c0_106 = arith.constant 0 : index
    %c13 = arith.constant 13 : index
    %c0_107 = arith.constant 0 : index
    %280 = vector.load %arg4[%c0_106, %c13, %c0_107] : memref<2x25x64xf32, #tpu.memory_space<vmem>>, vector<1x1x32xf32>
    %281 = vector.shape_cast %280 : vector<1x1x32xf32> to vector<1x32xf32>
    %282 = vector.shape_cast %281 : vector<1x32xf32> to vector<1x1x32xf32>
    %283 = vector.broadcast %282 : vector<1x1x32xf32> to vector<2x8x32xf32>
    %284 = arith.addf %279, %283 : vector<2x8x32xf32>
    %285 = vector.shape_cast %284 : vector<2x8x32xf32> to vector<16x32xf32>
    %c0_108 = arith.constant 0 : index
    %c14 = arith.constant 14 : index
    %c0_109 = arith.constant 0 : index
    %286 = vector.load %arg4[%c0_108, %c14, %c0_109] : memref<2x25x64xf32, #tpu.memory_space<vmem>>, vector<1x1x32xf32>
    %287 = vector.shape_cast %286 : vector<1x1x32xf32> to vector<1x32xf32>
    %c0_110 = arith.constant 0 : index
    %c15 = arith.constant 15 : index
    %c0_111 = arith.constant 0 : index
    %288 = vector.load %arg4[%c0_110, %c15, %c0_111] : memref<2x25x64xf32, #tpu.memory_space<vmem>>, vector<1x1x32xf32>
    %289 = vector.shape_cast %288 : vector<1x1x32xf32> to vector<1x32xf32>
    %cst_112 = arith.constant dense<0.000000e+00> : vector<16xf32>
    %290 = vector.multi_reduction <add>, %285, %cst_112 [1] : vector<16x32xf32> to vector<16xf32>
    %291 = vector.shape_cast %290 : vector<16xf32> to vector<16x1xf32>
    %cst_113 = arith.constant 3.200000e+01 : f32
    %292 = vector.broadcast %cst_113 : f32 to vector<16x1xf32>
    %293 = arith.divf %291, %292 : vector<16x1xf32>
    %294 = vector.broadcast %293 : vector<16x1xf32> to vector<16x32xf32>
    %295 = arith.subf %285, %294 : vector<16x32xf32>
    %296 = arith.mulf %295, %295 : vector<16x32xf32>
    %cst_114 = arith.constant dense<0.000000e+00> : vector<16xf32>
    %297 = vector.multi_reduction <add>, %296, %cst_114 [1] : vector<16x32xf32> to vector<16xf32>
    %298 = vector.shape_cast %297 : vector<16xf32> to vector<16x1xf32>
    %cst_115 = arith.constant 3.200000e+01 : f32
    %299 = vector.broadcast %cst_115 : f32 to vector<16x1xf32>
    %300 = arith.divf %298, %299 : vector<16x1xf32>
    %301 = vector.broadcast %293 : vector<16x1xf32> to vector<16x32xf32>
    %302 = arith.subf %285, %301 : vector<16x32xf32>
    %cst_116 = arith.constant 9.99999974E-6 : f32
    %303 = vector.broadcast %cst_116 : f32 to vector<16x1xf32>
    %304 = arith.addf %300, %303 : vector<16x1xf32>
    %305 = math.rsqrt %304 : vector<16x1xf32>
    %306 = vector.broadcast %305 : vector<16x1xf32> to vector<16x32xf32>
    %307 = arith.mulf %302, %306 : vector<16x32xf32>
    %308 = vector.broadcast %287 : vector<1x32xf32> to vector<16x32xf32>
    %309 = arith.mulf %307, %308 : vector<16x32xf32>
    %310 = vector.broadcast %289 : vector<1x32xf32> to vector<16x32xf32>
    %311 = arith.addf %309, %310 : vector<16x32xf32>
    %312 = arith.negf %311 : vector<16x32xf32>
    %313 = math.exp %312 : vector<16x32xf32>
    %cst_117 = arith.constant 1.000000e+00 : f32
    %314 = vector.broadcast %cst_117 : f32 to vector<16x32xf32>
    %315 = arith.addf %314, %313 : vector<16x32xf32>
    %316 = arith.divf %314, %315 : vector<16x32xf32>
    %317 = arith.mulf %311, %316 : vector<16x32xf32>
    %c6_118 = arith.constant 6 : index
    %c0_119 = arith.constant 0 : index
    %c0_120 = arith.constant 0 : index
    %318 = vector.load %arg1[%c6_118, %c0_119, %c0_120] : memref<18x32x64xbf16, #tpu.memory_space<vmem>>, vector<1x32x32xbf16>
    %319 = vector.shape_cast %318 : vector<1x32x32xbf16> to vector<32x32xbf16>
    %320 = arith.truncf %317 : vector<16x32xf32> to vector<16x32xbf16>
    %cst_121 = arith.constant dense<0.000000e+00> : vector<16x32xf32>
    %321 = tpu.matmul %320, %319, %cst_121 {dimension_numbers = #tpu.dot_dimension_numbers<[1], [0], [0], [1], [0, 0, 1, 1], [], []>} : vector<16x32xbf16>, vector<32x32xbf16>, vector<16x32xf32> -> vector<16x32xf32>
    %c0_122 = arith.constant 0 : index
    %c16 = arith.constant 16 : index
    %c0_123 = arith.constant 0 : index
    %322 = vector.load %arg4[%c0_122, %c16, %c0_123] : memref<2x25x64xf32, #tpu.memory_space<vmem>>, vector<1x1x32xf32>
    %323 = vector.shape_cast %322 : vector<1x1x32xf32> to vector<1x32xf32>
    %324 = vector.broadcast %323 : vector<1x32xf32> to vector<16x32xf32>
    %325 = arith.addf %321, %324 : vector<16x32xf32>
    %326 = arith.addf %223, %325 : vector<16x32xf32>
    %c0_124 = arith.constant 0 : index
    %c17 = arith.constant 17 : index
    %c0_125 = arith.constant 0 : index
    %327 = vector.load %arg4[%c0_124, %c17, %c0_125] : memref<2x25x64xf32, #tpu.memory_space<vmem>>, vector<1x1x32xf32>
    %328 = vector.shape_cast %327 : vector<1x1x32xf32> to vector<1x32xf32>
    %c0_126 = arith.constant 0 : index
    %c18 = arith.constant 18 : index
    %c0_127 = arith.constant 0 : index
    %329 = vector.load %arg4[%c0_126, %c18, %c0_127] : memref<2x25x64xf32, #tpu.memory_space<vmem>>, vector<1x1x32xf32>
    %330 = vector.shape_cast %329 : vector<1x1x32xf32> to vector<1x32xf32>
    %cst_128 = arith.constant dense<0.000000e+00> : vector<16xf32>
    %331 = vector.multi_reduction <add>, %326, %cst_128 [1] : vector<16x32xf32> to vector<16xf32>
    %332 = vector.shape_cast %331 : vector<16xf32> to vector<16x1xf32>
    %cst_129 = arith.constant 3.200000e+01 : f32
    %333 = vector.broadcast %cst_129 : f32 to vector<16x1xf32>
    %334 = arith.divf %332, %333 : vector<16x1xf32>
    %335 = vector.broadcast %334 : vector<16x1xf32> to vector<16x32xf32>
    %336 = arith.subf %326, %335 : vector<16x32xf32>
    %337 = arith.mulf %336, %336 : vector<16x32xf32>
    %cst_130 = arith.constant dense<0.000000e+00> : vector<16xf32>
    %338 = vector.multi_reduction <add>, %337, %cst_130 [1] : vector<16x32xf32> to vector<16xf32>
    %339 = vector.shape_cast %338 : vector<16xf32> to vector<16x1xf32>
    %cst_131 = arith.constant 3.200000e+01 : f32
    %340 = vector.broadcast %cst_131 : f32 to vector<16x1xf32>
    %341 = arith.divf %339, %340 : vector<16x1xf32>
    %342 = vector.broadcast %334 : vector<16x1xf32> to vector<16x32xf32>
    %343 = arith.subf %326, %342 : vector<16x32xf32>
    %cst_132 = arith.constant 9.99999974E-6 : f32
    %344 = vector.broadcast %cst_132 : f32 to vector<16x1xf32>
    %345 = arith.addf %341, %344 : vector<16x1xf32>
    %346 = math.rsqrt %345 : vector<16x1xf32>
    %347 = vector.broadcast %346 : vector<16x1xf32> to vector<16x32xf32>
    %348 = arith.mulf %343, %347 : vector<16x32xf32>
    %349 = vector.broadcast %328 : vector<1x32xf32> to vector<16x32xf32>
    %350 = arith.mulf %348, %349 : vector<16x32xf32>
    %351 = vector.broadcast %330 : vector<1x32xf32> to vector<16x32xf32>
    %352 = arith.addf %350, %351 : vector<16x32xf32>
    %c8_133 = arith.constant 8 : index
    %c0_134 = arith.constant 0 : index
    %c0_135 = arith.constant 0 : index
    %353 = vector.load %arg1[%c8_133, %c0_134, %c0_135] : memref<18x32x64xbf16, #tpu.memory_space<vmem>>, vector<1x32x64xbf16>
    %354 = vector.shape_cast %353 : vector<1x32x64xbf16> to vector<32x64xbf16>
    %355 = arith.truncf %352 : vector<16x32xf32> to vector<16x32xbf16>
    %cst_136 = arith.constant dense<0.000000e+00> : vector<16x64xf32>
    %356 = tpu.matmul %355, %354, %cst_136 {dimension_numbers = #tpu.dot_dimension_numbers<[1], [0], [0], [1], [0, 0, 1, 1], [], []>} : vector<16x32xbf16>, vector<32x64xbf16>, vector<16x64xf32> -> vector<16x64xf32>
    %c0_137 = arith.constant 0 : index
    %c19 = arith.constant 19 : index
    %c0_138 = arith.constant 0 : index
    %357 = vector.load %arg4[%c0_137, %c19, %c0_138] : memref<2x25x64xf32, #tpu.memory_space<vmem>>, vector<1x1x64xf32>
    %358 = vector.shape_cast %357 : vector<1x1x64xf32> to vector<1x64xf32>
    %359 = vector.broadcast %358 : vector<1x64xf32> to vector<16x64xf32>
    %360 = arith.addf %356, %359 : vector<16x64xf32>
    %361 = arith.negf %360 : vector<16x64xf32>
    %362 = math.exp %361 : vector<16x64xf32>
    %cst_139 = arith.constant 1.000000e+00 : f32
    %363 = vector.broadcast %cst_139 : f32 to vector<16x64xf32>
    %364 = arith.addf %363, %362 : vector<16x64xf32>
    %365 = arith.divf %363, %364 : vector<16x64xf32>
    %366 = arith.mulf %360, %365 : vector<16x64xf32>
    %c1_140 = arith.constant 1 : index
    %c0_141 = arith.constant 0 : index
    %c0_142 = arith.constant 0 : index
    %367 = vector.load %arg2[%c1_140, %c0_141, %c0_142] : memref<4x64x32xbf16, #tpu.memory_space<vmem>>, vector<1x64x32xbf16>
    %368 = vector.shape_cast %367 : vector<1x64x32xbf16> to vector<64x32xbf16>
    %369 = arith.truncf %366 : vector<16x64xf32> to vector<16x64xbf16>
    %cst_143 = arith.constant dense<0.000000e+00> : vector<16x32xf32>
    %370 = tpu.matmul %369, %368, %cst_143 {dimension_numbers = #tpu.dot_dimension_numbers<[1], [0], [0], [1], [0, 0, 1, 1], [], []>} : vector<16x64xbf16>, vector<64x32xbf16>, vector<16x32xf32> -> vector<16x32xf32>
    %c0_144 = arith.constant 0 : index
    %c20 = arith.constant 20 : index
    %c0_145 = arith.constant 0 : index
    %371 = vector.load %arg4[%c0_144, %c20, %c0_145] : memref<2x25x64xf32, #tpu.memory_space<vmem>>, vector<1x1x32xf32>
    %372 = vector.shape_cast %371 : vector<1x1x32xf32> to vector<1x32xf32>
    %373 = vector.broadcast %372 : vector<1x32xf32> to vector<16x32xf32>
    %374 = arith.addf %370, %373 : vector<16x32xf32>
    %cst_146 = arith.constant 5.000000e-01 : f32
    %375 = vector.broadcast %cst_146 : f32 to vector<16x32xf32>
    %376 = arith.mulf %375, %374 : vector<16x32xf32>
    %377 = arith.addf %326, %376 : vector<16x32xf32>
    %c0_147 = arith.constant 0 : index
    %c21 = arith.constant 21 : index
    %c0_148 = arith.constant 0 : index
    %378 = vector.load %arg4[%c0_147, %c21, %c0_148] : memref<2x25x64xf32, #tpu.memory_space<vmem>>, vector<1x1x32xf32>
    %379 = vector.shape_cast %378 : vector<1x1x32xf32> to vector<1x32xf32>
    %c0_149 = arith.constant 0 : index
    %c22 = arith.constant 22 : index
    %c0_150 = arith.constant 0 : index
    %380 = vector.load %arg4[%c0_149, %c22, %c0_150] : memref<2x25x64xf32, #tpu.memory_space<vmem>>, vector<1x1x32xf32>
    %381 = vector.shape_cast %380 : vector<1x1x32xf32> to vector<1x32xf32>
    %cst_151 = arith.constant dense<0.000000e+00> : vector<16xf32>
    %382 = vector.multi_reduction <add>, %377, %cst_151 [1] : vector<16x32xf32> to vector<16xf32>
    %383 = vector.shape_cast %382 : vector<16xf32> to vector<16x1xf32>
    %cst_152 = arith.constant 3.200000e+01 : f32
    %384 = vector.broadcast %cst_152 : f32 to vector<16x1xf32>
    %385 = arith.divf %383, %384 : vector<16x1xf32>
    %386 = vector.broadcast %385 : vector<16x1xf32> to vector<16x32xf32>
    %387 = arith.subf %377, %386 : vector<16x32xf32>
    %388 = arith.mulf %387, %387 : vector<16x32xf32>
    %cst_153 = arith.constant dense<0.000000e+00> : vector<16xf32>
    %389 = vector.multi_reduction <add>, %388, %cst_153 [1] : vector<16x32xf32> to vector<16xf32>
    %390 = vector.shape_cast %389 : vector<16xf32> to vector<16x1xf32>
    %cst_154 = arith.constant 3.200000e+01 : f32
    %391 = vector.broadcast %cst_154 : f32 to vector<16x1xf32>
    %392 = arith.divf %390, %391 : vector<16x1xf32>
    %393 = vector.broadcast %385 : vector<16x1xf32> to vector<16x32xf32>
    %394 = arith.subf %377, %393 : vector<16x32xf32>
    %cst_155 = arith.constant 9.99999974E-6 : f32
    %395 = vector.broadcast %cst_155 : f32 to vector<16x1xf32>
    %396 = arith.addf %392, %395 : vector<16x1xf32>
    %397 = math.rsqrt %396 : vector<16x1xf32>
    %398 = vector.broadcast %397 : vector<16x1xf32> to vector<16x32xf32>
    %399 = arith.mulf %394, %398 : vector<16x32xf32>
    %400 = vector.broadcast %379 : vector<1x32xf32> to vector<16x32xf32>
    %401 = arith.mulf %399, %400 : vector<16x32xf32>
    %402 = vector.broadcast %381 : vector<1x32xf32> to vector<16x32xf32>
    %403 = arith.addf %401, %402 : vector<16x32xf32>
    %c1_156 = arith.constant 1 : index
    %c0_157 = arith.constant 0 : index
    %c0_158 = arith.constant 0 : index
    %404 = vector.load %arg4[%c1_156, %c0_157, %c0_158] : memref<2x25x64xf32, #tpu.memory_space<vmem>>, vector<1x1x32xf32>
    %405 = vector.shape_cast %404 : vector<1x1x32xf32> to vector<1x32xf32>
    %c1_159 = arith.constant 1 : index
    %c1_160 = arith.constant 1 : index
    %c0_161 = arith.constant 0 : index
    %406 = vector.load %arg4[%c1_159, %c1_160, %c0_161] : memref<2x25x64xf32, #tpu.memory_space<vmem>>, vector<1x1x32xf32>
    %407 = vector.shape_cast %406 : vector<1x1x32xf32> to vector<1x32xf32>
    %cst_162 = arith.constant dense<0.000000e+00> : vector<16xf32>
    %408 = vector.multi_reduction <add>, %403, %cst_162 [1] : vector<16x32xf32> to vector<16xf32>
    %409 = vector.shape_cast %408 : vector<16xf32> to vector<16x1xf32>
    %cst_163 = arith.constant 3.200000e+01 : f32
    %410 = vector.broadcast %cst_163 : f32 to vector<16x1xf32>
    %411 = arith.divf %409, %410 : vector<16x1xf32>
    %412 = vector.broadcast %411 : vector<16x1xf32> to vector<16x32xf32>
    %413 = arith.subf %403, %412 : vector<16x32xf32>
    %414 = arith.mulf %413, %413 : vector<16x32xf32>
    %cst_164 = arith.constant dense<0.000000e+00> : vector<16xf32>
    %415 = vector.multi_reduction <add>, %414, %cst_164 [1] : vector<16x32xf32> to vector<16xf32>
    %416 = vector.shape_cast %415 : vector<16xf32> to vector<16x1xf32>
    %cst_165 = arith.constant 3.200000e+01 : f32
    %417 = vector.broadcast %cst_165 : f32 to vector<16x1xf32>
    %418 = arith.divf %416, %417 : vector<16x1xf32>
    %419 = vector.broadcast %411 : vector<16x1xf32> to vector<16x32xf32>
    %420 = arith.subf %403, %419 : vector<16x32xf32>
    %cst_166 = arith.constant 9.99999974E-6 : f32
    %421 = vector.broadcast %cst_166 : f32 to vector<16x1xf32>
    %422 = arith.addf %418, %421 : vector<16x1xf32>
    %423 = math.rsqrt %422 : vector<16x1xf32>
    %424 = vector.broadcast %423 : vector<16x1xf32> to vector<16x32xf32>
    %425 = arith.mulf %420, %424 : vector<16x32xf32>
    %426 = vector.broadcast %405 : vector<1x32xf32> to vector<16x32xf32>
    %427 = arith.mulf %425, %426 : vector<16x32xf32>
    %428 = vector.broadcast %407 : vector<1x32xf32> to vector<16x32xf32>
    %429 = arith.addf %427, %428 : vector<16x32xf32>
    %c16_167 = arith.constant 16 : index
    %c0_168 = arith.constant 0 : index
    %c0_169 = arith.constant 0 : index
    %430 = vector.load %arg1[%c16_167, %c0_168, %c0_169] : memref<18x32x64xbf16, #tpu.memory_space<vmem>>, vector<1x32x64xbf16>
    %431 = vector.shape_cast %430 : vector<1x32x64xbf16> to vector<32x64xbf16>
    %432 = arith.truncf %429 : vector<16x32xf32> to vector<16x32xbf16>
    %cst_170 = arith.constant dense<0.000000e+00> : vector<16x64xf32>
    %433 = tpu.matmul %432, %431, %cst_170 {dimension_numbers = #tpu.dot_dimension_numbers<[1], [0], [0], [1], [0, 0, 1, 1], [], []>} : vector<16x32xbf16>, vector<32x64xbf16>, vector<16x64xf32> -> vector<16x64xf32>
    %c1_171 = arith.constant 1 : index
    %c2_172 = arith.constant 2 : index
    %c0_173 = arith.constant 0 : index
    %434 = vector.load %arg4[%c1_171, %c2_172, %c0_173] : memref<2x25x64xf32, #tpu.memory_space<vmem>>, vector<1x1x64xf32>
    %435 = vector.shape_cast %434 : vector<1x1x64xf32> to vector<1x64xf32>
    %436 = vector.broadcast %435 : vector<1x64xf32> to vector<16x64xf32>
    %437 = arith.addf %433, %436 : vector<16x64xf32>
    %438 = arith.negf %437 : vector<16x64xf32>
    %439 = math.exp %438 : vector<16x64xf32>
    %cst_174 = arith.constant 1.000000e+00 : f32
    %440 = vector.broadcast %cst_174 : f32 to vector<16x64xf32>
    %441 = arith.addf %440, %439 : vector<16x64xf32>
    %442 = arith.divf %440, %441 : vector<16x64xf32>
    %443 = arith.mulf %437, %442 : vector<16x64xf32>
    %c2_175 = arith.constant 2 : index
    %c0_176 = arith.constant 0 : index
    %c0_177 = arith.constant 0 : index
    %444 = vector.load %arg2[%c2_175, %c0_176, %c0_177] : memref<4x64x32xbf16, #tpu.memory_space<vmem>>, vector<1x64x32xbf16>
    %445 = vector.shape_cast %444 : vector<1x64x32xbf16> to vector<64x32xbf16>
    %446 = arith.truncf %443 : vector<16x64xf32> to vector<16x64xbf16>
    %cst_178 = arith.constant dense<0.000000e+00> : vector<16x32xf32>
    %447 = tpu.matmul %446, %445, %cst_178 {dimension_numbers = #tpu.dot_dimension_numbers<[1], [0], [0], [1], [0, 0, 1, 1], [], []>} : vector<16x64xbf16>, vector<64x32xbf16>, vector<16x32xf32> -> vector<16x32xf32>
    %c1_179 = arith.constant 1 : index
    %c3_180 = arith.constant 3 : index
    %c0_181 = arith.constant 0 : index
    %448 = vector.load %arg4[%c1_179, %c3_180, %c0_181] : memref<2x25x64xf32, #tpu.memory_space<vmem>>, vector<1x1x32xf32>
    %449 = vector.shape_cast %448 : vector<1x1x32xf32> to vector<1x32xf32>
    %450 = vector.broadcast %449 : vector<1x32xf32> to vector<16x32xf32>
    %451 = arith.addf %447, %450 : vector<16x32xf32>
    %cst_182 = arith.constant 5.000000e-01 : f32
    %452 = vector.broadcast %cst_182 : f32 to vector<16x32xf32>
    %453 = arith.mulf %452, %451 : vector<16x32xf32>
    %454 = arith.addf %403, %453 : vector<16x32xf32>
    %c1_183 = arith.constant 1 : index
    %c4_184 = arith.constant 4 : index
    %c0_185 = arith.constant 0 : index
    %455 = vector.load %arg4[%c1_183, %c4_184, %c0_185] : memref<2x25x64xf32, #tpu.memory_space<vmem>>, vector<1x1x32xf32>
    %456 = vector.shape_cast %455 : vector<1x1x32xf32> to vector<1x32xf32>
    %c1_186 = arith.constant 1 : index
    %c5_187 = arith.constant 5 : index
    %c0_188 = arith.constant 0 : index
    %457 = vector.load %arg4[%c1_186, %c5_187, %c0_188] : memref<2x25x64xf32, #tpu.memory_space<vmem>>, vector<1x1x32xf32>
    %458 = vector.shape_cast %457 : vector<1x1x32xf32> to vector<1x32xf32>
    %cst_189 = arith.constant dense<0.000000e+00> : vector<16xf32>
    %459 = vector.multi_reduction <add>, %454, %cst_189 [1] : vector<16x32xf32> to vector<16xf32>
    %460 = vector.shape_cast %459 : vector<16xf32> to vector<16x1xf32>
    %cst_190 = arith.constant 3.200000e+01 : f32
    %461 = vector.broadcast %cst_190 : f32 to vector<16x1xf32>
    %462 = arith.divf %460, %461 : vector<16x1xf32>
    %463 = vector.broadcast %462 : vector<16x1xf32> to vector<16x32xf32>
    %464 = arith.subf %454, %463 : vector<16x32xf32>
    %465 = arith.mulf %464, %464 : vector<16x32xf32>
    %cst_191 = arith.constant dense<0.000000e+00> : vector<16xf32>
    %466 = vector.multi_reduction <add>, %465, %cst_191 [1] : vector<16x32xf32> to vector<16xf32>
    %467 = vector.shape_cast %466 : vector<16xf32> to vector<16x1xf32>
    %cst_192 = arith.constant 3.200000e+01 : f32
    %468 = vector.broadcast %cst_192 : f32 to vector<16x1xf32>
    %469 = arith.divf %467, %468 : vector<16x1xf32>
    %470 = vector.broadcast %462 : vector<16x1xf32> to vector<16x32xf32>
    %471 = arith.subf %454, %470 : vector<16x32xf32>
    %cst_193 = arith.constant 9.99999974E-6 : f32
    %472 = vector.broadcast %cst_193 : f32 to vector<16x1xf32>
    %473 = arith.addf %469, %472 : vector<16x1xf32>
    %474 = math.rsqrt %473 : vector<16x1xf32>
    %475 = vector.broadcast %474 : vector<16x1xf32> to vector<16x32xf32>
    %476 = arith.mulf %471, %475 : vector<16x32xf32>
    %477 = vector.broadcast %456 : vector<1x32xf32> to vector<16x32xf32>
    %478 = arith.mulf %476, %477 : vector<16x32xf32>
    %479 = vector.broadcast %458 : vector<1x32xf32> to vector<16x32xf32>
    %480 = arith.addf %478, %479 : vector<16x32xf32>
    %481 = arith.truncf %480 : vector<16x32xf32> to vector<16x32xbf16>
    %c9_194 = arith.constant 9 : index
    %c0_195 = arith.constant 0 : index
    %c0_196 = arith.constant 0 : index
    %482 = vector.load %arg1[%c9_194, %c0_195, %c0_196] : memref<18x32x64xbf16, #tpu.memory_space<vmem>>, vector<1x32x32xbf16>
    %483 = vector.shape_cast %482 : vector<1x32x32xbf16> to vector<32x32xbf16>
    %cst_197 = arith.constant dense<0.000000e+00> : vector<16x32xf32>
    %484 = tpu.matmul %481, %483, %cst_197 {dimension_numbers = #tpu.dot_dimension_numbers<[1], [0], [0], [1], [0, 0, 1, 1], [], []>} : vector<16x32xbf16>, vector<32x32xbf16>, vector<16x32xf32> -> vector<16x32xf32>
    %c10_198 = arith.constant 10 : index
    %c0_199 = arith.constant 0 : index
    %c0_200 = arith.constant 0 : index
    %485 = vector.load %arg1[%c10_198, %c0_199, %c0_200] : memref<18x32x64xbf16, #tpu.memory_space<vmem>>, vector<1x32x32xbf16>
    %486 = vector.shape_cast %485 : vector<1x32x32xbf16> to vector<32x32xbf16>
    %cst_201 = arith.constant dense<0.000000e+00> : vector<16x32xf32>
    %487 = tpu.matmul %481, %486, %cst_201 {dimension_numbers = #tpu.dot_dimension_numbers<[1], [0], [0], [1], [0, 0, 1, 1], [], []>} : vector<16x32xbf16>, vector<32x32xbf16>, vector<16x32xf32> -> vector<16x32xf32>
    %c11_202 = arith.constant 11 : index
    %c0_203 = arith.constant 0 : index
    %c0_204 = arith.constant 0 : index
    %488 = vector.load %arg1[%c11_202, %c0_203, %c0_204] : memref<18x32x64xbf16, #tpu.memory_space<vmem>>, vector<1x32x32xbf16>
    %489 = vector.shape_cast %488 : vector<1x32x32xbf16> to vector<32x32xbf16>
    %cst_205 = arith.constant dense<0.000000e+00> : vector<16x32xf32>
    %490 = tpu.matmul %481, %489, %cst_205 {dimension_numbers = #tpu.dot_dimension_numbers<[1], [0], [0], [1], [0, 0, 1, 1], [], []>} : vector<16x32xbf16>, vector<32x32xbf16>, vector<16x32xf32> -> vector<16x32xf32>
    %c1_206 = arith.constant 1 : index
    %c6_207 = arith.constant 6 : index
    %c0_208 = arith.constant 0 : index
    %491 = vector.load %arg4[%c1_206, %c6_207, %c0_208] : memref<2x25x64xf32, #tpu.memory_space<vmem>>, vector<1x1x32xf32>
    %492 = vector.shape_cast %491 : vector<1x1x32xf32> to vector<1x32xf32>
    %493 = vector.broadcast %492 : vector<1x32xf32> to vector<16x32xf32>
    %494 = arith.addf %484, %493 : vector<16x32xf32>
    %c1_209 = arith.constant 1 : index
    %c7_210 = arith.constant 7 : index
    %c0_211 = arith.constant 0 : index
    %495 = vector.load %arg4[%c1_209, %c7_210, %c0_211] : memref<2x25x64xf32, #tpu.memory_space<vmem>>, vector<1x1x32xf32>
    %496 = vector.shape_cast %495 : vector<1x1x32xf32> to vector<1x32xf32>
    %497 = vector.broadcast %496 : vector<1x32xf32> to vector<16x32xf32>
    %498 = arith.addf %484, %497 : vector<16x32xf32>
    %c2_212 = arith.constant 2 : index
    %c0_213 = arith.constant 0 : index
    %c0_214 = arith.constant 0 : index
    %c0_215 = arith.constant 0 : index
    %499 = vector.load %arg3[%c2_212, %c0_213, %c0_214, %c0_215] : memref<4x8x8x32xf32, #tpu.memory_space<vmem>>, vector<1x8x8x32xf32>
    %500 = vector.shape_cast %499 : vector<1x8x8x32xf32> to vector<8x8x32xf32>
    %501 = vector.extract_strided_slice %494 {offsets = [0, 0], sizes = [16, 8], strides = [1, 1]} : vector<16x32xf32> to vector<16x8xf32>
    %502 = vector.shape_cast %501 : vector<16x8xf32> to vector<2x8x8xf32>
    %503 = vector.extract_strided_slice %498 {offsets = [0, 0], sizes = [16, 8], strides = [1, 1]} : vector<16x32xf32> to vector<16x8xf32>
    %504 = vector.shape_cast %503 : vector<16x8xf32> to vector<2x8x8xf32>
    %505 = vector.extract_strided_slice %487 {offsets = [0, 0], sizes = [16, 8], strides = [1, 1]} : vector<16x32xf32> to vector<16x8xf32>
    %506 = vector.shape_cast %505 : vector<16x8xf32> to vector<2x8x8xf32>
    %507 = vector.extract_strided_slice %490 {offsets = [0, 0], sizes = [16, 8], strides = [1, 1]} : vector<16x32xf32> to vector<16x8xf32>
    %508 = vector.shape_cast %507 : vector<16x8xf32> to vector<2x8x8xf32>
    "tpu.trace_start"() <{level = 10 : i32, message = "bqd,bkd->bqk"}> : () -> ()
    %cst_216 = arith.constant dense<0.000000e+00> : vector<2x8x8xf32>
    %509 = tpu.matmul %502, %506, %cst_216 {dimension_numbers = #tpu.dot_dimension_numbers<[2], [2], [1], [1], [0, 0, 0, 1, 1, 1], [0], [0]>} : vector<2x8x8xf32>, vector<2x8x8xf32>, vector<2x8x8xf32> -> vector<2x8x8xf32>
    "tpu.trace_stop"() : () -> ()
    %510 = vector.shape_cast %504 : vector<2x8x8xf32> to vector<2x8x1x8xf32>
    %511 = vector.extract_strided_slice %500 {offsets = [0, 0, 0], sizes = [8, 8, 8], strides = [1, 1, 1]} : vector<8x8x32xf32> to vector<8x8x8xf32>
    %512 = vector.shape_cast %511 : vector<8x8x8xf32> to vector<1x8x8x8xf32>
    %513 = vector.broadcast %510 : vector<2x8x1x8xf32> to vector<2x8x8x8xf32>
    %514 = vector.broadcast %512 : vector<1x8x8x8xf32> to vector<2x8x8x8xf32>
    %515 = arith.mulf %513, %514 : vector<2x8x8x8xf32>
    %cst_217 = arith.constant dense<0.000000e+00> : vector<2x8x8xf32>
    %516 = vector.multi_reduction <add>, %515, %cst_217 [3] : vector<2x8x8x8xf32> to vector<2x8x8xf32>
    %517 = arith.addf %509, %516 : vector<2x8x8xf32>
    %cst_218 = arith.constant dense<0xFF800000> : vector<2x8xf32>
    %518 = vector.multi_reduction <maximumf>, %517, %cst_218 [2] : vector<2x8x8xf32> to vector<2x8xf32>
    %519 = vector.shape_cast %518 : vector<2x8xf32> to vector<2x8x1xf32>
    %520 = vector.broadcast %519 : vector<2x8x1xf32> to vector<2x8x8xf32>
    %521 = arith.subf %517, %520 : vector<2x8x8xf32>
    %522 = math.exp %521 : vector<2x8x8xf32>
    %cst_219 = arith.constant dense<0.000000e+00> : vector<2x8xf32>
    %523 = vector.multi_reduction <add>, %522, %cst_219 [2] : vector<2x8x8xf32> to vector<2x8xf32>
    %524 = vector.shape_cast %523 : vector<2x8xf32> to vector<2x8x1xf32>
    %525 = tpu.reciprocal %524 {approx = true} : vector<2x8x1xf32> -> vector<2x8x1xf32>
    %526 = vector.broadcast %525 : vector<2x8x1xf32> to vector<2x8x8xf32>
    %527 = arith.mulf %522, %526 : vector<2x8x8xf32>
    "tpu.trace_start"() <{level = 10 : i32, message = "bqk,bkd->bqd"}> : () -> ()
    %cst_220 = arith.constant dense<0.000000e+00> : vector<2x8x8xf32>
    %528 = tpu.matmul %527, %508, %cst_220 {dimension_numbers = #tpu.dot_dimension_numbers<[2], [1], [1], [2], [0, 0, 0, 1, 1, 2], [0], [0]>} : vector<2x8x8xf32>, vector<2x8x8xf32>, vector<2x8x8xf32> -> vector<2x8x8xf32>
    "tpu.trace_stop"() : () -> ()
    %529 = vector.shape_cast %528 : vector<2x8x8xf32> to vector<16x8xf32>
    %530 = vector.extract_strided_slice %494 {offsets = [0, 8], sizes = [16, 8], strides = [1, 1]} : vector<16x32xf32> to vector<16x8xf32>
    %531 = vector.shape_cast %530 : vector<16x8xf32> to vector<2x8x8xf32>
    %532 = vector.extract_strided_slice %498 {offsets = [0, 8], sizes = [16, 8], strides = [1, 1]} : vector<16x32xf32> to vector<16x8xf32>
    %533 = vector.shape_cast %532 : vector<16x8xf32> to vector<2x8x8xf32>
    %534 = vector.extract_strided_slice %487 {offsets = [0, 8], sizes = [16, 8], strides = [1, 1]} : vector<16x32xf32> to vector<16x8xf32>
    %535 = vector.shape_cast %534 : vector<16x8xf32> to vector<2x8x8xf32>
    %536 = vector.extract_strided_slice %490 {offsets = [0, 8], sizes = [16, 8], strides = [1, 1]} : vector<16x32xf32> to vector<16x8xf32>
    %537 = vector.shape_cast %536 : vector<16x8xf32> to vector<2x8x8xf32>
    "tpu.trace_start"() <{level = 10 : i32, message = "bqd,bkd->bqk"}> : () -> ()
    %cst_221 = arith.constant dense<0.000000e+00> : vector<2x8x8xf32>
    %538 = tpu.matmul %531, %535, %cst_221 {dimension_numbers = #tpu.dot_dimension_numbers<[2], [2], [1], [1], [0, 0, 0, 1, 1, 1], [0], [0]>} : vector<2x8x8xf32>, vector<2x8x8xf32>, vector<2x8x8xf32> -> vector<2x8x8xf32>
    "tpu.trace_stop"() : () -> ()
    %539 = vector.shape_cast %533 : vector<2x8x8xf32> to vector<2x8x1x8xf32>
    %540 = vector.extract_strided_slice %500 {offsets = [0, 0, 8], sizes = [8, 8, 8], strides = [1, 1, 1]} : vector<8x8x32xf32> to vector<8x8x8xf32>
    %541 = vector.shape_cast %540 : vector<8x8x8xf32> to vector<1x8x8x8xf32>
    %542 = vector.broadcast %539 : vector<2x8x1x8xf32> to vector<2x8x8x8xf32>
    %543 = vector.broadcast %541 : vector<1x8x8x8xf32> to vector<2x8x8x8xf32>
    %544 = arith.mulf %542, %543 : vector<2x8x8x8xf32>
    %cst_222 = arith.constant dense<0.000000e+00> : vector<2x8x8xf32>
    %545 = vector.multi_reduction <add>, %544, %cst_222 [3] : vector<2x8x8x8xf32> to vector<2x8x8xf32>
    %546 = arith.addf %538, %545 : vector<2x8x8xf32>
    %cst_223 = arith.constant dense<0xFF800000> : vector<2x8xf32>
    %547 = vector.multi_reduction <maximumf>, %546, %cst_223 [2] : vector<2x8x8xf32> to vector<2x8xf32>
    %548 = vector.shape_cast %547 : vector<2x8xf32> to vector<2x8x1xf32>
    %549 = vector.broadcast %548 : vector<2x8x1xf32> to vector<2x8x8xf32>
    %550 = arith.subf %546, %549 : vector<2x8x8xf32>
    %551 = math.exp %550 : vector<2x8x8xf32>
    %cst_224 = arith.constant dense<0.000000e+00> : vector<2x8xf32>
    %552 = vector.multi_reduction <add>, %551, %cst_224 [2] : vector<2x8x8xf32> to vector<2x8xf32>
    %553 = vector.shape_cast %552 : vector<2x8xf32> to vector<2x8x1xf32>
    %554 = tpu.reciprocal %553 {approx = true} : vector<2x8x1xf32> -> vector<2x8x1xf32>
    %555 = vector.broadcast %554 : vector<2x8x1xf32> to vector<2x8x8xf32>
    %556 = arith.mulf %551, %555 : vector<2x8x8xf32>
    "tpu.trace_start"() <{level = 10 : i32, message = "bqk,bkd->bqd"}> : () -> ()
    %cst_225 = arith.constant dense<0.000000e+00> : vector<2x8x8xf32>
    %557 = tpu.matmul %556, %537, %cst_225 {dimension_numbers = #tpu.dot_dimension_numbers<[2], [1], [1], [2], [0, 0, 0, 1, 1, 2], [0], [0]>} : vector<2x8x8xf32>, vector<2x8x8xf32>, vector<2x8x8xf32> -> vector<2x8x8xf32>
    "tpu.trace_stop"() : () -> ()
    %558 = vector.shape_cast %557 : vector<2x8x8xf32> to vector<16x8xf32>
    %559 = vector.extract_strided_slice %494 {offsets = [0, 16], sizes = [16, 8], strides = [1, 1]} : vector<16x32xf32> to vector<16x8xf32>
    %560 = vector.shape_cast %559 : vector<16x8xf32> to vector<2x8x8xf32>
    %561 = vector.extract_strided_slice %498 {offsets = [0, 16], sizes = [16, 8], strides = [1, 1]} : vector<16x32xf32> to vector<16x8xf32>
    %562 = vector.shape_cast %561 : vector<16x8xf32> to vector<2x8x8xf32>
    %563 = vector.extract_strided_slice %487 {offsets = [0, 16], sizes = [16, 8], strides = [1, 1]} : vector<16x32xf32> to vector<16x8xf32>
    %564 = vector.shape_cast %563 : vector<16x8xf32> to vector<2x8x8xf32>
    %565 = vector.extract_strided_slice %490 {offsets = [0, 16], sizes = [16, 8], strides = [1, 1]} : vector<16x32xf32> to vector<16x8xf32>
    %566 = vector.shape_cast %565 : vector<16x8xf32> to vector<2x8x8xf32>
    "tpu.trace_start"() <{level = 10 : i32, message = "bqd,bkd->bqk"}> : () -> ()
    %cst_226 = arith.constant dense<0.000000e+00> : vector<2x8x8xf32>
    %567 = tpu.matmul %560, %564, %cst_226 {dimension_numbers = #tpu.dot_dimension_numbers<[2], [2], [1], [1], [0, 0, 0, 1, 1, 1], [0], [0]>} : vector<2x8x8xf32>, vector<2x8x8xf32>, vector<2x8x8xf32> -> vector<2x8x8xf32>
    "tpu.trace_stop"() : () -> ()
    %568 = vector.shape_cast %562 : vector<2x8x8xf32> to vector<2x8x1x8xf32>
    %569 = vector.extract_strided_slice %500 {offsets = [0, 0, 16], sizes = [8, 8, 8], strides = [1, 1, 1]} : vector<8x8x32xf32> to vector<8x8x8xf32>
    %570 = vector.shape_cast %569 : vector<8x8x8xf32> to vector<1x8x8x8xf32>
    %571 = vector.broadcast %568 : vector<2x8x1x8xf32> to vector<2x8x8x8xf32>
    %572 = vector.broadcast %570 : vector<1x8x8x8xf32> to vector<2x8x8x8xf32>
    %573 = arith.mulf %571, %572 : vector<2x8x8x8xf32>
    %cst_227 = arith.constant dense<0.000000e+00> : vector<2x8x8xf32>
    %574 = vector.multi_reduction <add>, %573, %cst_227 [3] : vector<2x8x8x8xf32> to vector<2x8x8xf32>
    %575 = arith.addf %567, %574 : vector<2x8x8xf32>
    %cst_228 = arith.constant dense<0xFF800000> : vector<2x8xf32>
    %576 = vector.multi_reduction <maximumf>, %575, %cst_228 [2] : vector<2x8x8xf32> to vector<2x8xf32>
    %577 = vector.shape_cast %576 : vector<2x8xf32> to vector<2x8x1xf32>
    %578 = vector.broadcast %577 : vector<2x8x1xf32> to vector<2x8x8xf32>
    %579 = arith.subf %575, %578 : vector<2x8x8xf32>
    %580 = math.exp %579 : vector<2x8x8xf32>
    %cst_229 = arith.constant dense<0.000000e+00> : vector<2x8xf32>
    %581 = vector.multi_reduction <add>, %580, %cst_229 [2] : vector<2x8x8xf32> to vector<2x8xf32>
    %582 = vector.shape_cast %581 : vector<2x8xf32> to vector<2x8x1xf32>
    %583 = tpu.reciprocal %582 {approx = true} : vector<2x8x1xf32> -> vector<2x8x1xf32>
    %584 = vector.broadcast %583 : vector<2x8x1xf32> to vector<2x8x8xf32>
    %585 = arith.mulf %580, %584 : vector<2x8x8xf32>
    "tpu.trace_start"() <{level = 10 : i32, message = "bqk,bkd->bqd"}> : () -> ()
    %cst_230 = arith.constant dense<0.000000e+00> : vector<2x8x8xf32>
    %586 = tpu.matmul %585, %566, %cst_230 {dimension_numbers = #tpu.dot_dimension_numbers<[2], [1], [1], [2], [0, 0, 0, 1, 1, 2], [0], [0]>} : vector<2x8x8xf32>, vector<2x8x8xf32>, vector<2x8x8xf32> -> vector<2x8x8xf32>
    "tpu.trace_stop"() : () -> ()
    %587 = vector.shape_cast %586 : vector<2x8x8xf32> to vector<16x8xf32>
    %588 = vector.extract_strided_slice %494 {offsets = [0, 24], sizes = [16, 8], strides = [1, 1]} : vector<16x32xf32> to vector<16x8xf32>
    %589 = vector.shape_cast %588 : vector<16x8xf32> to vector<2x8x8xf32>
    %590 = vector.extract_strided_slice %498 {offsets = [0, 24], sizes = [16, 8], strides = [1, 1]} : vector<16x32xf32> to vector<16x8xf32>
    %591 = vector.shape_cast %590 : vector<16x8xf32> to vector<2x8x8xf32>
    %592 = vector.extract_strided_slice %487 {offsets = [0, 24], sizes = [16, 8], strides = [1, 1]} : vector<16x32xf32> to vector<16x8xf32>
    %593 = vector.shape_cast %592 : vector<16x8xf32> to vector<2x8x8xf32>
    %594 = vector.extract_strided_slice %490 {offsets = [0, 24], sizes = [16, 8], strides = [1, 1]} : vector<16x32xf32> to vector<16x8xf32>
    %595 = vector.shape_cast %594 : vector<16x8xf32> to vector<2x8x8xf32>
    "tpu.trace_start"() <{level = 10 : i32, message = "bqd,bkd->bqk"}> : () -> ()
    %cst_231 = arith.constant dense<0.000000e+00> : vector<2x8x8xf32>
    %596 = tpu.matmul %589, %593, %cst_231 {dimension_numbers = #tpu.dot_dimension_numbers<[2], [2], [1], [1], [0, 0, 0, 1, 1, 1], [0], [0]>} : vector<2x8x8xf32>, vector<2x8x8xf32>, vector<2x8x8xf32> -> vector<2x8x8xf32>
    "tpu.trace_stop"() : () -> ()
    %597 = vector.shape_cast %591 : vector<2x8x8xf32> to vector<2x8x1x8xf32>
    %598 = vector.extract_strided_slice %500 {offsets = [0, 0, 24], sizes = [8, 8, 8], strides = [1, 1, 1]} : vector<8x8x32xf32> to vector<8x8x8xf32>
    %599 = vector.shape_cast %598 : vector<8x8x8xf32> to vector<1x8x8x8xf32>
    %600 = vector.broadcast %597 : vector<2x8x1x8xf32> to vector<2x8x8x8xf32>
    %601 = vector.broadcast %599 : vector<1x8x8x8xf32> to vector<2x8x8x8xf32>
    %602 = arith.mulf %600, %601 : vector<2x8x8x8xf32>
    %cst_232 = arith.constant dense<0.000000e+00> : vector<2x8x8xf32>
    %603 = vector.multi_reduction <add>, %602, %cst_232 [3] : vector<2x8x8x8xf32> to vector<2x8x8xf32>
    %604 = arith.addf %596, %603 : vector<2x8x8xf32>
    %cst_233 = arith.constant dense<0xFF800000> : vector<2x8xf32>
    %605 = vector.multi_reduction <maximumf>, %604, %cst_233 [2] : vector<2x8x8xf32> to vector<2x8xf32>
    %606 = vector.shape_cast %605 : vector<2x8xf32> to vector<2x8x1xf32>
    %607 = vector.broadcast %606 : vector<2x8x1xf32> to vector<2x8x8xf32>
    %608 = arith.subf %604, %607 : vector<2x8x8xf32>
    %609 = math.exp %608 : vector<2x8x8xf32>
    %cst_234 = arith.constant dense<0.000000e+00> : vector<2x8xf32>
    %610 = vector.multi_reduction <add>, %609, %cst_234 [2] : vector<2x8x8xf32> to vector<2x8xf32>
    %611 = vector.shape_cast %610 : vector<2x8xf32> to vector<2x8x1xf32>
    %612 = tpu.reciprocal %611 {approx = true} : vector<2x8x1xf32> -> vector<2x8x1xf32>
    %613 = vector.broadcast %612 : vector<2x8x1xf32> to vector<2x8x8xf32>
    %614 = arith.mulf %609, %613 : vector<2x8x8xf32>
    "tpu.trace_start"() <{level = 10 : i32, message = "bqk,bkd->bqd"}> : () -> ()
    %cst_235 = arith.constant dense<0.000000e+00> : vector<2x8x8xf32>
    %615 = tpu.matmul %614, %595, %cst_235 {dimension_numbers = #tpu.dot_dimension_numbers<[2], [1], [1], [2], [0, 0, 0, 1, 1, 2], [0], [0]>} : vector<2x8x8xf32>, vector<2x8x8xf32>, vector<2x8x8xf32> -> vector<2x8x8xf32>
    "tpu.trace_stop"() : () -> ()
    %616 = vector.shape_cast %615 : vector<2x8x8xf32> to vector<16x8xf32>
    %617 = tpu.concatenate %529, %558, %587, %616 in 1 : vector<16x8xf32>, vector<16x8xf32>, vector<16x8xf32>, vector<16x8xf32> -> vector<16x32xf32>
    %c12_236 = arith.constant 12 : index
    %c0_237 = arith.constant 0 : index
    %c0_238 = arith.constant 0 : index
    %618 = vector.load %arg1[%c12_236, %c0_237, %c0_238] : memref<18x32x64xbf16, #tpu.memory_space<vmem>>, vector<1x32x32xbf16>
    %619 = vector.shape_cast %618 : vector<1x32x32xbf16> to vector<32x32xbf16>
    %620 = arith.truncf %617 : vector<16x32xf32> to vector<16x32xbf16>
    %cst_239 = arith.constant dense<0.000000e+00> : vector<16x32xf32>
    %621 = tpu.matmul %620, %619, %cst_239 {dimension_numbers = #tpu.dot_dimension_numbers<[1], [0], [0], [1], [0, 0, 1, 1], [], []>} : vector<16x32xbf16>, vector<32x32xbf16>, vector<16x32xf32> -> vector<16x32xf32>
    %c1_240 = arith.constant 1 : index
    %c8_241 = arith.constant 8 : index
    %c0_242 = arith.constant 0 : index
    %622 = vector.load %arg4[%c1_240, %c8_241, %c0_242] : memref<2x25x64xf32, #tpu.memory_space<vmem>>, vector<1x1x32xf32>
    %623 = vector.shape_cast %622 : vector<1x1x32xf32> to vector<1x32xf32>
    %624 = vector.broadcast %623 : vector<1x32xf32> to vector<16x32xf32>
    %625 = arith.addf %621, %624 : vector<16x32xf32>
    %626 = arith.addf %454, %625 : vector<16x32xf32>
    %c1_243 = arith.constant 1 : index
    %c9_244 = arith.constant 9 : index
    %c0_245 = arith.constant 0 : index
    %627 = vector.load %arg4[%c1_243, %c9_244, %c0_245] : memref<2x25x64xf32, #tpu.memory_space<vmem>>, vector<1x1x32xf32>
    %628 = vector.shape_cast %627 : vector<1x1x32xf32> to vector<1x32xf32>
    %c1_246 = arith.constant 1 : index
    %c10_247 = arith.constant 10 : index
    %c0_248 = arith.constant 0 : index
    %629 = vector.load %arg4[%c1_246, %c10_247, %c0_248] : memref<2x25x64xf32, #tpu.memory_space<vmem>>, vector<1x1x32xf32>
    %630 = vector.shape_cast %629 : vector<1x1x32xf32> to vector<1x32xf32>
    %cst_249 = arith.constant dense<0.000000e+00> : vector<16xf32>
    %631 = vector.multi_reduction <add>, %626, %cst_249 [1] : vector<16x32xf32> to vector<16xf32>
    %632 = vector.shape_cast %631 : vector<16xf32> to vector<16x1xf32>
    %cst_250 = arith.constant 3.200000e+01 : f32
    %633 = vector.broadcast %cst_250 : f32 to vector<16x1xf32>
    %634 = arith.divf %632, %633 : vector<16x1xf32>
    %635 = vector.broadcast %634 : vector<16x1xf32> to vector<16x32xf32>
    %636 = arith.subf %626, %635 : vector<16x32xf32>
    %637 = arith.mulf %636, %636 : vector<16x32xf32>
    %cst_251 = arith.constant dense<0.000000e+00> : vector<16xf32>
    %638 = vector.multi_reduction <add>, %637, %cst_251 [1] : vector<16x32xf32> to vector<16xf32>
    %639 = vector.shape_cast %638 : vector<16xf32> to vector<16x1xf32>
    %cst_252 = arith.constant 3.200000e+01 : f32
    %640 = vector.broadcast %cst_252 : f32 to vector<16x1xf32>
    %641 = arith.divf %639, %640 : vector<16x1xf32>
    %642 = vector.broadcast %634 : vector<16x1xf32> to vector<16x32xf32>
    %643 = arith.subf %626, %642 : vector<16x32xf32>
    %cst_253 = arith.constant 9.99999974E-6 : f32
    %644 = vector.broadcast %cst_253 : f32 to vector<16x1xf32>
    %645 = arith.addf %641, %644 : vector<16x1xf32>
    %646 = math.rsqrt %645 : vector<16x1xf32>
    %647 = vector.broadcast %646 : vector<16x1xf32> to vector<16x32xf32>
    %648 = arith.mulf %643, %647 : vector<16x32xf32>
    %649 = vector.broadcast %628 : vector<1x32xf32> to vector<16x32xf32>
    %650 = arith.mulf %648, %649 : vector<16x32xf32>
    %651 = vector.broadcast %630 : vector<1x32xf32> to vector<16x32xf32>
    %652 = arith.addf %650, %651 : vector<16x32xf32>
    %653 = arith.truncf %652 : vector<16x32xf32> to vector<16x32xbf16>
    %c13_254 = arith.constant 13 : index
    %c0_255 = arith.constant 0 : index
    %c0_256 = arith.constant 0 : index
    %654 = vector.load %arg1[%c13_254, %c0_255, %c0_256] : memref<18x32x64xbf16, #tpu.memory_space<vmem>>, vector<1x32x32xbf16>
    %655 = vector.shape_cast %654 : vector<1x32x32xbf16> to vector<32x32xbf16>
    %cst_257 = arith.constant dense<0.000000e+00> : vector<16x32xf32>
    %656 = tpu.matmul %653, %655, %cst_257 {dimension_numbers = #tpu.dot_dimension_numbers<[1], [0], [0], [1], [0, 0, 1, 1], [], []>} : vector<16x32xbf16>, vector<32x32xbf16>, vector<16x32xf32> -> vector<16x32xf32>
    %c1_258 = arith.constant 1 : index
    %c11_259 = arith.constant 11 : index
    %c0_260 = arith.constant 0 : index
    %657 = vector.load %arg4[%c1_258, %c11_259, %c0_260] : memref<2x25x64xf32, #tpu.memory_space<vmem>>, vector<1x1x32xf32>
    %658 = vector.shape_cast %657 : vector<1x1x32xf32> to vector<1x32xf32>
    %659 = vector.broadcast %658 : vector<1x32xf32> to vector<16x32xf32>
    %660 = arith.addf %656, %659 : vector<16x32xf32>
    %c14_261 = arith.constant 14 : index
    %c0_262 = arith.constant 0 : index
    %c0_263 = arith.constant 0 : index
    %661 = vector.load %arg1[%c14_261, %c0_262, %c0_263] : memref<18x32x64xbf16, #tpu.memory_space<vmem>>, vector<1x32x32xbf16>
    %662 = vector.shape_cast %661 : vector<1x32x32xbf16> to vector<32x32xbf16>
    %cst_264 = arith.constant dense<0.000000e+00> : vector<16x32xf32>
    %663 = tpu.matmul %653, %662, %cst_264 {dimension_numbers = #tpu.dot_dimension_numbers<[1], [0], [0], [1], [0, 0, 1, 1], [], []>} : vector<16x32xbf16>, vector<32x32xbf16>, vector<16x32xf32> -> vector<16x32xf32>
    %c1_265 = arith.constant 1 : index
    %c12_266 = arith.constant 12 : index
    %c0_267 = arith.constant 0 : index
    %664 = vector.load %arg4[%c1_265, %c12_266, %c0_267] : memref<2x25x64xf32, #tpu.memory_space<vmem>>, vector<1x1x32xf32>
    %665 = vector.shape_cast %664 : vector<1x1x32xf32> to vector<1x32xf32>
    %666 = vector.broadcast %665 : vector<1x32xf32> to vector<16x32xf32>
    %667 = arith.addf %663, %666 : vector<16x32xf32>
    %668 = arith.negf %667 : vector<16x32xf32>
    %669 = math.exp %668 : vector<16x32xf32>
    %cst_268 = arith.constant 1.000000e+00 : f32
    %670 = vector.broadcast %cst_268 : f32 to vector<16x32xf32>
    %671 = arith.addf %670, %669 : vector<16x32xf32>
    %672 = arith.divf %670, %671 : vector<16x32xf32>
    %673 = arith.mulf %660, %672 : vector<16x32xf32>
    %674 = vector.shape_cast %673 : vector<16x32xf32> to vector<2x8x32xf32>
    %675 = vector.shape_cast %674 : vector<2x8x32xf32> to vector<2x8x1x32xf32>
    %c3_269 = arith.constant 3 : index
    %c0_270 = arith.constant 0 : index
    %c0_271 = arith.constant 0 : index
    %c0_272 = arith.constant 0 : index
    %676 = vector.load %arg3[%c3_269, %c0_270, %c0_271, %c0_272] : memref<4x8x8x32xf32, #tpu.memory_space<vmem>>, vector<1x8x8x32xf32>
    %677 = vector.shape_cast %676 : vector<1x8x8x32xf32> to vector<8x8x32xf32>
    %678 = vector.shape_cast %677 : vector<8x8x32xf32> to vector<1x8x8x32xf32>
    %679 = vector.broadcast %675 : vector<2x8x1x32xf32> to vector<2x8x8x32xf32>
    %680 = vector.broadcast %678 : vector<1x8x8x32xf32> to vector<2x8x8x32xf32>
    %681 = arith.mulf %679, %680 : vector<2x8x8x32xf32>
    %cst_273 = arith.constant dense<0.000000e+00> : vector<2x8x32xf32>
    %682 = vector.multi_reduction <add>, %681, %cst_273 [1] : vector<2x8x8x32xf32> to vector<2x8x32xf32>
    %c1_274 = arith.constant 1 : index
    %c13_275 = arith.constant 13 : index
    %c0_276 = arith.constant 0 : index
    %683 = vector.load %arg4[%c1_274, %c13_275, %c0_276] : memref<2x25x64xf32, #tpu.memory_space<vmem>>, vector<1x1x32xf32>
    %684 = vector.shape_cast %683 : vector<1x1x32xf32> to vector<1x32xf32>
    %685 = vector.shape_cast %684 : vector<1x32xf32> to vector<1x1x32xf32>
    %686 = vector.broadcast %685 : vector<1x1x32xf32> to vector<2x8x32xf32>
    %687 = arith.addf %682, %686 : vector<2x8x32xf32>
    %688 = vector.shape_cast %687 : vector<2x8x32xf32> to vector<16x32xf32>
    %c1_277 = arith.constant 1 : index
    %c14_278 = arith.constant 14 : index
    %c0_279 = arith.constant 0 : index
    %689 = vector.load %arg4[%c1_277, %c14_278, %c0_279] : memref<2x25x64xf32, #tpu.memory_space<vmem>>, vector<1x1x32xf32>
    %690 = vector.shape_cast %689 : vector<1x1x32xf32> to vector<1x32xf32>
    %c1_280 = arith.constant 1 : index
    %c15_281 = arith.constant 15 : index
    %c0_282 = arith.constant 0 : index
    %691 = vector.load %arg4[%c1_280, %c15_281, %c0_282] : memref<2x25x64xf32, #tpu.memory_space<vmem>>, vector<1x1x32xf32>
    %692 = vector.shape_cast %691 : vector<1x1x32xf32> to vector<1x32xf32>
    %cst_283 = arith.constant dense<0.000000e+00> : vector<16xf32>
    %693 = vector.multi_reduction <add>, %688, %cst_283 [1] : vector<16x32xf32> to vector<16xf32>
    %694 = vector.shape_cast %693 : vector<16xf32> to vector<16x1xf32>
    %cst_284 = arith.constant 3.200000e+01 : f32
    %695 = vector.broadcast %cst_284 : f32 to vector<16x1xf32>
    %696 = arith.divf %694, %695 : vector<16x1xf32>
    %697 = vector.broadcast %696 : vector<16x1xf32> to vector<16x32xf32>
    %698 = arith.subf %688, %697 : vector<16x32xf32>
    %699 = arith.mulf %698, %698 : vector<16x32xf32>
    %cst_285 = arith.constant dense<0.000000e+00> : vector<16xf32>
    %700 = vector.multi_reduction <add>, %699, %cst_285 [1] : vector<16x32xf32> to vector<16xf32>
    %701 = vector.shape_cast %700 : vector<16xf32> to vector<16x1xf32>
    %cst_286 = arith.constant 3.200000e+01 : f32
    %702 = vector.broadcast %cst_286 : f32 to vector<16x1xf32>
    %703 = arith.divf %701, %702 : vector<16x1xf32>
    %704 = vector.broadcast %696 : vector<16x1xf32> to vector<16x32xf32>
    %705 = arith.subf %688, %704 : vector<16x32xf32>
    %cst_287 = arith.constant 9.99999974E-6 : f32
    %706 = vector.broadcast %cst_287 : f32 to vector<16x1xf32>
    %707 = arith.addf %703, %706 : vector<16x1xf32>
    %708 = math.rsqrt %707 : vector<16x1xf32>
    %709 = vector.broadcast %708 : vector<16x1xf32> to vector<16x32xf32>
    %710 = arith.mulf %705, %709 : vector<16x32xf32>
    %711 = vector.broadcast %690 : vector<1x32xf32> to vector<16x32xf32>
    %712 = arith.mulf %710, %711 : vector<16x32xf32>
    %713 = vector.broadcast %692 : vector<1x32xf32> to vector<16x32xf32>
    %714 = arith.addf %712, %713 : vector<16x32xf32>
    %715 = arith.negf %714 : vector<16x32xf32>
    %716 = math.exp %715 : vector<16x32xf32>
    %cst_288 = arith.constant 1.000000e+00 : f32
    %717 = vector.broadcast %cst_288 : f32 to vector<16x32xf32>
    %718 = arith.addf %717, %716 : vector<16x32xf32>
    %719 = arith.divf %717, %718 : vector<16x32xf32>
    %720 = arith.mulf %714, %719 : vector<16x32xf32>
    %c15_289 = arith.constant 15 : index
    %c0_290 = arith.constant 0 : index
    %c0_291 = arith.constant 0 : index
    %721 = vector.load %arg1[%c15_289, %c0_290, %c0_291] : memref<18x32x64xbf16, #tpu.memory_space<vmem>>, vector<1x32x32xbf16>
    %722 = vector.shape_cast %721 : vector<1x32x32xbf16> to vector<32x32xbf16>
    %723 = arith.truncf %720 : vector<16x32xf32> to vector<16x32xbf16>
    %cst_292 = arith.constant dense<0.000000e+00> : vector<16x32xf32>
    %724 = tpu.matmul %723, %722, %cst_292 {dimension_numbers = #tpu.dot_dimension_numbers<[1], [0], [0], [1], [0, 0, 1, 1], [], []>} : vector<16x32xbf16>, vector<32x32xbf16>, vector<16x32xf32> -> vector<16x32xf32>
    %c1_293 = arith.constant 1 : index
    %c16_294 = arith.constant 16 : index
    %c0_295 = arith.constant 0 : index
    %725 = vector.load %arg4[%c1_293, %c16_294, %c0_295] : memref<2x25x64xf32, #tpu.memory_space<vmem>>, vector<1x1x32xf32>
    %726 = vector.shape_cast %725 : vector<1x1x32xf32> to vector<1x32xf32>
    %727 = vector.broadcast %726 : vector<1x32xf32> to vector<16x32xf32>
    %728 = arith.addf %724, %727 : vector<16x32xf32>
    %729 = arith.addf %626, %728 : vector<16x32xf32>
    %c1_296 = arith.constant 1 : index
    %c17_297 = arith.constant 17 : index
    %c0_298 = arith.constant 0 : index
    %730 = vector.load %arg4[%c1_296, %c17_297, %c0_298] : memref<2x25x64xf32, #tpu.memory_space<vmem>>, vector<1x1x32xf32>
    %731 = vector.shape_cast %730 : vector<1x1x32xf32> to vector<1x32xf32>
    %c1_299 = arith.constant 1 : index
    %c18_300 = arith.constant 18 : index
    %c0_301 = arith.constant 0 : index
    %732 = vector.load %arg4[%c1_299, %c18_300, %c0_301] : memref<2x25x64xf32, #tpu.memory_space<vmem>>, vector<1x1x32xf32>
    %733 = vector.shape_cast %732 : vector<1x1x32xf32> to vector<1x32xf32>
    %cst_302 = arith.constant dense<0.000000e+00> : vector<16xf32>
    %734 = vector.multi_reduction <add>, %729, %cst_302 [1] : vector<16x32xf32> to vector<16xf32>
    %735 = vector.shape_cast %734 : vector<16xf32> to vector<16x1xf32>
    %cst_303 = arith.constant 3.200000e+01 : f32
    %736 = vector.broadcast %cst_303 : f32 to vector<16x1xf32>
    %737 = arith.divf %735, %736 : vector<16x1xf32>
    %738 = vector.broadcast %737 : vector<16x1xf32> to vector<16x32xf32>
    %739 = arith.subf %729, %738 : vector<16x32xf32>
    %740 = arith.mulf %739, %739 : vector<16x32xf32>
    %cst_304 = arith.constant dense<0.000000e+00> : vector<16xf32>
    %741 = vector.multi_reduction <add>, %740, %cst_304 [1] : vector<16x32xf32> to vector<16xf32>
    %742 = vector.shape_cast %741 : vector<16xf32> to vector<16x1xf32>
    %cst_305 = arith.constant 3.200000e+01 : f32
    %743 = vector.broadcast %cst_305 : f32 to vector<16x1xf32>
    %744 = arith.divf %742, %743 : vector<16x1xf32>
    %745 = vector.broadcast %737 : vector<16x1xf32> to vector<16x32xf32>
    %746 = arith.subf %729, %745 : vector<16x32xf32>
    %cst_306 = arith.constant 9.99999974E-6 : f32
    %747 = vector.broadcast %cst_306 : f32 to vector<16x1xf32>
    %748 = arith.addf %744, %747 : vector<16x1xf32>
    %749 = math.rsqrt %748 : vector<16x1xf32>
    %750 = vector.broadcast %749 : vector<16x1xf32> to vector<16x32xf32>
    %751 = arith.mulf %746, %750 : vector<16x32xf32>
    %752 = vector.broadcast %731 : vector<1x32xf32> to vector<16x32xf32>
    %753 = arith.mulf %751, %752 : vector<16x32xf32>
    %754 = vector.broadcast %733 : vector<1x32xf32> to vector<16x32xf32>
    %755 = arith.addf %753, %754 : vector<16x32xf32>
    %c17_307 = arith.constant 17 : index
    %c0_308 = arith.constant 0 : index
    %c0_309 = arith.constant 0 : index
    %756 = vector.load %arg1[%c17_307, %c0_308, %c0_309] : memref<18x32x64xbf16, #tpu.memory_space<vmem>>, vector<1x32x64xbf16>
    %757 = vector.shape_cast %756 : vector<1x32x64xbf16> to vector<32x64xbf16>
    %758 = arith.truncf %755 : vector<16x32xf32> to vector<16x32xbf16>
    %cst_310 = arith.constant dense<0.000000e+00> : vector<16x64xf32>
    %759 = tpu.matmul %758, %757, %cst_310 {dimension_numbers = #tpu.dot_dimension_numbers<[1], [0], [0], [1], [0, 0, 1, 1], [], []>} : vector<16x32xbf16>, vector<32x64xbf16>, vector<16x64xf32> -> vector<16x64xf32>
    %c1_311 = arith.constant 1 : index
    %c19_312 = arith.constant 19 : index
    %c0_313 = arith.constant 0 : index
    %760 = vector.load %arg4[%c1_311, %c19_312, %c0_313] : memref<2x25x64xf32, #tpu.memory_space<vmem>>, vector<1x1x64xf32>
    %761 = vector.shape_cast %760 : vector<1x1x64xf32> to vector<1x64xf32>
    %762 = vector.broadcast %761 : vector<1x64xf32> to vector<16x64xf32>
    %763 = arith.addf %759, %762 : vector<16x64xf32>
    %764 = arith.negf %763 : vector<16x64xf32>
    %765 = math.exp %764 : vector<16x64xf32>
    %cst_314 = arith.constant 1.000000e+00 : f32
    %766 = vector.broadcast %cst_314 : f32 to vector<16x64xf32>
    %767 = arith.addf %766, %765 : vector<16x64xf32>
    %768 = arith.divf %766, %767 : vector<16x64xf32>
    %769 = arith.mulf %763, %768 : vector<16x64xf32>
    %c3_315 = arith.constant 3 : index
    %c0_316 = arith.constant 0 : index
    %c0_317 = arith.constant 0 : index
    %770 = vector.load %arg2[%c3_315, %c0_316, %c0_317] : memref<4x64x32xbf16, #tpu.memory_space<vmem>>, vector<1x64x32xbf16>
    %771 = vector.shape_cast %770 : vector<1x64x32xbf16> to vector<64x32xbf16>
    %772 = arith.truncf %769 : vector<16x64xf32> to vector<16x64xbf16>
    %cst_318 = arith.constant dense<0.000000e+00> : vector<16x32xf32>
    %773 = tpu.matmul %772, %771, %cst_318 {dimension_numbers = #tpu.dot_dimension_numbers<[1], [0], [0], [1], [0, 0, 1, 1], [], []>} : vector<16x64xbf16>, vector<64x32xbf16>, vector<16x32xf32> -> vector<16x32xf32>
    %c1_319 = arith.constant 1 : index
    %c20_320 = arith.constant 20 : index
    %c0_321 = arith.constant 0 : index
    %774 = vector.load %arg4[%c1_319, %c20_320, %c0_321] : memref<2x25x64xf32, #tpu.memory_space<vmem>>, vector<1x1x32xf32>
    %775 = vector.shape_cast %774 : vector<1x1x32xf32> to vector<1x32xf32>
    %776 = vector.broadcast %775 : vector<1x32xf32> to vector<16x32xf32>
    %777 = arith.addf %773, %776 : vector<16x32xf32>
    %cst_322 = arith.constant 5.000000e-01 : f32
    %778 = vector.broadcast %cst_322 : f32 to vector<16x32xf32>
    %779 = arith.mulf %778, %777 : vector<16x32xf32>
    %780 = arith.addf %729, %779 : vector<16x32xf32>
    %c1_323 = arith.constant 1 : index
    %c21_324 = arith.constant 21 : index
    %c0_325 = arith.constant 0 : index
    %781 = vector.load %arg4[%c1_323, %c21_324, %c0_325] : memref<2x25x64xf32, #tpu.memory_space<vmem>>, vector<1x1x32xf32>
    %782 = vector.shape_cast %781 : vector<1x1x32xf32> to vector<1x32xf32>
    %c1_326 = arith.constant 1 : index
    %c22_327 = arith.constant 22 : index
    %c0_328 = arith.constant 0 : index
    %783 = vector.load %arg4[%c1_326, %c22_327, %c0_328] : memref<2x25x64xf32, #tpu.memory_space<vmem>>, vector<1x1x32xf32>
    %784 = vector.shape_cast %783 : vector<1x1x32xf32> to vector<1x32xf32>
    %cst_329 = arith.constant dense<0.000000e+00> : vector<16xf32>
    %785 = vector.multi_reduction <add>, %780, %cst_329 [1] : vector<16x32xf32> to vector<16xf32>
    %786 = vector.shape_cast %785 : vector<16xf32> to vector<16x1xf32>
    %cst_330 = arith.constant 3.200000e+01 : f32
    %787 = vector.broadcast %cst_330 : f32 to vector<16x1xf32>
    %788 = arith.divf %786, %787 : vector<16x1xf32>
    %789 = vector.broadcast %788 : vector<16x1xf32> to vector<16x32xf32>
    %790 = arith.subf %780, %789 : vector<16x32xf32>
    %791 = arith.mulf %790, %790 : vector<16x32xf32>
    %cst_331 = arith.constant dense<0.000000e+00> : vector<16xf32>
    %792 = vector.multi_reduction <add>, %791, %cst_331 [1] : vector<16x32xf32> to vector<16xf32>
    %793 = vector.shape_cast %792 : vector<16xf32> to vector<16x1xf32>
    %cst_332 = arith.constant 3.200000e+01 : f32
    %794 = vector.broadcast %cst_332 : f32 to vector<16x1xf32>
    %795 = arith.divf %793, %794 : vector<16x1xf32>
    %796 = vector.broadcast %788 : vector<16x1xf32> to vector<16x32xf32>
    %797 = arith.subf %780, %796 : vector<16x32xf32>
    %cst_333 = arith.constant 9.99999974E-6 : f32
    %798 = vector.broadcast %cst_333 : f32 to vector<16x1xf32>
    %799 = arith.addf %795, %798 : vector<16x1xf32>
    %800 = math.rsqrt %799 : vector<16x1xf32>
    %801 = vector.broadcast %800 : vector<16x1xf32> to vector<16x32xf32>
    %802 = arith.mulf %797, %801 : vector<16x32xf32>
    %803 = vector.broadcast %782 : vector<1x32xf32> to vector<16x32xf32>
    %804 = arith.mulf %802, %803 : vector<16x32xf32>
    %805 = vector.broadcast %784 : vector<1x32xf32> to vector<16x32xf32>
    %806 = arith.addf %804, %805 : vector<16x32xf32>
    %c0_334 = arith.constant 0 : index
    %c23 = arith.constant 23 : index
    %c0_335 = arith.constant 0 : index
    %807 = vector.load %arg4[%c0_334, %c23, %c0_335] : memref<2x25x64xf32, #tpu.memory_space<vmem>>, vector<1x1x32xf32>
    %808 = vector.shape_cast %807 : vector<1x1x32xf32> to vector<1x32xf32>
    %c0_336 = arith.constant 0 : index
    %c24 = arith.constant 24 : index
    %c0_337 = arith.constant 0 : index
    %809 = vector.load %arg4[%c0_336, %c24, %c0_337] : memref<2x25x64xf32, #tpu.memory_space<vmem>>, vector<1x1x32xf32>
    %810 = vector.shape_cast %809 : vector<1x1x32xf32> to vector<1x32xf32>
    %cst_338 = arith.constant dense<0.000000e+00> : vector<16xf32>
    %811 = vector.multi_reduction <add>, %806, %cst_338 [1] : vector<16x32xf32> to vector<16xf32>
    %812 = vector.shape_cast %811 : vector<16xf32> to vector<16x1xf32>
    %cst_339 = arith.constant 3.200000e+01 : f32
    %813 = vector.broadcast %cst_339 : f32 to vector<16x1xf32>
    %814 = arith.divf %812, %813 : vector<16x1xf32>
    %815 = vector.broadcast %814 : vector<16x1xf32> to vector<16x32xf32>
    %816 = arith.subf %806, %815 : vector<16x32xf32>
    %817 = arith.mulf %816, %816 : vector<16x32xf32>
    %cst_340 = arith.constant dense<0.000000e+00> : vector<16xf32>
    %818 = vector.multi_reduction <add>, %817, %cst_340 [1] : vector<16x32xf32> to vector<16xf32>
    %819 = vector.shape_cast %818 : vector<16xf32> to vector<16x1xf32>
    %cst_341 = arith.constant 3.200000e+01 : f32
    %820 = vector.broadcast %cst_341 : f32 to vector<16x1xf32>
    %821 = arith.divf %819, %820 : vector<16x1xf32>
    %822 = vector.broadcast %814 : vector<16x1xf32> to vector<16x32xf32>
    %823 = arith.subf %806, %822 : vector<16x32xf32>
    %cst_342 = arith.constant 9.99999997E-7 : f32
    %824 = vector.broadcast %cst_342 : f32 to vector<16x1xf32>
    %825 = arith.addf %821, %824 : vector<16x1xf32>
    %826 = math.rsqrt %825 : vector<16x1xf32>
    %827 = vector.broadcast %826 : vector<16x1xf32> to vector<16x32xf32>
    %828 = arith.mulf %823, %827 : vector<16x32xf32>
    %829 = vector.broadcast %808 : vector<1x32xf32> to vector<16x32xf32>
    %830 = arith.mulf %828, %829 : vector<16x32xf32>
    %831 = vector.broadcast %810 : vector<1x32xf32> to vector<16x32xf32>
    %832 = arith.addf %830, %831 : vector<16x32xf32>
    %c0_343 = arith.constant 0 : index
    %c0_344 = arith.constant 0 : index
    %833 = vector.load %arg5[%c0_343, %c0_344] : memref<16x32xf32, #tpu.memory_space<vmem>>, vector<16x32xf32>
    tpu.vector_store %arg5[%c0_343, %c0_344], %832 {strides = array<i32>} : memref<16x32xf32, #tpu.memory_space<vmem>>, vector<16x32xf32>,
    return
  }
}

</mosaic_0001>

<bundles_post_ra>
// kernel: cus_encoder_forward.1
= control target key start
LH: loop header
LB: loop body
LE: loop exit
PB: predicated region body
PF: predicated region fallthrough
CT: control target
= control target key end

     0   :  { %vm26_vm0 = vcmask 261120   ;;  %s10240_s0 = inlined_call_operand.vmem [shape: f32[16,32], index: 0, kind: input, shape index: {}]   ;;  %s10241_s1 = inlined_call_operand.vmem [shape: bf16[18,32,64], index: 1, kind: input, shape index: {}]   ;;  %s10242_s2 = inlined_call_operand.vmem [shape: bf16[4,64,32], index: 2, kind: input, shape index: {}]   ;;  %s10243_s3 = inlined_call_operand.vmem [shape: f32[4,8,8,32], index: 3, kind: input, shape index: {}]   ;;  %s10244_s4 = inlined_call_operand.vmem [shape: f32[2,25,64], index: 4, kind: input, shape index: {}]   ;;  %s10245_s5 = inlined_call_operand.hbm [shape: f32[16,32], index: 5, kind: output, shape index: {}]  }
   0x1   :  { %v8427_v0 = vld [vmem:[%s10240_s0] sm:$0xff]  ;;  %v8432_v1 = vld [vmem:[%s10240_s0 + $0x8] sm:$0xff] }
   0x2   :  { %v27_v2 = vsel %vm26_vm0, %v8427_v0, 0.0  ;;  %v30_v3 = vsel %vm26_vm0, %v8432_v1, 0.0 }
   0x3   :  { %28 = vadd.xlane.f32.xlu0 %v27_v2 }
   0x7   :  { %31 = vadd.xlane.f32.xlu0 %v30_v3 }
   0x8   :  { %10 = vsyncpa [#allocation3], 0  ;;  %v8129_v14 = vld [vmem:[%s10241_s1 + $0x78] sm:$0xff]   ;;  %v8383_v15 = vmov 0.0   ;;  %vm8384_vm1 = vmmov 0   ;;  %v8130_v16 = vld [vmem:[%s10241_s1 + $0x70] sm:$0xff]  }
   0x9   :  { %7736 = vmatprep.subr.bf16.mxu0 %v8383_v15  ;;  %7740 = vmatprep.mubr.msk.bf16.mxu0 %vm8384_vm1, %v8383_v15  ;;  %v7273_v25 = vld [vmem:[%s10244_s4] ss:$0 sm:$0xff]  ;;  %v7274_v29 = vld [vmem:[%s10244_s4 + $0x1] ss:$0 sm:$0xff]  ;;  %v8131_v34 = vld [vmem:[%s10242_s2 + $0x18] sm:$0xff]   ;;  %vm185_vm2 = vcmask 523264  }
   0xa   :  { %7737 = vmatpush3.bf16.msra.mxu0 %v8129_v14  ;;  %7744 = vmatprep.subr.bf16.mxu1 %v8383_v15  ;;  %v8132_v35 = vld [vmem:[%s10242_s2 + $0x10] sm:$0xff]   ;;  %v8133_v36 = vld [vmem:[%s10242_s2 + $0x8] sm:$0xff]   ;;  %v8134_v37 = vld [vmem:[%s10242_s2] sm:$0xff]   ;;  %vm669_vm3 = vcmask 64512   ;;  %vm760_vm4 = vcmask 1041409   ;;  %vm762_vm5 = vcmask 1042434  }
   0xb   :  { %7738 = vmatprep.subr.bf16.mxu0 %v8383_v15  ;;  %7752 = vmatprep.mubr.msk.bf16.mxu1 %vm8384_vm1, %v8383_v15  ;;  %v7279_v38 = vld [vmem:[%s10244_s4 + $0x2] ss:$0 sm:$0xff]  ;;  %v7285_v56 = vld [vmem:[%s10244_s4 + $0x3] ss:$0 sm:$0xff]  ;;  %vm764_vm6 = vcmask 1043459   ;;  %vm766_vm7 = vcmask 1044484  }
   0xc   :  { %7745 = vmatpush3.bf16.msra.mxu1 %v8131_v34  ;;  %vm768_vm8 = vcmask 1045509   ;;  %vm770_vm9 = vcmask 1046534   ;;  %vm772_vm10 = vcmask 1047559   ;;  %s8386_s25 = smov 120   ;;  %s8387_s26 = smov 112   ;;  %vm2753_vm11 = vcmask 130048  }
   0xd   :  { %7746 = vmatprep.subr.bf16.mxu1 %v8383_v15  ;;  %s8388_s27 = smov 104   ;;  %s8389_s28 = smov 8   ;;  %vm2756_vm12 = vcmask 195584  }
   0xe   :  { %7739 = vmatpush3.bf16.msra.mxu0 %v8130_v16  ;;  %v8135_v16 = vld [vmem:[%s10241_s1 + $0x8] sm:$0xff]   ;;  %s8390_s29 = smov 16   ;;  %s8391_s9 = smov 24  }
   0xf   :  { %7756 = vmatprep.subr.bf16.mxu0 %v8383_v15  ;;  %s8392_s15 = smov [#allocation2]  }
  0x10   :  { %7747 = vmatpush3.bf16.msra.mxu1 %v8132_v35 }
  0x11   :  { %7748 = vmatprep.subr.bf16.mxu1 %v8383_v15 }
  0x14   :  { %7749 = vmatpush3.bf16.msra.mxu1 %v8133_v36  ;;  %v8139_v36 = vld [vmem:[%s10241_s1 + $0x18] sm:$0xff]  }
  0x15   :  { %7750 = vmatprep.subr.bf16.mxu1 %v8383_v15 }
  0x18   :  { %7751 = vmatpush3.bf16.msra.mxu1 %v8134_v37 }
  0x19   :  { %7772 = vmatprep.subr.bf16.mxu1 %v8383_v15 }
  0x8c   :  { %v29_v4 = vpop.xlane.xlu0 %28 }
  0x8d   :  { %v34_v5 = vmul.f32 0.03125, %v29_v4 }
  0x8f   :  { %v36_v6 = vsub.f32 %v8427_v0, %v34_v5 }
  0x90   :  { %v32_v7 = vpop.xlane.xlu0 %31 }
  0x91   :  { %v35_v8 = vmul.f32 0.03125, %v32_v7  ;;  %v38_v9 = vmul.f32 %v36_v6, %v36_v6 }
  0x93   :  { %v37_v10 = vsub.f32 %v8432_v1, %v35_v8  ;;  %v40_v11 = vsel %vm26_vm0, %v38_v9, 0.0 }
  0x94   :  { %41 = vadd.xlane.f32.xlu1 %v40_v11 }
  0x95   :  { %v39_v12 = vmul.f32 %v37_v10, %v37_v10 }
  0x97   :  { %v43_v13 = vsel %vm26_vm0, %v39_v12, 0.0 }
  0x98   :  { %44 = vadd.xlane.f32.xlu1 %v43_v13 }
 0x11d   :  { %v42_v17 = vpop.xlane.xlu1 %41 }
 0x11e   :  { %v46_v18 = vmul.f32 0.03125, %v42_v17  ;;  %v8136_v17 = vld [vmem:[%s10241_s1 + $0x28] sm:$0xff]  }
 0x120   :  { %v48_v19 = vadd.f32 1e-05, %v46_v18  ;;  %v8137_v18 = vld [vmem:[%s10241_s1] sm:$0xff]  }
 0x121   :  { %v45_v20 = vpop.xlane.xlu1 %44 }
 0x122   :  { %8181 = vrsqrt.f32 %v48_v19  ;;  %v47_v21 = vmul.f32 0.03125, %v45_v20  ;;  %v8138_v19 = vld [vmem:[%s10241_s1 + $0x20] sm:$0xff]  }
 0x124   :  { %v49_v22 = vadd.f32 1e-05, %v47_v21 }
 0x126   :  { %8183 = vrsqrt.f32 %v49_v22 }
 0x12f   :  { %v8182_v23 = vpop.eup %8181 }
 0x130   :  { %v52_v24 = vmul.f32 %v8182_v23, %v36_v6 }
 0x132   :  { %v58_v28 = vmul.f32 %v7273_v25, %v52_v24 }
 0x133   :  { %v8184_v26 = vpop.eup %8183 }
 0x134   :  { %v53_v27 = vmul.f32 %v8184_v26, %v37_v10  ;;  %v64_v31 = vadd.f32 %v7274_v29, %v58_v28  ;;  %v7291_v28 = vld [vmem:[%s10244_s4 + $0x4] ss:$0 sm:$0xff] }
 0x136   :  { %v59_v30 = vmul.f32 %v7273_v25, %v53_v27 }
 0x138   :  { %v65_v32 = vadd.f32 %v7274_v29, %v59_v30 }
 0x13a   :  { %v71_v33 = vpack.c.bf16 %v65_v32, %v64_v31  ;;  %v7292_v32 = vld [vmem:[%s10244_s4 + $0x5] ss:$0 sm:$0xff] }
 0x13c   :  { %7741 = vmatmul.mubr.msk.bf16.vlgmr.msra.gmra.mxu0 %vm26_vm0, %v71_v33 }
 0x13d   :  { %7760 = vmatprep.mubr.msk.bf16.mxu0 %vm8384_vm1, %v8383_v15  ;;  %7757 = vmatpush3.bf16.msra.mxu0 %v8135_v16 }
 0x13e   :  { %7758 = vmatprep.subr.bf16.mxu0 %v8383_v15 }
 0x141   :  { %7759 = vmatpush3.bf16.msra.mxu0 %v8137_v18 }
 0x142   :  { %7764 = vmatprep.subr.bf16.mxu0 %v8383_v15 }
 0x1fc   :  { %v126_v39 = vpop.f32.mrf.mxu0 }
 0x1fd   :  { %v127_v40 = vadd.f32 %v7279_v38, %v126_v39  ;;  %v479_v39 = vlaneseq }
 0x1fe   :  { %v7742_v41 = vpop.f32.mrf.mxu0 }
 0x1ff   :  { %v7283_v42 = vmul.f32 -1.442695, %v127_v40  ;;  %v727_v41 = vand.u32 127, %v479_v39 }
 0x200   :  { %v129_v43 = vpop.f32.mrf.mxu0 }
 0x201   :  { %8185 = vpow2.f32 %v7283_v42  ;;  %v130_v44 = vadd.f32 %v7279_v38, %v129_v43  ;;  %v8140_v38 = vld [vmem:[%s10241_s1 + $0x10] sm:$0xff]   ;;  %v8385_v43 = vmov 1966171168  }
 0x202   :  { %v7743_v45 = vpop.f32.mrf.mxu0 }
 0x203   :  { %v7284_v46 = vmul.f32 -1.442695, %v130_v44 }
 0x205   :  { %8187 = vpow2.f32 %v7284_v46  ;;  %v7311_v46 = vld [vmem:[%s10244_s4 + $0x7] ss:$0 sm:$0xff] }
 0x20e   :  { %v8186_v47 = vpop.eup %8185 }
 0x20f   :  { %v139_v48 = vadd.f32 1.0, %v8186_v47 }
 0x211   :  { %8189 = vrcp.f32 %v139_v48 }
 0x212   :  { %v8188_v49 = vpop.eup %8187 }
 0x213   :  { %v140_v50 = vadd.f32 1.0, %v8188_v49 }
 0x215   :  { %8191 = vrcp.f32 %v140_v50 }
 0x21e   :  { %v8190_v51 = vpop.eup %8189 }
 0x21f   :  { %v145_v53 = vmul.f32 %v8190_v51, %v127_v40  ;;  %v480_v40 = vshrl.u32 %v479_v39, 7 }
 0x221   :  { %v8543_v42 = vsub.s32 %v727_v41, %v480_v40 }
 0x222   :  { %v8192_v52 = vpop.eup %8191 }
 0x223   :  { %v146_v54 = vmul.f32 %v8192_v52, %v130_v44  ;;  %v477_v44 = vunpack.c.l.s4 %v8385_v43 }
 0x225   :  { %v155_v55 = vpack.c.bf16 %v146_v54, %v145_v53  ;;  %v478_v45 = vunpack.c.0.s8 %v477_v44 }
 0x227   :  { %7753 = vmatmul.mubr.msk.bf16.vlgmr.msra.gmra.mxu1 %vm185_vm2, %v155_v55  ;;  %v8548_v47 = vsub.s32 %v478_v45, %v480_v40  ;;  %v8553_v55 = vsub.s32 0, %v480_v40 }
 0x228   :  { %7776 = vmatprep.mubr.msk.bf16.mxu1 %vm8384_vm1, %v8383_v15  ;;  %7773 = vmatpush3.bf16.msra.mxu1 %v8136_v17 }
 0x229   :  { %7774 = vmatprep.subr.bf16.mxu1 %v8383_v15 }
 0x22c   :  { %7775 = vmatpush3.bf16.msra.mxu1 %v8138_v19  ;;  %v467_v19 = vld [vmem:[%s10243_s3 + $0x10] sm:$0xff] }
 0x22d   :  { %7795 = vmatprep.subr.mxu1 %v8383_v15 }
 0x2e7   :  { %v223_v57 = vpop.f32.mrf.mxu1 }
 0x2e8   :  { %v224_v58 = vadd.f32 %v7285_v56, %v223_v57 }
 0x2e9   :  { %v7754_v59 = vpop.f32.mrf.mxu1 }
 0x2ea   :  { %v230_v60 = vmul.f32 0.5, %v224_v58 }
 0x2eb   :  { %v226_v61 = vpop.f32.mrf.mxu1 }
 0x2ec   :  { %v8491_v62 = vadd.f32 %v230_v60, %v8427_v0  ;;  %v227_v63 = vadd.f32 %v7285_v56, %v226_v61 }
 0x2ed   :  { %v7755_v2 = vpop.f32.mrf.mxu1 }
 0x2ee   :  { %v231_v3 = vmul.f32 0.5, %v227_v63  ;;  %v236_v4 = vsel %vm26_vm0, %v8491_v62, 0.0 }
 0x2ef   :  { %237 = vadd.xlane.f32.xlu0 %v236_v4 }
 0x2f0   :  { %v8496_v5 = vadd.f32 %v231_v3, %v8432_v1  ;;  %v7310_v3 = vld [vmem:[%s10244_s4 + $0x6] ss:$0 sm:$0xff] }
 0x2f2   :  { %v239_v6 = vsel %vm26_vm0, %v8496_v5, 0.0 }
 0x2f3   :  { %240 = vadd.xlane.f32.xlu1 %v239_v6 }
 0x378   :  { %v238_v7 = vpop.xlane.xlu0 %237 }
 0x379   :  { %v242_v8 = vmul.f32 0.03125, %v238_v7 }
 0x37b   :  { %v244_v9 = vsub.f32 %v8491_v62, %v242_v8 }
 0x37c   :  { %v241_v0 = vpop.xlane.xlu1 %240 }
 0x37d   :  { %v243_v10 = vmul.f32 0.03125, %v241_v0  ;;  %v246_v11 = vmul.f32 %v244_v9, %v244_v9 }
 0x37f   :  { %v245_v12 = vsub.f32 %v8496_v5, %v243_v10  ;;  %v248_v13 = vsel %vm26_vm0, %v246_v11, 0.0  ;;  %v465_v11 = vld [vmem:[%s10243_s3] sm:$0xff] }
 0x380   :  { %249 = vadd.xlane.f32.xlu0 %v248_v13 }
 0x381   :  { %v247_v14 = vmul.f32 %v245_v12, %v245_v12 }
 0x383   :  { %v251_v1 = vsel %vm26_vm0, %v247_v14, 0.0 }
 0x384   :  { %252 = vadd.xlane.f32.xlu1 %v251_v1 }
 0x409   :  { %v250_v20 = vpop.xlane.xlu0 %249 }
 0x40a   :  { %v254_v21 = vmul.f32 0.03125, %v250_v20 }
 0x40c   :  { %v256_v22 = vadd.f32 1e-05, %v254_v21 }
 0x40d   :  { %v253_v23 = vpop.xlane.xlu1 %252 }
 0x40e   :  { %8193 = vrsqrt.f32 %v256_v22  ;;  %v255_v24 = vmul.f32 0.03125, %v253_v23 }
 0x410   :  { %v257_v25 = vadd.f32 1e-05, %v255_v24 }
 0x412   :  { %8195 = vrsqrt.f32 %v257_v25 }
 0x41b   :  { %v8194_v26 = vpop.eup %8193 }
 0x41c   :  { %v260_v27 = vmul.f32 %v8194_v26, %v244_v9 }
 0x41e   :  { %v266_v31 = vmul.f32 %v7291_v28, %v260_v27 }
 0x41f   :  { %v8196_v29 = vpop.eup %8195 }
 0x420   :  { %v261_v30 = vmul.f32 %v8196_v29, %v245_v12  ;;  %v272_v34 = vadd.f32 %v7292_v32, %v266_v31  ;;  %v466_v12 = vld [vmem:[%s10243_s3 + $0x8] sm:$0xff] }
 0x422   :  { %v267_v33 = vmul.f32 %v7291_v28, %v261_v30 }
 0x424   :  { %v273_v35 = vadd.f32 %v7292_v32, %v267_v33 }
 0x426   :  { %v274_v37 = vpack.c.bf16 %v273_v35, %v272_v34  ;;  %v469_v34 = vld [vmem:[%s10243_s3 + $0x20] sm:$0xff] }
 0x428   :  { %7761 = vmatmul.mubr.msk.bf16.vlgmr.msra.gmra.mxu0 %vm26_vm0, %v274_v37  ;;  %7777 = vmatmul.mubr.msk.bf16.vlgmr.msra.gmra.mxu1 %vm26_vm0, %v274_v37 }
 0x429   :  { %7765 = vmatpush3.bf16.msra.mxu0 %v8139_v36  ;;  %7768 = vmatprep.mubr.msk.bf16.mxu0 %vm8384_vm1, %v8383_v15 }
 0x42a   :  { %7766 = vmatprep.subr.bf16.mxu0 %v8383_v15  ;;  %7797 = vmatprep.mubr.msk.f32.mxu1 %vm8384_vm1, %v8383_v15 }
 0x42d   :  { %7767 = vmatpush3.bf16.msra.mxu0 %v8140_v38 }
 0x42e   :  { %7780 = vmatprep.subr.mxu0 %v8383_v15 }
 0x430   :  { %7769 = vmatmul.mubr.msk.bf16.vlgmr.msra.gmra.mxu0 %vm26_vm0, %v274_v37 }
 0x431   :  { %7782 = vmatprep.mubr.msk.f32.mxu0 %vm8384_vm1, %v8383_v15 }
 0x4e8   :  { %v328_v48 = vpop.f32.mrf.mxu0  ;;  %v8550_v49 = vpop.f32.mrf.mxu1 }
 0x4e9   :  { %v463_v50 = vadd.f32 %v7311_v46, %v328_v48  ;;  %v8584_v14 = vadd.f32 %v7310_v3, %v328_v48 }
 0x4ea   :  { %v7762_v51 = vpop.f32.mrf.mxu0  ;;  %v7778_v52 = vpop.f32.mrf.mxu1 }
 0x4eb   :  { %v475_v53 = vcombine.high %v463_v50, %v463_v50  ;;  %v482_v54 = vrot.slane %v463_v50, %v8548_v47 }
 0x4ec   :  { %v331_v56 = vpop.f32.mrf.mxu0  ;;  %v8555_v57 = vpop.f32.mrf.mxu1 }
 0x4ed   :  { %v8558_v58 = vrot.slane %v475_v53, %v8548_v47  ;;  %v490_v59 = vcombine.high %v482_v54, %v482_v54  ;;  %v498_v60 = vrot.slane %v482_v54, %v8548_v47  ;;  %7796 = vmatpush3.msra.mxu1 %v8555_v57  ;;  %v464_v61 = vadd.f32 %v7311_v46, %v331_v56 }
 0x4ee   :  { %v7763_v63 = vpop.f32.mrf.mxu0  ;;  %v7779_v2 = vpop.f32.mrf.mxu1  ;;  %7805 = vmatprep.subr.mxu1 %v8383_v15  ;;  %v8614_v30 = vadd.f32 %v7310_v3, %v331_v56 }
 0x4ef   :  { %v512_v4 = vrot.slane %v490_v59, %v8548_v47  ;;  %v520_v6 = vcombine.high %v498_v60, %v498_v60  ;;  %v8569_v7 = vrot.slane %v8558_v58, %v8548_v47  ;;  %v576_v8 = vrot.slane %v498_v60, %v8553_v55  ;;  %v468_v59 = vld [vmem:[%s10243_s3 + $0x18] sm:$0xff] }
 0x4f0   :  { %v524_v9 = vcombine.high %v464_v61, %v464_v61  ;;  %v531_v0 = vrot.slane %v464_v61, %v8548_v47  ;;  %v8573_v10 = vpop.f32.mrf.mxu0  ;;  %v491_v36 = vcombine.high %v8558_v58, %v8558_v58 }
 0x4f1   :  { %v580_v13 = vrot.slane %v512_v4, %v8553_v55  ;;  %7781 = vmatpush3.xpose.msk.msra.mxu0 %vm669_vm3, %v8573_v10  ;;  %v584_v1 = vrot.slane %v520_v6, %v8553_v55  ;;  %v8593_v21 = vmul.f32 %v576_v8, %v465_v11  ;;  %v592_v23 = vrot.slane %v8569_v7, %v8553_v55 }
 0x4f2   :  { %v538_v16 = vrot.slane %v524_v9, %v8548_v47  ;;  %v539_v17 = vcombine.high %v531_v0, %v531_v0  ;;  %v7770_v18 = vpop.f32.mrf.mxu0  ;;  %7785 = vmatprep.subr.mxu0 %v8383_v15  ;;  %v547_v20 = vrot.slane %v531_v0, %v8548_v47  ;;  %v522_v37 = vcombine.high %v512_v4, %v512_v4  ;;  %v470_v9 = vld [vmem:[%s10243_s3 + $0x28] sm:$0xff] }
 0x4f3   :  { %v8595_v22 = vmul.f32 %v580_v13, %v466_v12  ;;  %v670_v27 = vsel %vm669_vm3, %v8593_v21, 0.0  ;;  %v8612_v29 = vmul.f32 %v584_v1, %v467_v19  ;;  %v8633_v43 = vmul.f32 %v592_v23, %v469_v34  ;;  %v471_v18 = vld [vmem:[%s10243_s3 + $0x30] sm:$0xff] }
 0x4f4   :  { %v561_v24 = vrot.slane %v539_v17, %v8548_v47  ;;  %v8600_v25 = vpop.f32.mrf.mxu0  ;;  %7783 = vmatmul.mubr.msk.f32.vlgmr.msra.gmra.mxu0 %vm669_vm3, %v8584_v14  ;;  %v569_v26 = vcombine.high %v547_v20, %v547_v20  ;;  %v554_v31 = vrot.slane %v538_v16, %v8548_v47  ;;  %671 = vadd.xlane.f32.xlu0 %v670_v27 }
 0x4f5   :  { %7786 = vmatpush3.xpose.msk.msra.mxu0 %vm669_vm3, %v8600_v25  ;;  %v673_v28 = vsel %vm669_vm3, %v8595_v22, 0.0  ;;  %7787 = vmatprep.mubr.msk.f32.mxu0 %vm8384_vm1, %v8383_v15  ;;  %v540_v39 = vcombine.high %v538_v16, %v538_v16  ;;  %v608_v40 = vrot.slane %v547_v20, %v8553_v55  ;;  %v676_v41 = vsel %vm669_vm3, %v8612_v29, 0.0 }
 0x4f6   :  { %v612_v32 = vrot.slane %v561_v24, %v8553_v55  ;;  %v7771_v33 = vpop.f32.mrf.mxu0  ;;  %v616_v35 = vrot.slane %v569_v26, %v8553_v55  ;;  %674 = vadd.xlane.f32.xlu1 %v673_v28  ;;  %7790 = vmatprep.subr.mxu0 %v8383_v15  ;;  %v571_v44 = vcombine.high %v561_v24, %v561_v24  ;;  %v682_v51 = vsel %vm669_vm3, %v8633_v43, 0.0  ;;  %v472_v28 = vld [vmem:[%s10243_s3 + $0x38] sm:$0xff] }
 0x4f7   :  { %v624_v45 = vrot.slane %v554_v31, %v8553_v55  ;;  %v519_v50 = vrot.slane %v491_v36, %v8548_v47  ;;  %v8646_v52 = vmul.f32 %v608_v40, %v465_v11  ;;  %v588_v53 = vrot.slane %v522_v37, %v8553_v55 }
 0x4f8   :  { %7788 = vmatmul.mubr.msk.f32.vlgmr.msra.gmra.mxu0 %vm669_vm3, %v8614_v30  ;;  %v8627_v38 = vmul.f32 %v612_v32, %v466_v12  ;;  %677 = vadd.xlane.f32.xlu0 %v676_v41  ;;  %v8640_v48 = vmul.f32 %v616_v35, %v467_v19  ;;  %v568_v54 = vrot.slane %v540_v39, %v8548_v47 }
 0x4f9   :  { %7791 = vmatpush3.msra.mxu0 %v8550_v49  ;;  %7792 = vmatprep.mubr.msk.f32.mxu0 %vm8384_vm1, %v8383_v15  ;;  %v8652_v58 = vmul.f32 %v624_v45, %v469_v34  ;;  %v620_v60 = vrot.slane %v571_v44, %v8553_v55  ;;  %v521_v61 = vcombine.high %v8569_v7, %v8569_v7  ;;  %v694_v63 = vsel %vm669_vm3, %v8646_v52, 0.0 }
 0x4fa   :  { %v697_v46 = vsel %vm669_vm3, %v8627_v38, 0.0  ;;  %7800 = vmatprep.subr.mxu0 %v8383_v15  ;;  %v700_v56 = vsel %vm669_vm3, %v8640_v48, 0.0  ;;  %v8662_v2 = vmul.f32 %v588_v53, %v468_v59  ;;  %v596_v3 = vrot.slane %v519_v50, %v8553_v55 }
 0x4fb   :  { %698 = vadd.xlane.f32.xlu1 %v697_v46  ;;  %v570_v4 = vcombine.high %v554_v31, %v554_v31  ;;  %v706_v6 = vsel %vm669_vm3, %v8652_v58, 0.0  ;;  %v8667_v8 = vmul.f32 %v620_v60, %v468_v59  ;;  %v628_v7 = vrot.slane %v568_v54, %v8553_v55 }
 0x4fc   :  { %683 = vadd.xlane.f32.xlu0 %v682_v51  ;;  %v523_v0 = vcombine.high %v519_v50, %v519_v50  ;;  %v679_v11 = vsel %vm669_vm3, %v8662_v2, 0.0  ;;  %v8675_v12 = vmul.f32 %v596_v3, %v470_v9  ;;  %v600_v13 = vrot.slane %v521_v61, %v8553_v55 }
 0x4fd   :  { %v572_v1 = vcombine.high %v568_v54, %v568_v54  ;;  %v703_v16 = vsel %vm669_vm3, %v8667_v8, 0.0  ;;  %v8680_v17 = vmul.f32 %v628_v7, %v470_v9  ;;  %v632_v19 = vrot.slane %v570_v4, %v8553_v55 }
 0x4fe   :  { %v685_v20 = vsel %vm669_vm3, %v8675_v12, 0.0  ;;  %v8688_v23 = vmul.f32 %v600_v13, %v471_v18  ;;  %v604_v24 = vrot.slane %v523_v0, %v8553_v55 }
 0x4ff   :  { %701 = vadd.xlane.f32.xlu1 %v700_v56  ;;  %v709_v26 = vsel %vm669_vm3, %v8680_v17, 0.0  ;;  %v8693_v27 = vmul.f32 %v632_v19, %v471_v18  ;;  %v636_v31 = vrot.slane %v572_v1, %v8553_v55 }
 0x500   :  { %695 = vadd.xlane.f32.xlu0 %v694_v63  ;;  %v688_v32 = vsel %vm669_vm3, %v8688_v23, 0.0  ;;  %v8701_v33 = vmul.f32 %v604_v24, %v472_v28 }
 0x501   :  { %v712_v34 = vsel %vm669_vm3, %v8693_v27, 0.0  ;;  %v8705_v35 = vmul.f32 %v636_v31, %v472_v28 }
 0x502   :  { %v691_v36 = vsel %vm669_vm3, %v8701_v33, 0.0 }
 0x503   :  { %707 = vadd.xlane.f32.xlu1 %v706_v6  ;;  %v715_v37 = vsel %vm669_vm3, %v8705_v35, 0.0 }
 0x504   :  { %680 = vadd.xlane.f32.xlu0 %v679_v11 }
 0x507   :  { %704 = vadd.xlane.f32.xlu1 %v703_v16 }
 0x508   :  { %686 = vadd.xlane.f32.xlu0 %v685_v20 }
 0x50b   :  { %710 = vadd.xlane.f32.xlu1 %v709_v26 }
 0x50c   :  { %689 = vadd.xlane.f32.xlu0 %v688_v32 }
 0x50f   :  { %713 = vadd.xlane.f32.xlu1 %v712_v34 }
 0x510   :  { %692 = vadd.xlane.f32.xlu0 %v691_v36 }
 0x513   :  { %716 = vadd.xlane.f32.xlu1 %v715_v37 }
 0x57d   :  { %v672_v39 = vpop.xlane.xlu0 %671 }
 0x57e   :  { %v731_v63 = vrot.slane %v672_v39, %v8543_v42 }
 0x57f   :  { %v675_v40 = vpop.xlane.xlu1 %674 }
 0x580   :  { %v735_v60 = vrot.slane %v675_v40, %v8543_v42 }
 0x581   :  { %v678_v41 = vpop.xlane.xlu0 %677 }
 0x582   :  { %v739_v3 = vrot.slane %v678_v41, %v8543_v42  ;;  %v761_v4 = vsel %vm760_vm4, %v735_v60, %v731_v63 }
 0x584   :  { %v699_v44 = vpop.xlane.xlu1 %698  ;;  %v763_v11 = vsel %vm762_vm5, %v739_v3, %v761_v4 }
 0x585   :  { %v684_v45 = vpop.xlane.xlu0 %683  ;;  %v866_v0 = vrot.slane %v699_v44, %v8543_v42 }
 0x586   :  { %v747_v20 = vrot.slane %v684_v45, %v8543_v42 }
 0x588   :  { %v702_v46 = vpop.xlane.xlu1 %701 }
 0x589   :  { %v696_v50 = vpop.xlane.xlu0 %695  ;;  %v870_v24 = vrot.slane %v702_v46, %v8543_v42 }
 0x58a   :  { %v862_v6 = vrot.slane %v696_v50, %v8543_v42 }
 0x58c   :  { %v708_v51 = vpop.xlane.xlu1 %707  ;;  %v891_v1 = vsel %vm760_vm4, %v866_v0, %v862_v6 }
 0x58d   :  { %v681_v53 = vpop.xlane.xlu0 %680  ;;  %v892_v31 = vsel %vm762_vm5, %v870_v24, %v891_v1  ;;  %v878_v40 = vrot.slane %v708_v51, %v8543_v42 }
 0x58e   :  { %v743_v9 = vrot.slane %v681_v53, %v8543_v42 }
 0x590   :  { %v705_v54 = vpop.xlane.xlu1 %704  ;;  %v765_v16 = vsel %vm764_vm6, %v743_v9, %v763_v11 }
 0x591   :  { %v687_v56 = vpop.xlane.xlu0 %686  ;;  %v874_v18 = vrot.slane %v705_v54, %v8543_v42  ;;  %v767_v34 = vsel %vm766_vm7, %v747_v20, %v765_v16 }
 0x592   :  { %v751_v19 = vrot.slane %v687_v56, %v8543_v42 }
 0x593   :  { %v893_v36 = vsel %vm764_vm6, %v874_v18, %v892_v31 }
 0x594   :  { %v711_v59 = vpop.xlane.xlu1 %710  ;;  %v769_v39 = vsel %vm768_vm8, %v751_v19, %v767_v34  ;;  %v894_v54 = vsel %vm766_vm7, %v878_v40, %v893_v36 }
 0x595   :  { %v690_v61 = vpop.xlane.xlu0 %689  ;;  %v882_v37 = vrot.slane %v711_v59, %v8543_v42 }
 0x596   :  { %v755_v26 = vrot.slane %v690_v61, %v8543_v42 }
 0x597   :  { %v895_v60 = vsel %vm768_vm8, %v882_v37, %v894_v54 }
 0x598   :  { %v714_v7 = vpop.xlane.xlu1 %713  ;;  %v771_v44 = vsel %vm770_vm9, %v755_v26, %v769_v39 }
 0x599   :  { %v693_v13 = vpop.xlane.xlu0 %692  ;;  %v886_v41 = vrot.slane %v714_v7, %v8543_v42 }
 0x59a   :  { %v759_v28 = vrot.slane %v693_v13, %v8543_v42 }
 0x59b   :  { %v896_v61 = vsel %vm770_vm9, %v886_v41, %v895_v60 }
 0x59c   :  { %v717_v32 = vpop.xlane.xlu1 %716  ;;  %v773_v46 = vsel %vm772_vm10, %v759_v28, %v771_v44 }
 0x59d   :  { %v890_v45 = vrot.slane %v717_v32, %v8543_v42 }
 0x59f   :  { %v897_v51 = vsel %vm772_vm10, %v890_v45, %v896_v61 }
 0x5b4   :  { %v847_v50 = vpop.f32.mrf.mxu0 }
 0x5b5   :  { %v848_v53 = vadd.f32 %v847_v50, %v773_v46 }
 0x5b6   :  { %v7784_v56 = vpop.f32.mrf.mxu0 }
 0x5b7   :  { %v975_v59 = vsel %vm669_vm3, %v848_v53, -inf }
 0x5b8   :  { %976 = vmax.xlane.f32.xlu0 %v975_v59  ;;  %v971_v63 = vpop.f32.mrf.mxu0 }
 0x5b9   :  { %v972_v3 = vadd.f32 %v971_v63, %v897_v51 }
 0x5ba   :  { %v7789_v4 = vpop.f32.mrf.mxu0 }
 0x5bb   :  { %v978_v6 = vsel %vm669_vm3, %v972_v3, -inf }
 0x5bc   :  { %979 = vmax.xlane.f32.xlu1 %v978_v6 }
 0x5cd   :  { %1383 = vrot.lane.b32.xlu1 %v8600_v25, %s8386_s25 }
 0x5d1   :  { %1255 = vrot.lane.b32.xlu1 %v8584_v14, %s8386_s25 }
 0x641   :  { %v977_v9 = vpop.xlane.xlu0 %976 }
 0x642   :  { %v981_v7 = vsub.f32 %v848_v53, %v977_v9 }
 0x644   :  { %v983_v0 = vmul.f32 1.442695, %v981_v7 }
 0x645   :  { %v980_v11 = vpop.xlane.xlu1 %979 }
 0x646   :  { %8197 = vpow2.f32 %v983_v0  ;;  %v982_v13 = vsub.f32 %v972_v3, %v980_v11 }
 0x648   :  { %v985_v1 = vmul.f32 1.442695, %v982_v13 }
 0x649   :  { %v1384_v24 = vpop.permute.xlu1 %1383 }
 0x64a   :  { %8199 = vpow2.f32 %v985_v1 }
 0x64d   :  { %v1256_v26 = vpop.permute.xlu1 %1255 }
 0x653   :  { %v8198_v16 = vpop.eup %8197 }
 0x654   :  { %v987_v18 = vsel %vm669_vm3, %v8198_v16, 0.0 }
 0x655   :  { %988 = vadd.xlane.f32.xlu0 %v987_v18 }
 0x657   :  { %v8200_v19 = vpop.eup %8199 }
 0x658   :  { %v990_v20 = vsel %vm669_vm3, %v8200_v19, 0.0 }
 0x659   :  { %991 = vadd.xlane.f32.xlu1 %v990_v20 }
 0x66a   :  { %1381 = vrot.lane.b32.xlu1 %v8614_v30, %s8386_s25 }
 0x66b   :  { %1257 = vrot.lane.b32.xlu0 %v8573_v10, %s8386_s25 }
 0x66e   :  { %1161 = vrot.lane.b32.xlu1 %v8595_v22, %s8386_s25 }
 0x66f   :  { %1159 = vrot.lane.b32.xlu0 %v8593_v21, %s8386_s25 }
 0x672   :  { %1177 = vrot.lane.b32.xlu1 %v8627_v38, %s8386_s25 }
 0x673   :  { %1175 = vrot.lane.b32.xlu0 %v8646_v52, %s8386_s25 }
 0x676   :  { %1179 = vrot.lane.b32.xlu1 %v8640_v48, %s8386_s25 }
 0x677   :  { %1163 = vrot.lane.b32.xlu0 %v8612_v29, %s8386_s25 }
 0x67a   :  { %1181 = vrot.lane.b32.xlu1 %v8667_v8, %s8386_s25 }
 0x67b   :  { %1165 = vrot.lane.b32.xlu0 %v8662_v2, %s8386_s25 }
 0x67e   :  { %1183 = vrot.lane.b32.xlu1 %v8652_v58, %s8386_s25 }
 0x67f   :  { %1167 = vrot.lane.b32.xlu0 %v8633_v43, %s8386_s25 }
 0x682   :  { %1185 = vrot.lane.b32.xlu1 %v8680_v17, %s8386_s25 }
 0x683   :  { %1169 = vrot.lane.b32.xlu0 %v8675_v12, %s8386_s25 }
 0x686   :  { %1187 = vrot.lane.b32.xlu1 %v8693_v27, %s8386_s25 }
 0x687   :  { %1171 = vrot.lane.b32.xlu0 %v8688_v23, %s8386_s25 }
 0x68a   :  { %1189 = vrot.lane.b32.xlu1 %v8705_v35, %s8386_s25 }
 0x68b   :  { %1173 = vrot.lane.b32.xlu0 %v8701_v33, %s8386_s25 }
 0x6de   :  { %v989_v28 = vpop.xlane.xlu0 %988 }
 0x6df   :  { %8201 = vrcp.f32 %v989_v28 }
 0x6e2   :  { %v1258_v31 = vpop.permute.xlu0 %1257  ;;  %v992_v32 = vpop.xlane.xlu1 %991 }
 0x6e3   :  { %8203 = vrcp.f32 %v992_v32 }
 0x6e6   :  { %v1160_v34 = vpop.permute.xlu0 %1159  ;;  %v1382_v36 = vpop.permute.xlu1 %1381 }
 0x6e7   :  { %v1207_v37 = vsel %vm669_vm3, %v1160_v34, 0.0 }
 0x6e8   :  { %1208 = vadd.xlane.f32.xlu0 %v1207_v37 }
 0x6ea   :  { %v1176_v39 = vpop.permute.xlu0 %1175  ;;  %v1162_v40 = vpop.permute.xlu1 %1161 }
 0x6eb   :  { %v1231_v41 = vsel %vm669_vm3, %v1176_v39, 0.0  ;;  %v1210_v44 = vsel %vm669_vm3, %v1162_v40, 0.0 }
 0x6ec   :  { %v8202_v45 = vpop.eup %8201  ;;  %1232 = vadd.xlane.f32.xlu0 %v1231_v41  ;;  %1211 = vadd.xlane.f32.xlu1 %v1210_v44 }
 0x6ed   :  { %v995_v46 = vmul.f32 %v8202_v45, %v8198_v16 }
 0x6ee   :  { %v1164_v50 = vpop.permute.xlu0 %1163  ;;  %v1178_v53 = vpop.permute.xlu1 %1177 }
 0x6ef   :  { %7793 = vmatmul.mubr.msk.f32.vlgmr.msra.gmra.mxu0 %vm669_vm3, %v995_v46  ;;  %v1234_v54 = vsel %vm669_vm3, %v1178_v53, 0.0  ;;  %v1213_v51 = vsel %vm669_vm3, %v1164_v50, 0.0 }
 0x6f0   :  { %v8204_v56 = vpop.eup %8203  ;;  %7801 = vmatpush3.xpose.msk.msra.mxu0 %vm669_vm3, %v1258_v31  ;;  %1235 = vadd.xlane.f32.xlu0 %v1234_v54 }
 0x6f1   :  { %7802 = vmatprep.mubr.msk.f32.mxu0 %vm8384_vm1, %v8383_v15  ;;  %v996_v60 = vmul.f32 %v8204_v56, %v8200_v19  ;;  %7810 = vmatprep.subr.mxu0 %v8383_v15 }
 0x6f2   :  { %v1166_v59 = vpop.permute.xlu0 %1165  ;;  %v1180_v61 = vpop.permute.xlu1 %1179 }
 0x6f3   :  { %7798 = vmatmul.mubr.msk.f32.vlgmr.msra.gmra.mxu1 %vm669_vm3, %v996_v60  ;;  %7803 = vmatmul.mubr.msk.f32.vlgmr.msra.gmra.mxu0 %vm669_vm3, %v1256_v26  ;;  %v1237_v63 = vsel %vm669_vm3, %v1180_v61, 0.0  ;;  %v1216_v6 = vsel %vm669_vm3, %v1166_v59, 0.0 }
 0x6f4   :  { %7806 = vmatpush3.xpose.msk.msra.mxu1 %vm669_vm3, %v1384_v24  ;;  %1214 = vadd.xlane.f32.xlu0 %v1213_v51 }
 0x6f5   :  { %1238 = vadd.xlane.f32.xlu1 %v1237_v63  ;;  %7807 = vmatprep.mubr.msk.f32.mxu1 %vm8384_vm1, %v8383_v15 }
 0x6f6   :  { %v1168_v3 = vpop.permute.xlu0 %1167  ;;  %v1182_v4 = vpop.permute.xlu1 %1181  ;;  %7815 = vmatprep.subr.mxu1 %v8383_v15  ;;  %7812 = vmatprep.mubr.msk.f32.mxu0 %vm8384_vm1, %v8383_v15 }
 0x6f7   :  { %7808 = vmatmul.mubr.msk.f32.vlgmr.msra.gmra.mxu1 %vm669_vm3, %v1382_v36  ;;  %v1240_v9 = vsel %vm669_vm3, %v1182_v4, 0.0  ;;  %v1219_v11 = vsel %vm669_vm3, %v1168_v3, 0.0 }
 0x6f8   :  { %1217 = vadd.xlane.f32.xlu0 %v1216_v6  ;;  %7817 = vmatprep.mubr.msk.f32.mxu1 %vm8384_vm1, %v8383_v15 }
 0x6f9   :  { %1241 = vadd.xlane.f32.xlu1 %v1240_v9 }
 0x6fa   :  { %v1170_v7 = vpop.permute.xlu0 %1169  ;;  %v1184_v0 = vpop.permute.xlu1 %1183 }
 0x6fb   :  { %v1243_v13 = vsel %vm669_vm3, %v1184_v0, 0.0  ;;  %v1222_v18 = vsel %vm669_vm3, %v1170_v7, 0.0 }
 0x6fc   :  { %1220 = vadd.xlane.f32.xlu0 %v1219_v11 }
 0x6fd   :  { %1244 = vadd.xlane.f32.xlu1 %v1243_v13 }
 0x6fe   :  { %v1172_v1 = vpop.permute.xlu0 %1171  ;;  %v1186_v16 = vpop.permute.xlu1 %1185 }
 0x6ff   :  { %v1246_v19 = vsel %vm669_vm3, %v1186_v16, 0.0  ;;  %v1225_v24 = vsel %vm669_vm3, %v1172_v1, 0.0 }
 0x700   :  { %1223 = vadd.xlane.f32.xlu0 %v1222_v18 }
 0x701   :  { %1247 = vadd.xlane.f32.xlu1 %v1246_v19 }
 0x702   :  { %v1188_v20 = vpop.permute.xlu1 %1187  ;;  %v1174_v28 = vpop.permute.xlu0 %1173 }
 0x703   :  { %v1249_v26 = vsel %vm669_vm3, %v1188_v20, 0.0  ;;  %v1228_v32 = vsel %vm669_vm3, %v1174_v28, 0.0 }
 0x704   :  { %1226 = vadd.xlane.f32.xlu0 %v1225_v24 }
 0x705   :  { %1250 = vadd.xlane.f32.xlu1 %v1249_v26 }
 0x706   :  { %v1190_v31 = vpop.permute.xlu1 %1189 }
 0x707   :  { %v1252_v34 = vsel %vm669_vm3, %v1190_v31, 0.0 }
 0x708   :  { %1229 = vadd.xlane.f32.xlu0 %v1228_v32 }
 0x709   :  { %1253 = vadd.xlane.f32.xlu1 %v1252_v34 }
 0x771   :  { %v1209_v36 = vpop.xlane.xlu0 %1208 }
 0x772   :  { %v1270_v63 = vrot.slane %v1209_v36, %v8543_v42 }
 0x775   :  { %v1233_v37 = vpop.xlane.xlu0 %1232  ;;  %v1212_v40 = vpop.xlane.xlu1 %1211 }
 0x776   :  { %v1274_v59 = vrot.slane %v1212_v40, %v8543_v42  ;;  %v1396_v16 = vrot.slane %v1233_v37, %v8543_v42 }
 0x778   :  { %v1299_v9 = vsel %vm760_vm4, %v1274_v59, %v1270_v63 }
 0x779   :  { %v1236_v39 = vpop.xlane.xlu0 %1235 }
 0x77a   :  { %v1400_v7 = vrot.slane %v1236_v39, %v8543_v42 }
 0x77c   :  { %v1425_v32 = vsel %vm760_vm4, %v1400_v7, %v1396_v16 }
 0x77d   :  { %v1215_v41 = vpop.xlane.xlu0 %1214 }
 0x77e   :  { %v1239_v44 = vpop.xlane.xlu1 %1238  ;;  %v1278_v61 = vrot.slane %v1215_v41, %v8543_v42 }
 0x77f   :  { %v1404_v13 = vrot.slane %v1239_v44, %v8543_v42 }
 0x780   :  { %v1300_v11 = vsel %vm762_vm5, %v1278_v61, %v1299_v9 }
 0x781   :  { %v1218_v45 = vpop.xlane.xlu0 %1217  ;;  %v1426_v39 = vsel %vm762_vm5, %v1404_v13, %v1425_v32 }
 0x782   :  { %v1242_v46 = vpop.xlane.xlu1 %1241  ;;  %v1282_v3 = vrot.slane %v1218_v45, %v8543_v42 }
 0x783   :  { %v1408_v19 = vrot.slane %v1242_v46, %v8543_v42 }
 0x784   :  { %v1301_v18 = vsel %vm764_vm6, %v1282_v3, %v1300_v11 }
 0x785   :  { %v1221_v50 = vpop.xlane.xlu0 %1220  ;;  %v1427_v44 = vsel %vm764_vm6, %v1408_v19, %v1426_v39 }
 0x786   :  { %v1245_v53 = vpop.xlane.xlu1 %1244  ;;  %v1286_v4 = vrot.slane %v1221_v50, %v8543_v42 }
 0x787   :  { %v1412_v28 = vrot.slane %v1245_v53, %v8543_v42 }
 0x788   :  { %v1302_v26 = vsel %vm766_vm7, %v1286_v4, %v1301_v18 }
 0x789   :  { %v1224_v54 = vpop.xlane.xlu0 %1223 }
 0x78a   :  { %v1248_v56 = vpop.xlane.xlu1 %1247  ;;  %v1290_v0 = vrot.slane %v1224_v54, %v8543_v42  ;;  %v1428_v54 = vsel %vm766_vm7, %v1412_v28, %v1427_v44 }
 0x78b   :  { %v1416_v34 = vrot.slane %v1248_v56, %v8543_v42 }
 0x78c   :  { %v1303_v37 = vsel %vm768_vm8, %v1290_v0, %v1302_v26 }
 0x78d   :  { %v1227_v60 = vpop.xlane.xlu0 %1226  ;;  %v1429_v61 = vsel %vm768_vm8, %v1416_v34, %v1428_v54 }
 0x78e   :  { %v1251_v51 = vpop.xlane.xlu1 %1250  ;;  %v1294_v1 = vrot.slane %v1227_v60, %v8543_v42 }
 0x78f   :  { %v1420_v40 = vrot.slane %v1251_v51, %v8543_v42 }
 0x790   :  { %v1304_v41 = vsel %vm770_vm9, %v1294_v1, %v1303_v37 }
 0x791   :  { %v1230_v6 = vpop.xlane.xlu0 %1229  ;;  %v1430_v51 = vsel %vm770_vm9, %v1420_v40, %v1429_v61 }
 0x792   :  { %v1298_v20 = vrot.slane %v1230_v6, %v8543_v42  ;;  %v1254_v31 = vpop.xlane.xlu1 %1253 }
 0x793   :  { %v1424_v45 = vrot.slane %v1254_v31, %v8543_v42 }
 0x794   :  { %v1305_v50 = vsel %vm772_vm10, %v1298_v20, %v1304_v41 }
 0x795   :  { %v1431_v3 = vsel %vm772_vm10, %v1424_v45, %v1430_v51 }
 0x7af   :  { %v8832_v24 = vpop.f32.mrf.mxu0 }
 0x7b1   :  { %v7794_v36 = vpop.f32.mrf.mxu0 }
 0x7b3   :  { %v8844_v46 = vpop.f32.mrf.mxu1  ;;  %v1377_v53 = vpop.f32.mrf.mxu0 }
 0x7b4   :  { %v1378_v56 = vadd.f32 %v1377_v53, %v1305_v50 }
 0x7b5   :  { %v7799_v60 = vpop.f32.mrf.mxu1  ;;  %v7804_v59 = vpop.f32.mrf.mxu0 }
 0x7b6   :  { %v1507_v63 = vsel %vm669_vm3, %v1378_v56, -inf }
 0x7b7   :  { %v1503_v4 = vpop.f32.mrf.mxu1  ;;  %1508 = vmax.xlane.f32.xlu0 %v1507_v63 }
 0x7b8   :  { %v1504_v6 = vadd.f32 %v1503_v4, %v1431_v3 }
 0x7b9   :  { %v7809_v9 = vpop.f32.mrf.mxu1 }
 0x7ba   :  { %v1510_v7 = vsel %vm669_vm3, %v1504_v6, -inf }
 0x7bb   :  { %1511 = vmax.xlane.f32.xlu1 %v1510_v7 }
 0x7cc   :  { %1607 = vrot.lane.b32.xlu1 %v8555_v57, %s8386_s25 }
 0x7d0   :  { %1781 = vrot.lane.b32.xlu1 %v8573_v10, %s8387_s26 }
 0x7d4   :  { %1907 = vrot.lane.b32.xlu1 %v8600_v25, %s8387_s26 }
 0x840   :  { %v1509_v0 = vpop.xlane.xlu0 %1508 }
 0x841   :  { %v1513_v11 = vsub.f32 %v1378_v56, %v1509_v0 }
 0x843   :  { %v1515_v13 = vmul.f32 1.442695, %v1513_v11 }
 0x844   :  { %v1512_v1 = vpop.xlane.xlu1 %1511 }
 0x845   :  { %8205 = vpow2.f32 %v1515_v13  ;;  %v1514_v16 = vsub.f32 %v1504_v6, %v1512_v1 }
 0x847   :  { %v1517_v18 = vmul.f32 1.442695, %v1514_v16 }
 0x848   :  { %v1608_v19 = vpop.permute.xlu1 %1607 }
 0x849   :  { %8207 = vpow2.f32 %v1517_v18  ;;  %7816 = vmatpush3.msra.mxu1 %v1608_v19 }
 0x84a   :  { %7825 = vmatprep.subr.mxu1 %v8383_v15 }
 0x84c   :  { %v1782_v32 = vpop.permute.xlu1 %1781 }
 0x850   :  { %v1908_v34 = vpop.permute.xlu1 %1907 }
 0x852   :  { %v8206_v20 = vpop.eup %8205 }
 0x853   :  { %v1519_v26 = vsel %vm669_vm3, %v8206_v20, 0.0 }
 0x854   :  { %1520 = vadd.xlane.f32.xlu0 %v1519_v26 }
 0x856   :  { %v8208_v28 = vpop.eup %8207 }
 0x857   :  { %v1522_v31 = vsel %vm669_vm3, %v8208_v28, 0.0 }
 0x858   :  { %1523 = vadd.xlane.f32.xlu1 %v1522_v31 }
 0x869   :  { %1905 = vrot.lane.b32.xlu1 %v8614_v30, %s8387_s26 }
 0x86a   :  { %1530 = vrot.lane.b32.xlu0 %v8550_v49, %s8386_s25 }
 0x86d   :  { %1685 = vrot.lane.b32.xlu1 %v8595_v22, %s8387_s26 }
 0x86e   :  { %1779 = vrot.lane.b32.xlu0 %v8584_v14, %s8387_s26 }
 0x871   :  { %1701 = vrot.lane.b32.xlu1 %v8627_v38, %s8387_s26 }
 0x872   :  { %1683 = vrot.lane.b32.xlu0 %v8593_v21, %s8387_s26 }
 0x875   :  { %1703 = vrot.lane.b32.xlu1 %v8640_v48, %s8387_s26 }
 0x876   :  { %1699 = vrot.lane.b32.xlu0 %v8646_v52, %s8387_s26 }
 0x879   :  { %1705 = vrot.lane.b32.xlu1 %v8667_v8, %s8387_s26 }
 0x87a   :  { %1687 = vrot.lane.b32.xlu0 %v8612_v29, %s8387_s26 }
 0x87d   :  { %1707 = vrot.lane.b32.xlu1 %v8652_v58, %s8387_s26 }
 0x87e   :  { %1689 = vrot.lane.b32.xlu0 %v8662_v2, %s8387_s26 }
 0x881   :  { %1709 = vrot.lane.b32.xlu1 %v8680_v17, %s8387_s26 }
 0x882   :  { %1691 = vrot.lane.b32.xlu0 %v8633_v43, %s8387_s26 }
 0x885   :  { %1711 = vrot.lane.b32.xlu1 %v8693_v27, %s8387_s26 }
 0x886   :  { %1693 = vrot.lane.b32.xlu0 %v8675_v12, %s8387_s26 }
 0x889   :  { %1713 = vrot.lane.b32.xlu1 %v8705_v35, %s8387_s26 }
 0x88a   :  { %1695 = vrot.lane.b32.xlu0 %v8688_v23, %s8387_s26 }
 0x88e   :  { %1697 = vrot.lane.b32.xlu0 %v8701_v33, %s8387_s26 }
 0x8dd   :  { %v1521_v36 = vpop.xlane.xlu0 %1520 }
 0x8de   :  { %8209 = vrcp.f32 %v1521_v36 }
 0x8e1   :  { %v1524_v37 = vpop.xlane.xlu1 %1523  ;;  %v1531_v39 = vpop.permute.xlu0 %1530 }
 0x8e2   :  { %8211 = vrcp.f32 %v1524_v37  ;;  %7811 = vmatpush3.msra.mxu0 %v1531_v39 }
 0x8e3   :  { %7820 = vmatprep.subr.mxu0 %v8383_v15 }
 0x8e5   :  { %v1906_v40 = vpop.permute.xlu1 %1905  ;;  %v1780_v41 = vpop.permute.xlu0 %1779 }
 0x8e9   :  { %v1686_v44 = vpop.permute.xlu1 %1685  ;;  %v1684_v45 = vpop.permute.xlu0 %1683 }
 0x8ea   :  { %v1734_v50 = vsel %vm669_vm3, %v1686_v44, 0.0  ;;  %v1731_v53 = vsel %vm669_vm3, %v1684_v45, 0.0 }
 0x8eb   :  { %v8210_v54 = vpop.eup %8209  ;;  %1735 = vadd.xlane.f32.xlu1 %v1734_v50  ;;  %1732 = vadd.xlane.f32.xlu0 %v1731_v53 }
 0x8ec   :  { %v1527_v56 = vmul.f32 %v8210_v54, %v8206_v20 }
 0x8ed   :  { %v1702_v60 = vpop.permute.xlu1 %1701  ;;  %v1700_v59 = vpop.permute.xlu0 %1699 }
 0x8ee   :  { %7813 = vmatmul.mubr.msk.f32.vlgmr.msra.gmra.mxu0 %vm669_vm3, %v1527_v56  ;;  %v1755_v61 = vsel %vm669_vm3, %v1700_v59, 0.0  ;;  %v1758_v9 = vsel %vm669_vm3, %v1702_v60, 0.0 }
 0x8ef   :  { %v8212_v51 = vpop.eup %8211  ;;  %7821 = vmatpush3.xpose.msk.msra.mxu0 %vm669_vm3, %v1782_v32  ;;  %1756 = vadd.xlane.f32.xlu0 %v1755_v61 }
 0x8f0   :  { %7822 = vmatprep.mubr.msk.f32.mxu0 %vm8384_vm1, %v8383_v15  ;;  %v1528_v63 = vmul.f32 %v8212_v51, %v8208_v28  ;;  %7830 = vmatprep.subr.mxu0 %v8383_v15 }
 0x8f1   :  { %v1704_v3 = vpop.permute.xlu1 %1703  ;;  %v1688_v4 = vpop.permute.xlu0 %1687 }
 0x8f2   :  { %7818 = vmatmul.mubr.msk.f32.vlgmr.msra.gmra.mxu1 %vm669_vm3, %v1528_v63  ;;  %7823 = vmatmul.mubr.msk.f32.vlgmr.msra.gmra.mxu0 %vm669_vm3, %v1780_v41  ;;  %v1761_v6 = vsel %vm669_vm3, %v1704_v3, 0.0  ;;  %v1737_v13 = vsel %vm669_vm3, %v1688_v4, 0.0 }
 0x8f3   :  { %7826 = vmatpush3.xpose.msk.msra.mxu1 %vm669_vm3, %v1908_v34  ;;  %1762 = vadd.xlane.f32.xlu1 %v1761_v6 }
 0x8f4   :  { %1759 = vadd.xlane.f32.xlu0 %v1758_v9  ;;  %7827 = vmatprep.mubr.msk.f32.mxu1 %vm8384_vm1, %v8383_v15 }
 0x8f5   :  { %v1706_v7 = vpop.permute.xlu1 %1705  ;;  %v1690_v0 = vpop.permute.xlu0 %1689  ;;  %7835 = vmatprep.subr.mxu1 %v8383_v15  ;;  %7832 = vmatprep.mubr.msk.f32.mxu0 %vm8384_vm1, %v8383_v15 }
 0x8f6   :  { %7828 = vmatmul.mubr.msk.f32.vlgmr.msra.gmra.mxu1 %vm669_vm3, %v1906_v40  ;;  %v1764_v11 = vsel %vm669_vm3, %v1706_v7, 0.0  ;;  %v1740_v19 = vsel %vm669_vm3, %v1690_v0, 0.0 }
 0x8f7   :  { %1765 = vadd.xlane.f32.xlu1 %v1764_v11  ;;  %7837 = vmatprep.mubr.msk.f32.mxu1 %vm8384_vm1, %v8383_v15 }
 0x8f8   :  { %1738 = vadd.xlane.f32.xlu0 %v1737_v13 }
 0x8f9   :  { %v1708_v1 = vpop.permute.xlu1 %1707  ;;  %v1692_v16 = vpop.permute.xlu0 %1691 }
 0x8fa   :  { %v1767_v18 = vsel %vm669_vm3, %v1708_v1, 0.0  ;;  %v1743_v31 = vsel %vm669_vm3, %v1692_v16, 0.0 }
 0x8fb   :  { %1768 = vadd.xlane.f32.xlu1 %v1767_v18 }
 0x8fc   :  { %1741 = vadd.xlane.f32.xlu0 %v1740_v19 }
 0x8fd   :  { %v1710_v20 = vpop.permute.xlu1 %1709  ;;  %v1694_v26 = vpop.permute.xlu0 %1693 }
 0x8fe   :  { %v1770_v28 = vsel %vm669_vm3, %v1710_v20, 0.0  ;;  %v1746_v37 = vsel %vm669_vm3, %v1694_v26, 0.0 }
 0x8ff   :  { %1771 = vadd.xlane.f32.xlu1 %v1770_v28 }
 0x900   :  { %1744 = vadd.xlane.f32.xlu0 %v1743_v31 }
 0x901   :  { %v1712_v32 = vpop.permute.xlu1 %1711  ;;  %v1696_v34 = vpop.permute.xlu0 %1695 }
 0x902   :  { %v1773_v36 = vsel %vm669_vm3, %v1712_v32, 0.0  ;;  %v1749_v41 = vsel %vm669_vm3, %v1696_v34, 0.0 }
 0x903   :  { %1774 = vadd.xlane.f32.xlu1 %v1773_v36 }
 0x904   :  { %1747 = vadd.xlane.f32.xlu0 %v1746_v37 }
 0x905   :  { %v1714_v39 = vpop.permute.xlu1 %1713  ;;  %v1698_v44 = vpop.permute.xlu0 %1697 }
 0x906   :  { %v1776_v40 = vsel %vm669_vm3, %v1714_v39, 0.0  ;;  %v1752_v45 = vsel %vm669_vm3, %v1698_v44, 0.0 }
 0x907   :  { %1777 = vadd.xlane.f32.xlu1 %v1776_v40 }
 0x908   :  { %1750 = vadd.xlane.f32.xlu0 %v1749_v41 }
 0x90c   :  { %1753 = vadd.xlane.f32.xlu0 %v1752_v45 }
 0x974   :  { %v1733_v50 = vpop.xlane.xlu0 %1732  ;;  %v1736_v56 = vpop.xlane.xlu1 %1735 }
 0x975   :  { %v1798_v7 = vrot.slane %v1736_v56, %v8543_v42  ;;  %v1794_v0 = vrot.slane %v1733_v50, %v8543_v42 }
 0x977   :  { %v1823_v20 = vsel %vm760_vm4, %v1798_v7, %v1794_v0 }
 0x978   :  { %v1757_v53 = vpop.xlane.xlu0 %1756 }
 0x979   :  { %v1920_v26 = vrot.slane %v1757_v53, %v8543_v42 }
 0x97c   :  { %v1763_v59 = vpop.xlane.xlu1 %1762 }
 0x97d   :  { %v1760_v54 = vpop.xlane.xlu0 %1759  ;;  %v1928_v31 = vrot.slane %v1763_v59, %v8543_v42 }
 0x97e   :  { %v1924_v1 = vrot.slane %v1760_v54, %v8543_v42 }
 0x980   :  { %v1766_v51 = vpop.xlane.xlu1 %1765  ;;  %v1949_v36 = vsel %vm760_vm4, %v1924_v1, %v1920_v26 }
 0x981   :  { %v1739_v60 = vpop.xlane.xlu0 %1738  ;;  %v1932_v37 = vrot.slane %v1766_v51, %v8543_v42 }
 0x982   :  { %v1802_v11 = vrot.slane %v1739_v60, %v8543_v42  ;;  %v1950_v60 = vsel %vm762_vm5, %v1928_v31, %v1949_v36 }
 0x983   :  { %v1951_v51 = vsel %vm764_vm6, %v1932_v37, %v1950_v60 }
 0x984   :  { %v1769_v3 = vpop.xlane.xlu1 %1768  ;;  %v1824_v32 = vsel %vm762_vm5, %v1802_v11, %v1823_v20 }
 0x985   :  { %v1742_v61 = vpop.xlane.xlu0 %1741  ;;  %v1936_v44 = vrot.slane %v1769_v3, %v8543_v42 }
 0x986   :  { %v1806_v16 = vrot.slane %v1742_v61, %v8543_v42 }
 0x988   :  { %v1772_v6 = vpop.xlane.xlu1 %1771  ;;  %v1825_v39 = vsel %vm764_vm6, %v1806_v16, %v1824_v32 }
 0x989   :  { %v1745_v63 = vpop.xlane.xlu0 %1744  ;;  %v1940_v53 = vrot.slane %v1772_v6, %v8543_v42  ;;  %v1952_v6 = vsel %vm766_vm7, %v1936_v44, %v1951_v51 }
 0x98a   :  { %v1810_v18 = vrot.slane %v1745_v63, %v8543_v42 }
 0x98c   :  { %v1775_v13 = vpop.xlane.xlu1 %1774  ;;  %v1826_v45 = vsel %vm766_vm7, %v1810_v18, %v1825_v39 }
 0x98d   :  { %v1748_v4 = vpop.xlane.xlu0 %1747  ;;  %v1944_v59 = vrot.slane %v1775_v13, %v8543_v42  ;;  %v1953_v13 = vsel %vm768_vm8, %v1940_v53, %v1952_v6 }
 0x98e   :  { %v1814_v28 = vrot.slane %v1748_v4, %v8543_v42 }
 0x98f   :  { %v1954_v16 = vsel %vm770_vm9, %v1944_v59, %v1953_v13 }
 0x990   :  { %v1778_v50 = vpop.xlane.xlu1 %1777  ;;  %v1827_v56 = vsel %vm768_vm8, %v1814_v28, %v1826_v45 }
 0x991   :  { %v1751_v9 = vpop.xlane.xlu0 %1750  ;;  %v1948_v63 = vrot.slane %v1778_v50, %v8543_v42 }
 0x992   :  { %v1818_v34 = vrot.slane %v1751_v9, %v8543_v42 }
 0x994   :  { %v1828_v61 = vsel %vm770_vm9, %v1818_v34, %v1827_v56 }
 0x995   :  { %v1754_v19 = vpop.xlane.xlu0 %1753 }
 0x996   :  { %v1822_v40 = vrot.slane %v1754_v19, %v8543_v42  ;;  %v1955_v19 = vsel %vm772_vm10, %v1948_v63, %v1954_v16 }
 0x998   :  { %v1829_v3 = vsel %vm772_vm10, %v1822_v40, %v1828_v61 }
 0x9ae   :  { %v8949_v41 = vpop.f32.mrf.mxu0 }
 0x9b0   :  { %v7814_v54 = vpop.f32.mrf.mxu0 }
 0x9b2   :  { %v8960_v4 = vpop.f32.mrf.mxu1  ;;  %v1901_v9 = vpop.f32.mrf.mxu0 }
 0x9b3   :  { %v8099_v7 = vpack.i.bf16 %v8960_v4, %v8949_v41  ;;  %v1902_v0 = vadd.f32 %v1901_v9, %v1829_v3 }
 0x9b4   :  { %v7819_v11 = vpop.f32.mrf.mxu1  ;;  %v7824_v1 = vpop.f32.mrf.mxu0 }
 0x9b5   :  { %v2031_v18 = vsel %vm669_vm3, %v1902_v0, -inf }
 0x9b6   :  { %v2027_v20 = vpop.f32.mrf.mxu1  ;;  %2032 = vmax.xlane.f32.xlu0 %v2031_v18 }
 0x9b7   :  { %v2028_v26 = vadd.f32 %v2027_v20, %v1955_v19 }
 0x9b8   :  { %v7829_v28 = vpop.f32.mrf.mxu1 }
 0x9b9   :  { %v2034_v31 = vsel %vm669_vm3, %v2028_v26, -inf }
 0x9ba   :  { %2035 = vmax.xlane.f32.xlu1 %v2034_v31 }
 0x9cb   :  { %2129 = vrot.lane.b32.xlu1 %v8555_v57, %s8387_s26 }
 0x9cf   :  { %2303 = vrot.lane.b32.xlu1 %v8573_v10, %s8388_s27 }
 0x9d3   :  { %2429 = vrot.lane.b32.xlu1 %v8600_v25, %s8388_s27 }
 0xa3f   :  { %v2033_v32 = vpop.xlane.xlu0 %2032 }
 0xa40   :  { %v2037_v34 = vsub.f32 %v1902_v0, %v2033_v32 }
 0xa42   :  { %v2039_v36 = vmul.f32 1.442695, %v2037_v34 }
 0xa43   :  { %v2036_v37 = vpop.xlane.xlu1 %2035 }
 0xa44   :  { %8213 = vpow2.f32 %v2039_v36  ;;  %v2038_v39 = vsub.f32 %v2028_v26, %v2036_v37 }
 0xa46   :  { %v2041_v40 = vmul.f32 1.442695, %v2038_v39 }
 0xa47   :  { %v2130_v44 = vpop.permute.xlu1 %2129 }
 0xa48   :  { %8215 = vpow2.f32 %v2041_v40  ;;  %7836 = vmatpush3.msra.mxu1 %v2130_v44 }
 0xa49   :  { %7845 = vmatprep.subr.mxu1 %v8383_v15 }
 0xa51   :  { %v8214_v45 = vpop.eup %8213 }
 0xa52   :  { %v2043_v50 = vsel %vm669_vm3, %v8214_v45, 0.0 }
 0xa53   :  { %2044 = vadd.xlane.f32.xlu0 %v2043_v50 }
 0xa55   :  { %v8216_v10 = vpop.eup %8215 }
 0xa56   :  { %v2046_v53 = vsel %vm669_vm3, %v8216_v10, 0.0 }
 0xa57   :  { %2047 = vadd.xlane.f32.xlu1 %v2046_v53 }
 0xa68   :  { %2427 = vrot.lane.b32.xlu1 %v8614_v30, %s8388_s27 }
 0xa69   :  { %2053 = vrot.lane.b32.xlu0 %v8550_v49, %s8387_s26 }
 0xa6c   :  { %2207 = vrot.lane.b32.xlu1 %v8595_v22, %s8388_s27 }
 0xa6d   :  { %2301 = vrot.lane.b32.xlu0 %v8584_v14, %s8388_s27  ;;  %v2304_v14 = vpop.permute.xlu1 %2303 }
 0xa70   :  { %2223 = vrot.lane.b32.xlu1 %v8627_v38, %s8388_s27 }
 0xa71   :  { %2205 = vrot.lane.b32.xlu0 %v8593_v21, %s8388_s27  ;;  %v2430_v21 = vpop.permute.xlu1 %2429 }
 0xa74   :  { %2225 = vrot.lane.b32.xlu1 %v8640_v48, %s8388_s27 }
 0xa75   :  { %2221 = vrot.lane.b32.xlu0 %v8646_v52, %s8388_s27 }
 0xa78   :  { %2227 = vrot.lane.b32.xlu1 %v8667_v8, %s8388_s27 }
 0xa79   :  { %2209 = vrot.lane.b32.xlu0 %v8612_v29, %s8388_s27 }
 0xa7c   :  { %2229 = vrot.lane.b32.xlu1 %v8652_v58, %s8388_s27 }
 0xa7d   :  { %2211 = vrot.lane.b32.xlu0 %v8662_v2, %s8388_s27 }
 0xa80   :  { %2231 = vrot.lane.b32.xlu1 %v8680_v17, %s8388_s27 }
 0xa81   :  { %2213 = vrot.lane.b32.xlu0 %v8633_v43, %s8388_s27 }
 0xa84   :  { %2233 = vrot.lane.b32.xlu1 %v8693_v27, %s8388_s27 }
 0xa85   :  { %2215 = vrot.lane.b32.xlu0 %v8675_v12, %s8388_s27 }
 0xa88   :  { %2235 = vrot.lane.b32.xlu1 %v8705_v35, %s8388_s27 }
 0xa89   :  { %2217 = vrot.lane.b32.xlu0 %v8688_v23, %s8388_s27 }
 0xa8d   :  { %2219 = vrot.lane.b32.xlu0 %v8701_v33, %s8388_s27 }
 0xadc   :  { %v2045_v22 = vpop.xlane.xlu0 %2044 }
 0xadd   :  { %8217 = vrcp.f32 %v2045_v22 }
 0xae0   :  { %v2048_v25 = vpop.xlane.xlu1 %2047  ;;  %v2054_v29 = vpop.permute.xlu0 %2053 }
 0xae1   :  { %8219 = vrcp.f32 %v2048_v25  ;;  %7831 = vmatpush3.msra.mxu0 %v2054_v29 }
 0xae2   :  { %7840 = vmatprep.subr.mxu0 %v8383_v15 }
 0xae4   :  { %v2428_v30 = vpop.permute.xlu1 %2427  ;;  %v2302_v38 = vpop.permute.xlu0 %2301 }
 0xae8   :  { %v2208_v43 = vpop.permute.xlu1 %2207  ;;  %v2206_v48 = vpop.permute.xlu0 %2205 }
 0xae9   :  { %v2256_v52 = vsel %vm669_vm3, %v2208_v43, 0.0  ;;  %v2253_v58 = vsel %vm669_vm3, %v2206_v48, 0.0 }
 0xaea   :  { %v8218_v2 = vpop.eup %8217  ;;  %2257 = vadd.xlane.f32.xlu1 %v2256_v52  ;;  %2254 = vadd.xlane.f32.xlu0 %v2253_v58 }
 0xaeb   :  { %v2051_v8 = vmul.f32 %v8218_v2, %v8214_v45 }
 0xaec   :  { %v2224_v12 = vpop.permute.xlu1 %2223  ;;  %v2222_v17 = vpop.permute.xlu0 %2221 }
 0xaed   :  { %7833 = vmatmul.mubr.msk.f32.vlgmr.msra.gmra.mxu0 %vm669_vm3, %v2051_v8  ;;  %v2277_v23 = vsel %vm669_vm3, %v2222_v17, 0.0  ;;  %v2280_v60 = vsel %vm669_vm3, %v2224_v12, 0.0 }
 0xaee   :  { %v8220_v27 = vpop.eup %8219  ;;  %7841 = vmatpush3.xpose.msk.msra.mxu0 %vm669_vm3, %v2304_v14  ;;  %2278 = vadd.xlane.f32.xlu0 %v2277_v23 }
 0xaef   :  { %7842 = vmatprep.mubr.msk.f32.mxu0 %vm8384_vm1, %v8383_v15  ;;  %v2052_v33 = vmul.f32 %v8220_v27, %v8216_v10  ;;  %7850 = vmatprep.subr.mxu0 %v8383_v15 }
 0xaf0   :  { %v2226_v35 = vpop.permute.xlu1 %2225  ;;  %v2210_v54 = vpop.permute.xlu0 %2209 }
 0xaf1   :  { %7838 = vmatmul.mubr.msk.f32.vlgmr.msra.gmra.mxu1 %vm669_vm3, %v2052_v33  ;;  %7843 = vmatmul.mubr.msk.f32.vlgmr.msra.gmra.mxu0 %vm669_vm3, %v2302_v38  ;;  %v2283_v56 = vsel %vm669_vm3, %v2226_v35, 0.0  ;;  %v2259_v63 = vsel %vm669_vm3, %v2210_v54, 0.0 }
 0xaf2   :  { %7846 = vmatpush3.xpose.msk.msra.mxu1 %vm669_vm3, %v2430_v21  ;;  %2284 = vadd.xlane.f32.xlu1 %v2283_v56 }
 0xaf3   :  { %2281 = vadd.xlane.f32.xlu0 %v2280_v60  ;;  %7847 = vmatprep.mubr.msk.f32.mxu1 %vm8384_vm1, %v8383_v15 }
 0xaf4   :  { %v2228_v59 = vpop.permute.xlu1 %2227  ;;  %v2212_v61 = vpop.permute.xlu0 %2211  ;;  %7855 = vmatprep.subr.mxu1 %v8383_v15  ;;  %7852 = vmatprep.mubr.msk.f32.mxu0 %vm8384_vm1, %v8383_v15 }
 0xaf5   :  { %7848 = vmatmul.mubr.msk.f32.vlgmr.msra.gmra.mxu1 %vm669_vm3, %v2428_v30  ;;  %v2286_v51 = vsel %vm669_vm3, %v2228_v59, 0.0  ;;  %v2262_v0 = vsel %vm669_vm3, %v2212_v61, 0.0 }
 0xaf6   :  { %2287 = vadd.xlane.f32.xlu1 %v2286_v51  ;;  %7857 = vmatprep.mubr.msk.f32.mxu1 %vm8384_vm1, %v8383_v15 }
 0xaf7   :  { %2260 = vadd.xlane.f32.xlu0 %v2259_v63 }
 0xaf8   :  { %v2230_v3 = vpop.permute.xlu1 %2229  ;;  %v2214_v9 = vpop.permute.xlu0 %2213 }
 0xaf9   :  { %v2289_v6 = vsel %vm669_vm3, %v2230_v3, 0.0  ;;  %v2265_v16 = vsel %vm669_vm3, %v2214_v9, 0.0 }
 0xafa   :  { %2290 = vadd.xlane.f32.xlu1 %v2289_v6 }
 0xafb   :  { %2263 = vadd.xlane.f32.xlu0 %v2262_v0 }
 0xafc   :  { %v2232_v11 = vpop.permute.xlu1 %2231  ;;  %v2216_v1 = vpop.permute.xlu0 %2215 }
 0xafd   :  { %v2292_v13 = vsel %vm669_vm3, %v2232_v11, 0.0  ;;  %v2268_v26 = vsel %vm669_vm3, %v2216_v1, 0.0 }
 0xafe   :  { %2293 = vadd.xlane.f32.xlu1 %v2292_v13 }
 0xaff   :  { %2266 = vadd.xlane.f32.xlu0 %v2265_v16 }
 0xb00   :  { %v2234_v18 = vpop.permute.xlu1 %2233  ;;  %v2218_v19 = vpop.permute.xlu0 %2217 }
 0xb01   :  { %v2295_v20 = vsel %vm669_vm3, %v2234_v18, 0.0  ;;  %v2271_v32 = vsel %vm669_vm3, %v2218_v19, 0.0 }
 0xb02   :  { %2296 = vadd.xlane.f32.xlu1 %v2295_v20 }
 0xb03   :  { %2269 = vadd.xlane.f32.xlu0 %v2268_v26 }
 0xb04   :  { %v2236_v28 = vpop.permute.xlu1 %2235  ;;  %v2220_v34 = vpop.permute.xlu0 %2219 }
 0xb05   :  { %v2298_v31 = vsel %vm669_vm3, %v2236_v28, 0.0  ;;  %v2274_v36 = vsel %vm669_vm3, %v2220_v34, 0.0 }
 0xb06   :  { %2299 = vadd.xlane.f32.xlu1 %v2298_v31 }
 0xb07   :  { %2272 = vadd.xlane.f32.xlu0 %v2271_v32 }
 0xb0b   :  { %2275 = vadd.xlane.f32.xlu0 %v2274_v36 }
 0xb73   :  { %v2255_v37 = vpop.xlane.xlu0 %2254  ;;  %v2258_v44 = vpop.xlane.xlu1 %2257 }
 0xb74   :  { %v2320_v30 = vrot.slane %v2258_v44, %v8543_v42  ;;  %v2316_v38 = vrot.slane %v2255_v37, %v8543_v42 }
 0xb76   :  { %v2345_v12 = vsel %vm760_vm4, %v2320_v30, %v2316_v38 }
 0xb77   :  { %v2279_v39 = vpop.xlane.xlu0 %2278 }
 0xb78   :  { %v2442_v17 = vrot.slane %v2279_v39, %v8543_v42 }
 0xb7b   :  { %v2285_v50 = vpop.xlane.xlu1 %2284 }
 0xb7c   :  { %v2282_v40 = vpop.xlane.xlu0 %2281  ;;  %v2450_v27 = vrot.slane %v2285_v50, %v8543_v42 }
 0xb7d   :  { %v2446_v52 = vrot.slane %v2282_v40, %v8543_v42 }
 0xb7f   :  { %v2288_v53 = vpop.xlane.xlu1 %2287  ;;  %v2471_v54 = vsel %vm760_vm4, %v2446_v52, %v2442_v17  ;;  %v8142_v17 = vld [vmem:[%s10241_s1 + $0x30] sm:$0xff]  }
 0xb80   :  { %v2261_v45 = vpop.xlane.xlu0 %2260  ;;  %v2454_v56 = vrot.slane %v2288_v53, %v8543_v42  ;;  %v2472_v11 = vsel %vm762_vm5, %v2450_v27, %v2471_v54 }
 0xb81   :  { %v2324_v43 = vrot.slane %v2261_v45, %v8543_v42 }
 0xb82   :  { %v2473_v16 = vsel %vm764_vm6, %v2454_v56, %v2472_v11 }
 0xb83   :  { %v2291_v21 = vpop.xlane.xlu1 %2290  ;;  %v2346_v33 = vsel %vm762_vm5, %v2324_v43, %v2345_v12 }
 0xb84   :  { %v2264_v10 = vpop.xlane.xlu0 %2263  ;;  %v2458_v51 = vrot.slane %v2291_v21, %v8543_v42 }
 0xb85   :  { %v2328_v58 = vrot.slane %v2264_v10, %v8543_v42 }
 0xb86   :  { %v2474_v28 = vsel %vm766_vm7, %v2458_v51, %v2473_v16 }
 0xb87   :  { %v2294_v25 = vpop.xlane.xlu1 %2293  ;;  %v2347_v60 = vsel %vm764_vm6, %v2328_v58, %v2346_v33 }
 0xb88   :  { %v2267_v14 = vpop.xlane.xlu0 %2266  ;;  %v2462_v9 = vrot.slane %v2294_v25, %v8543_v42 }
 0xb89   :  { %v2332_v2 = vrot.slane %v2267_v14, %v8543_v42 }
 0xb8a   :  { %v2475_v37 = vsel %vm768_vm8, %v2462_v9, %v2474_v28 }
 0xb8b   :  { %v2297_v48 = vpop.xlane.xlu1 %2296  ;;  %v2348_v63 = vsel %vm766_vm7, %v2332_v2, %v2347_v60 }
 0xb8c   :  { %v2270_v22 = vpop.xlane.xlu0 %2269  ;;  %v2466_v1 = vrot.slane %v2297_v48, %v8543_v42 }
 0xb8d   :  { %v2336_v23 = vrot.slane %v2270_v22, %v8543_v42 }
 0xb8e   :  { %v2476_v39 = vsel %vm770_vm9, %v2466_v1, %v2475_v37 }
 0xb8f   :  { %v2300_v3 = vpop.xlane.xlu1 %2299  ;;  %v2349_v0 = vsel %vm768_vm8, %v2336_v23, %v2348_v63 }
 0xb90   :  { %v2273_v29 = vpop.xlane.xlu0 %2272  ;;  %v2470_v18 = vrot.slane %v2300_v3, %v8543_v42 }
 0xb91   :  { %v2340_v35 = vrot.slane %v2273_v29, %v8543_v42 }
 0xb92   :  { %v2477_v44 = vsel %vm772_vm10, %v2470_v18, %v2476_v39 }
 0xb93   :  { %v2350_v13 = vsel %vm770_vm9, %v2340_v35, %v2349_v0 }
 0xb94   :  { %v2276_v8 = vpop.xlane.xlu0 %2275 }
 0xb95   :  { %v2344_v59 = vrot.slane %v2276_v8, %v8543_v42 }
 0xb97   :  { %v2351_v20 = vsel %vm772_vm10, %v2344_v59, %v2350_v13 }
 0xbad   :  { %v2125_v61 = vpop.f32.mrf.mxu0 }
 0xbaf   :  { %v7834_v6 = vpop.f32.mrf.mxu0 }
 0xbb1   :  { %v2201_v19 = vpop.f32.mrf.mxu1  ;;  %v2423_v26 = vpop.f32.mrf.mxu0 }
 0xbb2   :  { %v8104_v31 = vpack.i.bf16 %v2201_v19, %v2125_v61  ;;  %v2424_v32 = vadd.f32 %v2423_v26, %v2351_v20 }
 0xbb3   :  { %v7839_v34 = vpop.f32.mrf.mxu1  ;;  %v7844_v36 = vpop.f32.mrf.mxu0 }
 0xbb4   :  { %v2553_v40 = vsel %vm669_vm3, %v2424_v32, -inf }
 0xbb5   :  { %v2549_v45 = vpop.f32.mrf.mxu1  ;;  %2554 = vmax.xlane.f32.xlu0 %v2553_v40 }
 0xbb6   :  { %v2550_v50 = vadd.f32 %v2549_v45, %v2477_v44 }
 0xbb7   :  { %v7849_v10 = vpop.f32.mrf.mxu1 }
 0xbb8   :  { %v2556_v53 = vsel %vm669_vm3, %v2550_v50, -inf }
 0xbb9   :  { %2557 = vmax.xlane.f32.xlu1 %v2556_v53 }
 0xc3e   :  { %v2555_v14 = vpop.xlane.xlu0 %2554 }
 0xc3f   :  { %v2559_v21 = vsub.f32 %v2424_v32, %v2555_v14 }
 0xc41   :  { %v2561_v22 = vmul.f32 1.442695, %v2559_v21 }
 0xc42   :  { %v2558_v25 = vpop.xlane.xlu1 %2557 }
 0xc43   :  { %8221 = vpow2.f32 %v2561_v22  ;;  %v2560_v29 = vsub.f32 %v2550_v50, %v2558_v25  ;;  %v8143_v22 = vld [vmem:[%s10241_s1 + $0x48] sm:$0xff]   ;;  %v8144_v25 = vld [vmem:[%s10241_s1 + $0x58] sm:$0xff]  }
 0xc45   :  { %v2563_v30 = vmul.f32 1.442695, %v2560_v29  ;;  %v8145_v29 = vld [vmem:[%s10241_s1 + $0x40] sm:$0xff]  }
 0xc47   :  { %8223 = vpow2.f32 %v2563_v30  ;;  %v8146_v30 = vld [vmem:[%s10241_s1 + $0x50] sm:$0xff]  }
 0xc50   :  { %v8222_v38 = vpop.eup %8221 }
 0xc51   :  { %v2565_v43 = vsel %vm669_vm3, %v8222_v38, 0.0 }
 0xc52   :  { %2566 = vadd.xlane.f32.xlu0 %v2565_v43 }
 0xc54   :  { %v8224_v48 = vpop.eup %8223 }
 0xc55   :  { %v2568_v52 = vsel %vm669_vm3, %v8224_v48, 0.0 }
 0xc56   :  { %2569 = vadd.xlane.f32.xlu1 %v2568_v52 }
 0xc67   :  { %2651 = vrot.lane.b32.xlu1 %v8555_v57, %s8388_s27 }
 0xc68   :  { %2575 = vrot.lane.b32.xlu0 %v8550_v49, %s8388_s27 }
 0xc6b   :  { %8100 = vrot.lane.b32.xlu1 %v8099_v7, %s8389_s28  ;;  %v8141_v7 = vld [vmem:[%s10241_s1 + $0x38] sm:$0xff]  }
 0xc6f   :  { %8105 = vrot.lane.b32.xlu1 %v8104_v31, %s8390_s29 }
 0xcdb   :  { %v2567_v58 = vpop.xlane.xlu0 %2566 }
 0xcdc   :  { %8225 = vrcp.f32 %v2567_v58 }
 0xcdf   :  { %v2570_v2 = vpop.xlane.xlu1 %2569  ;;  %v2576_v8 = vpop.permute.xlu0 %2575 }
 0xce0   :  { %8227 = vrcp.f32 %v2570_v2  ;;  %7851 = vmatpush3.msra.mxu0 %v2576_v8 }
 0xce1   :  { %7860 = vmatprep.subr.bf16.mxu0 %v8383_v15 }
 0xce3   :  { %v2652_v57 = vpop.permute.xlu1 %2651 }
 0xce4   :  { %7856 = vmatpush3.msra.mxu1 %v2652_v57 }
 0xce5   :  { %7868 = vmatprep.subr.bf16.mxu1 %v8383_v15 }
 0xce7   :  { %v8101_v56 = vpop.permute.xlu1 %8100 }
 0xce8   :  { %v8103_v59 = vunpack.i.h.bf16 %v8101_v56  ;;  %v8102_v61 = vunpack.i.l.bf16 %v8101_v56 }
 0xce9   :  { %v8226_v49 = vpop.eup %8225 }
 0xcea   :  { %v2573_v12 = vmul.f32 %v8226_v49, %v8222_v38  ;;  %v2752_v9 = vsel %vm669_vm3, %v8844_v46, %v8103_v59  ;;  %v2751_v6 = vsel %vm669_vm3, %v8832_v24, %v8102_v61  ;;  %v7340_v24 = vld [vmem:[%s10244_s4 + $0x8] ss:$0 sm:$0xff]  ;;  %v7344_v49 = vld [vmem:[%s10244_s4 + $0x9] ss:$0 sm:$0xff] }
 0xceb   :  { %v8106_v60 = vpop.permute.xlu1 %8105 }
 0xcec   :  { %7853 = vmatmul.mubr.msk.f32.vlgmr.msra.gmra.mxu0 %vm669_vm3, %v2573_v12  ;;  %v8108_v51 = vunpack.i.h.bf16 %v8106_v60  ;;  %v8107_v63 = vunpack.i.l.bf16 %v8106_v60 }
 0xced   :  { %v8228_v41 = vpop.eup %8227  ;;  %7864 = vmatprep.mubr.msk.bf16.mxu0 %vm8384_vm1, %v8383_v15  ;;  %7861 = vmatpush3.bf16.msra.mxu0 %v8141_v7  ;;  %v7345_v7 = vld [vmem:[%s10244_s4 + $0xa] ss:$0 sm:$0xff] }
 0xcee   :  { %v2574_v4 = vmul.f32 %v8228_v41, %v8224_v48  ;;  %7862 = vmatprep.subr.bf16.mxu0 %v8383_v15  ;;  %v2755_v1 = vsel %vm2753_vm11, %v2752_v9, %v8108_v51  ;;  %v2754_v13 = vsel %vm2753_vm11, %v2751_v6, %v8107_v63 }
 0xcf0   :  { %7858 = vmatmul.mubr.msk.f32.vlgmr.msra.gmra.mxu1 %vm669_vm3, %v2574_v4 }
 0xcf1   :  { %7872 = vmatprep.mubr.msk.bf16.mxu1 %vm8384_vm1, %v8383_v15  ;;  %7863 = vmatpush3.bf16.msra.mxu0 %v8142_v17 }
 0xcf2   :  { %7876 = vmatprep.subr.bf16.mxu0 %v8383_v15  ;;  %7869 = vmatpush3.bf16.msra.mxu1 %v8143_v22  ;;  %v7365_v22 = vld [vmem:[%s10243_s3 + $0x48] sm:$0xff] }
 0xcf3   :  { %7870 = vmatprep.subr.bf16.mxu1 %v8383_v15 }
 0xcf6   :  { %7871 = vmatpush3.bf16.msra.mxu1 %v8145_v29 }
 0xcf7   :  { %7884 = vmatprep.subr.bf16.mxu1 %v8383_v15 }
 0xdac   :  { %v2647_v23 = vpop.f32.mrf.mxu0 }
 0xdae   :  { %v7854_v27 = vpop.f32.mrf.mxu0 }
 0xdb0   :  { %v2723_v33 = vpop.f32.mrf.mxu1 }
 0xdb1   :  { %v8109_v35 = vpack.i.bf16 %v2723_v33, %v2647_v23 }
 0xdb2   :  { %v7859_v54 = vpop.f32.mrf.mxu1 }
 0xdb3   :  { %8110 = vrot.lane.b32.xlu0 %v8109_v35, %s8391_s9  ;;  %v7358_v35 = vld [vmem:[%s10244_s4 + $0xc] ss:$0 sm:$0xff] }
 0xe25   :  { %v8111_v3 = vpop.permute.xlu0 %8110 }
 0xe26   :  { %v8113_v0 = vunpack.i.h.bf16 %v8111_v3  ;;  %v8112_v11 = vunpack.i.l.bf16 %v8111_v3 }
 0xe28   :  { %v2758_v16 = vsel %vm2756_vm12, %v2755_v1, %v8113_v0  ;;  %v2757_v18 = vsel %vm2756_vm12, %v2754_v13, %v8112_v11 }
 0xe29   :  { %v2764_v19 = vpack.c.bf16 %v2758_v16, %v2757_v18 }
 0xe2b   :  { %7865 = vmatmul.mubr.msk.bf16.vlgmr.msra.gmra.mxu0 %vm26_vm0, %v2764_v19  ;;  %v7350_v19 = vld [vmem:[%s10244_s4 + $0xb] ss:$0 sm:$0xff] }
 0xe2c   :  { %7880 = vmatprep.mubr.msk.bf16.mxu0 %vm8384_vm1, %v8383_v15  ;;  %7877 = vmatpush3.bf16.msra.mxu0 %v8144_v25  ;;  %v7366_v25 = vld [vmem:[%s10243_s3 + $0x50] sm:$0xff] }
 0xe2d   :  { %7878 = vmatprep.subr.bf16.mxu0 %v8383_v15 }
 0xe30   :  { %7879 = vmatpush3.bf16.msra.mxu0 %v8146_v30 }
 0xe31   :  { %7892 = vmatprep.subr.bf16.mxu0 %v8383_v15 }
 0xeeb   :  { %v2819_v46 = vpop.f32.mrf.mxu0 }
 0xeec   :  { %v2820_v20 = vadd.f32 %v7340_v24, %v2819_v46 }
 0xeed   :  { %v7866_v26 = vpop.f32.mrf.mxu0 }
 0xeee   :  { %v9126_v28 = vadd.f32 %v2820_v20, %v8491_v62 }
 0xeef   :  { %v2822_v31 = vpop.f32.mrf.mxu0 }
 0xef0   :  { %v2823_v32 = vadd.f32 %v7340_v24, %v2822_v31  ;;  %v2830_v34 = vsel %vm26_vm0, %v9126_v28, 0.0 }
 0xef1   :  { %2831 = vadd.xlane.f32.xlu1 %v2830_v34  ;;  %v7867_v36 = vpop.f32.mrf.mxu0 }
 0xef2   :  { %v9131_v37 = vadd.f32 %v2823_v32, %v8496_v5 }
 0xef4   :  { %v2833_v39 = vsel %vm26_vm0, %v9131_v37, 0.0 }
 0xef5   :  { %2834 = vadd.xlane.f32.xlu0 %v2833_v39 }
 0xf7a   :  { %v2832_v40 = vpop.xlane.xlu1 %2831 }
 0xf7b   :  { %v2836_v44 = vmul.f32 0.03125, %v2832_v40 }
 0xf7d   :  { %v2838_v45 = vsub.f32 %v9126_v28, %v2836_v44 }
 0xf7e   :  { %v2835_v62 = vpop.xlane.xlu0 %2834 }
 0xf7f   :  { %v2837_v50 = vmul.f32 0.03125, %v2835_v62  ;;  %v2840_v10 = vmul.f32 %v2838_v45, %v2838_v45 }
 0xf81   :  { %v2839_v53 = vsub.f32 %v9131_v37, %v2837_v50  ;;  %v2842_v14 = vsel %vm26_vm0, %v2840_v10, 0.0 }
 0xf82   :  { %2843 = vadd.xlane.f32.xlu0 %v2842_v14  ;;  %v7364_v14 = vld [vmem:[%s10243_s3 + $0x40] sm:$0xff] }
 0xf83   :  { %v2841_v21 = vmul.f32 %v2839_v53, %v2839_v53 }
 0xf85   :  { %v2845_v5 = vsel %vm26_vm0, %v2841_v21, 0.0 }
 0xf86   :  { %2846 = vadd.xlane.f32.xlu0 %v2845_v5 }
0x100b   :  { %v2844_v38 = vpop.xlane.xlu0 %2843 }
0x100c   :  { %v2848_v43 = vmul.f32 0.03125, %v2844_v38 }
0x100e   :  { %v2850_v48 = vadd.f32 1e-05, %v2848_v43 }
0x100f   :  { %v2847_v52 = vpop.xlane.xlu0 %2846 }
0x1010   :  { %8229 = vrsqrt.f32 %v2850_v48  ;;  %v2849_v58 = vmul.f32 0.03125, %v2847_v52 }
0x1012   :  { %v2851_v2 = vadd.f32 1e-05, %v2849_v58 }
0x1014   :  { %8231 = vrsqrt.f32 %v2851_v2  ;;  %v7367_v2 = vld [vmem:[%s10243_s3 + $0x58] sm:$0xff] }
0x101d   :  { %v8230_v8 = vpop.eup %8229 }
0x101e   :  { %v2854_v57 = vmul.f32 %v8230_v8, %v2838_v45 }
0x1020   :  { %v2860_v4 = vmul.f32 %v7344_v49, %v2854_v57 }
0x1021   :  { %v8232_v12 = vpop.eup %8231 }
0x1022   :  { %v2855_v41 = vmul.f32 %v8232_v12, %v2839_v53  ;;  %v2866_v23 = vadd.f32 %v7345_v7, %v2860_v4  ;;  %v7368_v12 = vld [vmem:[%s10243_s3 + $0x60] sm:$0xff] }
0x1024   :  { %v2861_v17 = vmul.f32 %v7344_v49, %v2855_v41 }
0x1026   :  { %v2867_v27 = vadd.f32 %v7345_v7, %v2861_v17 }
0x1028   :  { %v2868_v33 = vpack.c.bf16 %v2867_v27, %v2866_v23  ;;  %v7369_v23 = vld [vmem:[%s10243_s3 + $0x68] sm:$0xff] }
0x102a   :  { %7873 = vmatmul.mubr.msk.bf16.vlgmr.msra.gmra.mxu1 %vm26_vm0, %v2868_v33  ;;  %7881 = vmatmul.mubr.msk.bf16.vlgmr.msra.gmra.mxu0 %vm26_vm0, %v2868_v33 }
0x102b   :  { %7888 = vmatprep.mubr.msk.bf16.mxu1 %vm8384_vm1, %v8383_v15  ;;  %7896 = vmatprep.mubr.msk.bf16.mxu0 %vm8384_vm1, %v8383_v15 }
0x10ea   :  { %v2928_v54 = vpop.f32.mrf.mxu1  ;;  %v2991_v56 = vpop.f32.mrf.mxu0 }
0x10eb   :  { %v2992_v60 = vadd.f32 %v7358_v35, %v2991_v56  ;;  %v2929_v24 = vadd.f32 %v7350_v19, %v2928_v54 }
0x10ec   :  { %v7874_v59 = vpop.f32.mrf.mxu1  ;;  %v7882_v61 = vpop.f32.mrf.mxu0 }
0x10ed   :  { %v7362_v51 = vmul.f32 -1.442695, %v2992_v60  ;;  %v7370_v61 = vld [vmem:[%s10243_s3 + $0x70] sm:$0xff] }
0x10ee   :  { %v2931_v63 = vpop.f32.mrf.mxu1  ;;  %v2994_v3 = vpop.f32.mrf.mxu0 }
0x10ef   :  { %8233 = vpow2.f32 %v7362_v51  ;;  %v2995_v9 = vadd.f32 %v7358_v35, %v2994_v3  ;;  %v2932_v31 = vadd.f32 %v7350_v19, %v2931_v63 }
0x10f0   :  { %v7875_v6 = vpop.f32.mrf.mxu1  ;;  %v7883_v0 = vpop.f32.mrf.mxu0 }
0x10f1   :  { %v7363_v11 = vmul.f32 -1.442695, %v2995_v9 }
0x10f3   :  { %8235 = vpow2.f32 %v7363_v11 }
0x10fc   :  { %v8234_v1 = vpop.eup %8233 }
0x10fd   :  { %v3004_v13 = vadd.f32 1.0, %v8234_v1 }
0x10ff   :  { %8237 = vrcp.f32 %v3004_v13 }
0x1100   :  { %v8236_v16 = vpop.eup %8235 }
0x1101   :  { %v3005_v18 = vadd.f32 1.0, %v8236_v16 }
0x1103   :  { %8239 = vrcp.f32 %v3005_v18 }
0x110c   :  { %v8238_v46 = vpop.eup %8237 }
0x110d   :  { %v3010_v20 = vmul.f32 %v8238_v46, %v2929_v24  ;;  %v7371_v24 = vld [vmem:[%s10243_s3 + $0x78] sm:$0xff] }
0x110f   :  { %v3021_v26 = vrot.slane %v3010_v20, %v8548_v47  ;;  %v3014_v32 = vcombine.high %v3010_v20, %v3010_v20 }
0x1110   :  { %v8240_v34 = vpop.eup %8239 }
0x1111   :  { %v3029_v36 = vcombine.high %v3021_v26, %v3021_v26  ;;  %v3037_v39 = vrot.slane %v3021_v26, %v8548_v47  ;;  %v3011_v40 = vmul.f32 %v8240_v34, %v2932_v31  ;;  %v3028_v44 = vrot.slane %v3014_v32, %v8548_v47 }
0x1113   :  { %v3070_v45 = vrot.slane %v3011_v40, %v8548_v47  ;;  %v3030_v62 = vcombine.high %v3028_v44, %v3028_v44  ;;  %v3044_v50 = vrot.slane %v3028_v44, %v8548_v47  ;;  %v3051_v10 = vrot.slane %v3029_v36, %v8548_v47 }
0x1114   :  { %v3059_v53 = vcombine.high %v3037_v39, %v3037_v39  ;;  %v3124_v21 = vrot.slane %v3037_v39, %v8553_v55  ;;  %v3063_v29 = vcombine.high %v3011_v40, %v3011_v40 }
0x1115   :  { %v3058_v5 = vrot.slane %v3030_v62, %v8548_v47  ;;  %v3078_v30 = vcombine.high %v3070_v45, %v3070_v45  ;;  %v3061_v38 = vcombine.high %v3051_v10, %v3051_v10  ;;  %v3128_v43 = vrot.slane %v3051_v10, %v8553_v55 }
0x1116   :  { %v3132_v48 = vrot.slane %v3059_v53, %v8553_v55  ;;  %v3060_v52 = vcombine.high %v3044_v50, %v3044_v50  ;;  %v3140_v8 = vrot.slane %v3044_v50, %v8553_v55  ;;  %v3201_v57 = vmul.f32 %v7364_v14, %v3124_v21 }
0x1117   :  { %v3062_v58 = vcombine.high %v3058_v5, %v3058_v5  ;;  %v3086_v49 = vrot.slane %v3070_v45, %v8548_v47  ;;  %v3136_v41 = vrot.slane %v3061_v38, %v8553_v55  ;;  %v3202_v4 = vmul.f32 %v7365_v22, %v3128_v43 }
0x1118   :  { %v3203_v7 = vmul.f32 %v7366_v25, %v3132_v48  ;;  %v3144_v17 = vrot.slane %v3058_v5, %v8553_v55  ;;  %v3217_v33 = vsel %vm26_vm0, %v3201_v57, 0.0  ;;  %v3148_v54 = vrot.slane %v3060_v52, %v8553_v55 }
0x1119   :  { %v3204_v27 = vmul.f32 %v7367_v2, %v3136_v41  ;;  %v3218_v35 = vsel %vm26_vm0, %v3202_v4, 0.0  ;;  %v3152_v56 = vrot.slane %v3062_v58, %v8553_v55  ;;  %v3205_v60 = vmul.f32 %v7368_v12, %v3140_v8  ;;  %v7372_v8 = vld [vmem:[%s10244_s4 + $0xd] ss:$0 sm:$0xff] }
0x111a   :  { %v3219_v59 = vadd.f32 %v3218_v35, %v3217_v33  ;;  %v3220_v51 = vsel %vm26_vm0, %v3203_v7, 0.0  ;;  %v3077_v63 = vrot.slane %v3063_v29, %v8548_v47  ;;  %v3100_v3 = vrot.slane %v3078_v30, %v8548_v47 }
0x111b   :  { %v3108_v9 = vcombine.high %v3086_v49, %v3086_v49  ;;  %v3206_v6 = vmul.f32 %v7369_v23, %v3144_v17  ;;  %v3222_v11 = vsel %vm26_vm0, %v3204_v27, 0.0  ;;  %v3156_v1 = vrot.slane %v3086_v49, %v8553_v55 }
0x111c   :  { %v3221_v0 = vadd.f32 %v3220_v51, %v3219_v59  ;;  %v3079_v13 = vcombine.high %v3077_v63, %v3077_v63  ;;  %v3093_v16 = vrot.slane %v3077_v63, %v8548_v47  ;;  %v3110_v18 = vcombine.high %v3100_v3, %v3100_v3 }
0x111d   :  { %v3160_v19 = vrot.slane %v3100_v3, %v8553_v55  ;;  %v3207_v46 = vmul.f32 %v7370_v61, %v3148_v54  ;;  %v3164_v26 = vrot.slane %v3108_v9, %v8553_v55  ;;  %v3209_v31 = vmul.f32 %v7364_v14, %v3156_v1 }
0x111e   :  { %v3223_v20 = vadd.f32 %v3222_v11, %v3221_v0  ;;  %v3224_v32 = vsel %vm26_vm0, %v3205_v60, 0.0  ;;  %v3107_v34 = vrot.slane %v3079_v13, %v8548_v47  ;;  %v3109_v36 = vcombine.high %v3093_v16, %v3093_v16 }
0x111f   :  { %v3168_v39 = vrot.slane %v3110_v18, %v8553_v55  ;;  %v3172_v44 = vrot.slane %v3093_v16, %v8553_v55  ;;  %v3210_v45 = vmul.f32 %v7365_v22, %v3160_v19  ;;  %v3211_v62 = vmul.f32 %v7366_v25, %v3164_v26 }
0x1120   :  { %v3225_v40 = vadd.f32 %v3224_v32, %v3223_v20  ;;  %v3208_v50 = vmul.f32 %v7371_v24, %v3152_v56  ;;  %v3226_v10 = vsel %vm26_vm0, %v3206_v6, 0.0  ;;  %v3111_v53 = vcombine.high %v3107_v34, %v3107_v34  ;;  %v8148_v20 = vld [vmem:[%s10241_s1 + $0x60] sm:$0xff]  }
0x1121   :  { %v3232_v21 = vsel %vm26_vm0, %v3209_v31, 0.0  ;;  %v3176_v14 = vrot.slane %v3107_v34, %v8553_v55  ;;  %v3212_v29 = vmul.f32 %v7367_v2, %v3168_v39  ;;  %v3233_v30 = vsel %vm26_vm0, %v3210_v45, 0.0 }
0x1122   :  { %v3227_v5 = vadd.f32 %v3226_v10, %v3225_v40  ;;  %v3228_v38 = vsel %vm26_vm0, %v3207_v46, 0.0  ;;  %v3234_v43 = vadd.f32 %v3233_v30, %v3232_v21  ;;  %v3180_v52 = vrot.slane %v3109_v36, %v8553_v55  ;;  %v8147_v46 = vld [vmem:[%s10241_s1 + $0x68] sm:$0xff]  }
0x1123   :  { %v3213_v22 = vmul.f32 %v7368_v12, %v3172_v44  ;;  %v3235_v25 = vsel %vm26_vm0, %v3211_v62, 0.0  ;;  %v3230_v58 = vsel %vm26_vm0, %v3208_v50, 0.0  ;;  %v3184_v2 = vrot.slane %v3111_v53, %v8553_v55  ;;  %7885 = vmatpush3.bf16.msra.mxu1 %v8147_v46  ;;  %v7373_v44 = vld [vmem:[%s10244_s4 + $0xe] ss:$0 sm:$0xff]  ;;  %v7374_v62 = vld [vmem:[%s10244_s4 + $0xf] ss:$0 sm:$0xff] }
0x1124   :  { %v3229_v48 = vadd.f32 %v3228_v38, %v3227_v5  ;;  %v3236_v57 = vadd.f32 %v3235_v25, %v3234_v43  ;;  %v3214_v41 = vmul.f32 %v7369_v23, %v3176_v14  ;;  %v3237_v4 = vsel %vm26_vm0, %v3212_v29, 0.0  ;;  %7886 = vmatprep.subr.bf16.mxu1 %v8383_v15  ;;  %v7385_v46 = vld [vmem:[%s10244_s4 + $0x11] ss:$0 sm:$0xff] }
0x1125   :  { %v3215_v27 = vmul.f32 %v7370_v61, %v3180_v52  ;;  %v3239_v12 = vsel %vm26_vm0, %v3213_v22, 0.0  ;;  %v3216_v54 = vmul.f32 %v7371_v24, %v3184_v2 }
0x1126   :  { %v3231_v49 = vadd.f32 %v3230_v58, %v3229_v48  ;;  %v3238_v7 = vadd.f32 %v3237_v4, %v3236_v57  ;;  %v3241_v56 = vsel %vm26_vm0, %v3214_v41, 0.0 }
0x1127   :  { %v3243_v59 = vsel %vm26_vm0, %v3215_v27, 0.0  ;;  %v3245_v23 = vsel %vm26_vm0, %v3216_v54, 0.0  ;;  %7887 = vmatpush3.bf16.msra.mxu1 %v8148_v20 }
0x1128   :  { %v3252_v17 = vadd.f32 %v7372_v8, %v3231_v49  ;;  %v3240_v33 = vadd.f32 %v3239_v12, %v3238_v7  ;;  %7900 = vmatprep.subr.bf16.mxu1 %v8383_v15  ;;  %v7381_v49 = vld [vmem:[%s10244_s4 + $0x10] ss:$0 sm:$0xff] }
0x112a   :  { %v3256_v35 = vsel %vm26_vm0, %v3252_v17, 0.0  ;;  %v3242_v60 = vadd.f32 %v3241_v56, %v3240_v33 }
0x112b   :  { %3257 = vadd.xlane.f32.xlu1 %v3256_v35 }
0x112c   :  { %v3244_v51 = vadd.f32 %v3243_v59, %v3242_v60 }
0x112e   :  { %v3246_v63 = vadd.f32 %v3245_v23, %v3244_v51 }
0x1130   :  { %v3253_v3 = vadd.f32 %v7372_v8, %v3246_v63 }
0x1132   :  { %v3259_v9 = vsel %vm26_vm0, %v3253_v3, 0.0 }
0x1133   :  { %3260 = vadd.xlane.f32.xlu0 %v3259_v9 }
0x11b4   :  { %v3258_v61 = vpop.xlane.xlu1 %3257 }
0x11b5   :  { %v3262_v6 = vmul.f32 0.03125, %v3258_v61  ;;  %v8149_v61 = vld [vmem:[%s10241_s1 + $0x88] sm:$0xff]  }
0x11b6   :  { %7893 = vmatpush3.bf16.msra.mxu0 %v8149_v61 }
0x11b7   :  { %v3264_v0 = vsub.f32 %v3252_v17, %v3262_v6  ;;  %v8150_v6 = vld [vmem:[%s10241_s1 + $0x80] sm:$0xff]   ;;  %7894 = vmatprep.subr.bf16.mxu0 %v8383_v15 }
0x11b9   :  { %v3266_v11 = vmul.f32 %v3264_v0, %v3264_v0 }
0x11ba   :  { %7895 = vmatpush3.bf16.msra.mxu0 %v8150_v6 }
0x11bb   :  { %v3268_v1 = vsel %vm26_vm0, %v3266_v11, 0.0  ;;  %7912 = vmatprep.subr.bf16.mxu0 %v8383_v15 }
0x11bc   :  { %3269 = vadd.xlane.f32.xlu1 %v3268_v1  ;;  %v3261_v13 = vpop.xlane.xlu0 %3260 }
0x11bd   :  { %v3263_v16 = vmul.f32 0.03125, %v3261_v13 }
0x11bf   :  { %v3265_v18 = vsub.f32 %v3253_v3, %v3263_v16 }
0x11c1   :  { %v3267_v19 = vmul.f32 %v3265_v18, %v3265_v18 }
0x11c3   :  { %v3271_v24 = vsel %vm26_vm0, %v3267_v19, 0.0 }
0x11c4   :  { %3272 = vadd.xlane.f32.xlu0 %v3271_v24 }
0x1245   :  { %v3270_v26 = vpop.xlane.xlu1 %3269 }
0x1246   :  { %v3274_v31 = vmul.f32 0.03125, %v3270_v26 }
0x1248   :  { %v3276_v32 = vadd.f32 1e-05, %v3274_v31 }
0x124a   :  { %8241 = vrsqrt.f32 %v3276_v32  ;;  %v7386_v32 = vld [vmem:[%s10244_s4 + $0x12] ss:$0 sm:$0xff] }
0x124d   :  { %v3273_v34 = vpop.xlane.xlu0 %3272 }
0x124e   :  { %v3275_v36 = vmul.f32 0.03125, %v3273_v34 }
0x1250   :  { %v3277_v39 = vadd.f32 1e-05, %v3275_v36 }
0x1252   :  { %8243 = vrsqrt.f32 %v3277_v39 }
0x1257   :  { %v8242_v40 = vpop.eup %8241 }
0x1258   :  { %v3280_v45 = vmul.f32 %v8242_v40, %v3264_v0 }
0x125a   :  { %v3286_v50 = vmul.f32 %v7373_v44, %v3280_v45  ;;  %v8152_v45 = vld [vmem:[%s10242_s2 + $0x30] sm:$0xff]  }
0x125c   :  { %v3292_v10 = vadd.f32 %v7374_v62, %v3286_v50  ;;  %v8154_v50 = vld [vmem:[%s10242_s2 + $0x20] sm:$0xff]  }
0x125e   :  { %v7375_v53 = vmul.f32 -1.442695, %v3292_v10 }
0x125f   :  { %v8244_v21 = vpop.eup %8243 }
0x1260   :  { %v3281_v5 = vmul.f32 %v8244_v21, %v3265_v18  ;;  %8245 = vpow2.f32 %v7375_v53 }
0x1262   :  { %v3287_v14 = vmul.f32 %v7373_v44, %v3281_v5  ;;  %v8151_v44 = vld [vmem:[%s10242_s2 + $0x38] sm:$0xff]  }
0x1264   :  { %v3293_v29 = vadd.f32 %v7374_v62, %v3287_v14  ;;  %v8153_v62 = vld [vmem:[%s10242_s2 + $0x28] sm:$0xff]  }
0x1266   :  { %v7376_v30 = vmul.f32 -1.442695, %v3293_v29 }
0x1268   :  { %8247 = vpow2.f32 %v7376_v30 }
0x126d   :  { %v8246_v38 = vpop.eup %8245 }
0x126e   :  { %v3300_v43 = vadd.f32 1.0, %v8246_v38 }
0x1270   :  { %8249 = vrcp.f32 %v3300_v43 }
0x1275   :  { %v8248_v48 = vpop.eup %8247 }
0x1276   :  { %v3301_v52 = vadd.f32 1.0, %v8248_v48 }
0x1278   :  { %8251 = vrcp.f32 %v3301_v52 }
0x127d   :  { %v8250_v22 = vpop.eup %8249 }
0x127e   :  { %v3306_v58 = vmul.f32 %v8250_v22, %v3292_v10  ;;  %v7391_v10 = vld [vmem:[%s10244_s4 + $0x13] ss:$0 sm:$0xff] }
0x1285   :  { %v8252_v25 = vpop.eup %8251 }
0x1286   :  { %v3307_v8 = vmul.f32 %v8252_v25, %v3293_v29 }
0x1288   :  { %v3313_v57 = vpack.c.bf16 %v3307_v8, %v3306_v58 }
0x128a   :  { %7889 = vmatmul.mubr.msk.bf16.vlgmr.msra.gmra.mxu1 %vm26_vm0, %v3313_v57 }
0x128b   :  { %7908 = vmatprep.mubr.msk.bf16.mxu1 %vm8384_vm1, %v8383_v15  ;;  %7901 = vmatpush3.bf16.msra.mxu1 %v8151_v44 }
0x128c   :  { %7902 = vmatprep.subr.bf16.mxu1 %v8383_v15 }
0x128f   :  { %7903 = vmatpush3.bf16.msra.mxu1 %v8152_v45 }
0x1290   :  { %7904 = vmatprep.subr.bf16.mxu1 %v8383_v15 }
0x1293   :  { %7905 = vmatpush3.bf16.msra.mxu1 %v8153_v62 }
0x1294   :  { %7906 = vmatprep.subr.bf16.mxu1 %v8383_v15 }
0x1297   :  { %7907 = vmatpush3.bf16.msra.mxu1 %v8154_v50 }
0x1298   :  { %7932 = vmatprep.subr.bf16.mxu1 %v8383_v15 }
0x134a   :  { %v3368_v2 = vpop.f32.mrf.mxu1 }
0x134b   :  { %v3369_v41 = vadd.f32 %v7381_v49, %v3368_v2 }
0x134c   :  { %v7890_v4 = vpop.f32.mrf.mxu1 }
0x134d   :  { %v9269_v7 = vadd.f32 %v3369_v41, %v9126_v28  ;;  %v7405_v41 = vld [vmem:[%s10244_s4 + $0x14] ss:$0 sm:$0xff] }
0x134e   :  { %v3371_v17 = vpop.f32.mrf.mxu1 }
0x134f   :  { %v3372_v27 = vadd.f32 %v7381_v49, %v3371_v17  ;;  %v3379_v12 = vsel %vm26_vm0, %v9269_v7, 0.0 }
0x1350   :  { %3380 = vadd.xlane.f32.xlu1 %v3379_v12  ;;  %v7891_v33 = vpop.f32.mrf.mxu1 }
0x1351   :  { %v9274_v35 = vadd.f32 %v3372_v27, %v9131_v37 }
0x1353   :  { %v3382_v54 = vsel %vm26_vm0, %v9274_v35, 0.0 }
0x1354   :  { %3383 = vadd.xlane.f32.xlu0 %v3382_v54 }
0x13d9   :  { %v3381_v56 = vpop.xlane.xlu1 %3380 }
0x13da   :  { %v3385_v60 = vmul.f32 0.03125, %v3381_v56 }
0x13dc   :  { %v3387_v59 = vsub.f32 %v9269_v7, %v3385_v60 }
0x13dd   :  { %v3384_v28 = vpop.xlane.xlu0 %3383 }
0x13de   :  { %v3386_v51 = vmul.f32 0.03125, %v3384_v28  ;;  %v3389_v23 = vmul.f32 %v3387_v59, %v3387_v59 }
0x13e0   :  { %v3388_v63 = vsub.f32 %v9274_v35, %v3386_v51  ;;  %v3391_v3 = vsel %vm26_vm0, %v3389_v23, 0.0 }
0x13e1   :  { %3392 = vadd.xlane.f32.xlu1 %v3391_v3 }
0x13e2   :  { %v3390_v9 = vmul.f32 %v3388_v63, %v3388_v63 }
0x13e4   :  { %v3394_v37 = vsel %vm26_vm0, %v3390_v9, 0.0 }
0x13e5   :  { %3395 = vadd.xlane.f32.xlu0 %v3394_v37 }
0x146a   :  { %v3393_v0 = vpop.xlane.xlu1 %3392 }
0x146b   :  { %v3397_v11 = vmul.f32 0.03125, %v3393_v0 }
0x146d   :  { %v3399_v1 = vadd.f32 1e-05, %v3397_v11 }
0x146e   :  { %v3396_v13 = vpop.xlane.xlu0 %3395 }
0x146f   :  { %8253 = vrsqrt.f32 %v3399_v1  ;;  %v3398_v16 = vmul.f32 0.03125, %v3396_v13 }
0x1471   :  { %v3400_v18 = vadd.f32 1e-05, %v3398_v16 }
0x1473   :  { %8255 = vrsqrt.f32 %v3400_v18 }
0x147c   :  { %v8254_v19 = vpop.eup %8253 }
0x147d   :  { %v3403_v24 = vmul.f32 %v8254_v19, %v3387_v59 }
0x147f   :  { %v3409_v31 = vmul.f32 %v7385_v46, %v3403_v24 }
0x1480   :  { %v8256_v20 = vpop.eup %8255 }
0x1481   :  { %v3404_v26 = vmul.f32 %v8256_v20, %v3388_v63  ;;  %v3415_v36 = vadd.f32 %v7386_v32, %v3409_v31  ;;  %v7411_v20 = vld [vmem:[%s10244_s4 + $0x15] ss:$0 sm:$0xff]  ;;  %v7412_v31 = vld [vmem:[%s10244_s4 + $0x16] ss:$0 sm:$0xff] }
0x1483   :  { %v3410_v34 = vmul.f32 %v7385_v46, %v3404_v26 }
0x1485   :  { %v3416_v39 = vadd.f32 %v7386_v32, %v3410_v34 }
0x1487   :  { %v3422_v40 = vpack.c.bf16 %v3416_v39, %v3415_v36 }
0x1489   :  { %7897 = vmatmul.mubr.msk.bf16.vlgmr.msra.gmra.mxu0 %vm26_vm0, %v3422_v40 }
0x148a   :  { %7916 = vmatprep.mubr.msk.bf16.mxu0 %vm8384_vm1, %v8383_v15 }
0x1549   :  { %v3477_v53 = vpop.f32.mrf.mxu0 }
0x154a   :  { %v3478_v21 = vadd.f32 %v7391_v10, %v3477_v53 }
0x154b   :  { %v7898_v5 = vpop.f32.mrf.mxu0 }
0x154c   :  { %v7395_v14 = vmul.f32 -1.442695, %v3478_v21 }
0x154d   :  { %v3480_v29 = vpop.f32.mrf.mxu0 }
0x154e   :  { %8257 = vpow2.f32 %v7395_v14  ;;  %v3481_v30 = vadd.f32 %v7391_v10, %v3480_v29 }
0x154f   :  { %v7899_v38 = vpop.f32.mrf.mxu0 }
0x1550   :  { %v7396_v43 = vmul.f32 -1.442695, %v3481_v30 }
0x1552   :  { %8259 = vpow2.f32 %v7396_v43 }
0x155b   :  { %v8258_v48 = vpop.eup %8257 }
0x155c   :  { %v3490_v52 = vadd.f32 1.0, %v8258_v48  ;;  %v8155_v48 = vld [vmem:[%s10241_s1 + $0x108] sm:$0xff]  }
0x155d   :  { %7913 = vmatpush3.bf16.msra.mxu0 %v8155_v48 }
0x155e   :  { %8261 = vrcp.f32 %v3490_v52  ;;  %v8156_v52 = vld [vmem:[%s10241_s1 + $0x100] sm:$0xff]   ;;  %7914 = vmatprep.subr.bf16.mxu0 %v8383_v15 }
0x155f   :  { %v8260_v22 = vpop.eup %8259 }
0x1560   :  { %v3491_v25 = vadd.f32 1.0, %v8260_v22 }
0x1561   :  { %7915 = vmatpush3.bf16.msra.mxu0 %v8156_v52 }
0x1562   :  { %8263 = vrcp.f32 %v3491_v25  ;;  %7920 = vmatprep.subr.bf16.mxu0 %v8383_v15 }
0x156b   :  { %v8262_v58 = vpop.eup %8261 }
0x156c   :  { %v3496_v57 = vmul.f32 %v8262_v58, %v3478_v21 }
0x156f   :  { %v8264_v8 = vpop.eup %8263 }
0x1570   :  { %v3497_v49 = vmul.f32 %v8264_v8, %v3481_v30 }
0x1572   :  { %v3507_v2 = vpack.c.bf16 %v3497_v49, %v3496_v57 }
0x1574   :  { %7909 = vmatmul.mubr.msk.bf16.vlgmr.msra.gmra.mxu1 %vm185_vm2, %v3507_v2 }
0x1575   :  { %7936 = vmatprep.mubr.msk.bf16.mxu1 %vm8384_vm1, %v8383_v15 }
0x1634   :  { %v3574_v4 = vpop.f32.mrf.mxu1 }
0x1635   :  { %v3575_v17 = vadd.f32 %v7405_v41, %v3574_v4  ;;  %v7415_v4 = vld [vmem:[%s10244_s4 + $0x20] ss:$0 sm:$0xff] }
0x1636   :  { %v7910_v27 = vpop.f32.mrf.mxu1 }
0x1637   :  { %v3581_v12 = vmul.f32 0.5, %v3575_v17 }
0x1638   :  { %v3577_v33 = vpop.f32.mrf.mxu1 }
0x1639   :  { %v3583_v54 = vadd.f32 %v3581_v12, %v9269_v7  ;;  %v3578_v56 = vadd.f32 %v7405_v41, %v3577_v33  ;;  %v7416_v33 = vld [vmem:[%s10244_s4 + $0x21] ss:$0 sm:$0xff] }
0x163a   :  { %v7911_v60 = vpop.f32.mrf.mxu1 }
0x163b   :  { %v3582_v59 = vmul.f32 0.5, %v3578_v56  ;;  %v3587_v28 = vsel %vm26_vm0, %v3583_v54, 0.0 }
0x163c   :  { %3588 = vadd.xlane.f32.xlu1 %v3587_v28  ;;  %v8157_v28 = vld [vmem:[%s10242_s2 + $0x58] sm:$0xff]  }
0x163d   :  { %v3584_v51 = vadd.f32 %v3582_v59, %v9274_v35 }
0x163f   :  { %v3590_v23 = vsel %vm26_vm0, %v3584_v51, 0.0 }
0x1640   :  { %3591 = vadd.xlane.f32.xlu0 %v3590_v23  ;;  %v8159_v23 = vld [vmem:[%s10242_s2 + $0x48] sm:$0xff]  }
0x16c5   :  { %v3589_v63 = vpop.xlane.xlu1 %3588 }
0x16c6   :  { %v3593_v3 = vmul.f32 0.03125, %v3589_v63  ;;  %v8160_v63 = vld [vmem:[%s10242_s2 + $0x40] sm:$0xff]  }
0x16c8   :  { %v3595_v9 = vsub.f32 %v3583_v54, %v3593_v3  ;;  %v7422_v3 = vld [vmem:[%s10244_s4 + $0x22] ss:$0 sm:$0xff] }
0x16c9   :  { %v3592_v37 = vpop.xlane.xlu0 %3591 }
0x16ca   :  { %v3594_v61 = vmul.f32 0.03125, %v3592_v37  ;;  %v3597_v6 = vmul.f32 %v3595_v9, %v3595_v9 }
0x16cc   :  { %v3596_v0 = vsub.f32 %v3584_v51, %v3594_v61  ;;  %v3599_v7 = vsel %vm26_vm0, %v3597_v6, 0.0  ;;  %v8158_v51 = vld [vmem:[%s10242_s2 + $0x50] sm:$0xff]  }
0x16cd   :  { %3600 = vadd.xlane.f32.xlu1 %v3599_v7 }
0x16ce   :  { %v3598_v11 = vmul.f32 %v3596_v0, %v3596_v0 }
0x16d0   :  { %v3602_v1 = vsel %vm26_vm0, %v3598_v11, 0.0 }
0x16d1   :  { %3603 = vadd.xlane.f32.xlu0 %v3602_v1 }
0x1756   :  { %v3601_v13 = vpop.xlane.xlu1 %3600 }
0x1757   :  { %v3605_v16 = vmul.f32 0.03125, %v3601_v13 }
0x1759   :  { %v3607_v35 = vadd.f32 1e-05, %v3605_v16 }
0x175a   :  { %v3604_v18 = vpop.xlane.xlu0 %3603 }
0x175b   :  { %8265 = vrsqrt.f32 %v3607_v35  ;;  %v3606_v19 = vmul.f32 0.03125, %v3604_v18 }
0x175d   :  { %v3608_v24 = vadd.f32 1e-05, %v3606_v19 }
0x175f   :  { %8267 = vrsqrt.f32 %v3608_v24 }
0x1768   :  { %v8266_v46 = vpop.eup %8265 }
0x1769   :  { %v3611_v26 = vmul.f32 %v8266_v46, %v3595_v9 }
0x176b   :  { %v3617_v32 = vmul.f32 %v7411_v20, %v3611_v26 }
0x176c   :  { %v8268_v34 = vpop.eup %8267 }
0x176d   :  { %v9336_v36 = vadd.f32 %v7412_v31, %v3617_v32  ;;  %v3612_v39 = vmul.f32 %v8268_v34, %v3596_v0 }
0x176f   :  { %v3628_v40 = vsel %vm26_vm0, %v9336_v36, 0.0  ;;  %v3618_v44 = vmul.f32 %v7411_v20, %v3612_v39 }
0x1770   :  { %3629 = vadd.xlane.f32.xlu1 %v3628_v40 }
0x1771   :  { %v9340_v45 = vadd.f32 %v7412_v31, %v3618_v44  ;;  %v7437_v31 = vld [vmem:[%s10244_s4 + $0x23] ss:$0 sm:$0xff] }
0x1773   :  { %v3631_v62 = vsel %vm26_vm0, %v9340_v45, 0.0 }
0x1774   :  { %3632 = vadd.xlane.f32.xlu0 %v3631_v62 }
0x17f9   :  { %v3630_v50 = vpop.xlane.xlu1 %3629 }
0x17fa   :  { %v3634_v10 = vmul.f32 0.03125, %v3630_v50 }
0x17fc   :  { %v3636_v53 = vsub.f32 %v9336_v36, %v3634_v10 }
0x17fd   :  { %v3633_v21 = vpop.xlane.xlu0 %3632 }
0x17fe   :  { %v3635_v5 = vmul.f32 0.03125, %v3633_v21  ;;  %v3638_v14 = vmul.f32 %v3636_v53, %v3636_v53 }
0x1800   :  { %v3637_v29 = vsub.f32 %v9340_v45, %v3635_v5  ;;  %v3640_v30 = vsel %vm26_vm0, %v3638_v14, 0.0 }
0x1801   :  { %3641 = vadd.xlane.f32.xlu1 %v3640_v30 }
0x1802   :  { %v3639_v38 = vmul.f32 %v3637_v29, %v3637_v29 }
0x1804   :  { %v3643_v43 = vsel %vm26_vm0, %v3639_v38, 0.0 }
0x1805   :  { %3644 = vadd.xlane.f32.xlu0 %v3643_v43 }
0x188a   :  { %v3642_v22 = vpop.xlane.xlu1 %3641 }
0x188b   :  { %v3646_v25 = vmul.f32 0.03125, %v3642_v22 }
0x188d   :  { %v3648_v58 = vadd.f32 1e-05, %v3646_v25 }
0x188e   :  { %v3645_v8 = vpop.xlane.xlu0 %3644 }
0x188f   :  { %8269 = vrsqrt.f32 %v3648_v58  ;;  %v3647_v57 = vmul.f32 0.03125, %v3645_v8  ;;  %v8161_v58 = vld [vmem:[%s10241_s1 + $0x98] sm:$0xff]  }
0x1890   :  { %v8162_v8 = vld [vmem:[%s10241_s1 + $0xb8] sm:$0xff]   ;;  %7933 = vmatpush3.bf16.msra.mxu1 %v8161_v58 }
0x1891   :  { %v3649_v49 = vadd.f32 1e-05, %v3647_v57  ;;  %v8163_v57 = vld [vmem:[%s10241_s1 + $0x90] sm:$0xff]   ;;  %7934 = vmatprep.subr.bf16.mxu1 %v8383_v15 }
0x1893   :  { %8271 = vrsqrt.f32 %v3649_v49  ;;  %v8164_v49 = vld [vmem:[%s10241_s1 + $0xb0] sm:$0xff]  }
0x1894   :  { %7935 = vmatpush3.bf16.msra.mxu1 %v8163_v57 }
0x1895   :  { %7940 = vmatprep.subr.bf16.mxu1 %v8383_v15 }
0x189c   :  { %v8270_v2 = vpop.eup %8269 }
0x189d   :  { %v3652_v41 = vmul.f32 %v8270_v2, %v3636_v53 }
0x189f   :  { %v3658_v12 = vmul.f32 %v7415_v4, %v3652_v41 }
0x18a0   :  { %v8272_v17 = vpop.eup %8271 }
0x18a1   :  { %v3653_v27 = vmul.f32 %v8272_v17, %v3637_v29  ;;  %v3664_v56 = vadd.f32 %v7416_v33, %v3658_v12 }
0x18a3   :  { %v3659_v54 = vmul.f32 %v7415_v4, %v3653_v27 }
0x18a5   :  { %v3665_v60 = vadd.f32 %v7416_v33, %v3659_v54 }
0x18a7   :  { %v3671_v59 = vpack.c.bf16 %v3665_v60, %v3664_v56  ;;  %v7445_v56 = vld [vmem:[%s10244_s4 + $0x24] ss:$0 sm:$0xff] }
0x18a9   :  { %7917 = vmatmul.mubr.msk.bf16.vlgmr.msra.gmra.mxu0 %vm26_vm0, %v3671_v59 }
0x18aa   :  { %7928 = vmatprep.mubr.msk.bf16.mxu0 %vm8384_vm1, %v8383_v15  ;;  %7921 = vmatpush3.bf16.msra.mxu0 %v8157_v28 }
0x18ab   :  { %7922 = vmatprep.subr.bf16.mxu0 %v8383_v15 }
0x18ae   :  { %7923 = vmatpush3.bf16.msra.mxu0 %v8158_v51  ;;  %v7446_v51 = vld [vmem:[%s10244_s4 + $0x25] ss:$0 sm:$0xff] }
0x18af   :  { %7924 = vmatprep.subr.bf16.mxu0 %v8383_v15 }
0x18b2   :  { %7925 = vmatpush3.bf16.msra.mxu0 %v8159_v23 }
0x18b3   :  { %7926 = vmatprep.subr.bf16.mxu0 %v8383_v15 }
0x18b6   :  { %7927 = vmatpush3.bf16.msra.mxu0 %v8160_v63 }
0x18b7   :  { %7948 = vmatprep.subr.bf16.mxu0 %v8383_v15 }
0x1969   :  { %v3726_v9 = vpop.f32.mrf.mxu0 }
0x196a   :  { %v3727_v37 = vadd.f32 %v7422_v3, %v3726_v9  ;;  %v8165_v9 = vld [vmem:[%s10241_s1 + $0xa8] sm:$0xff]  }
0x196b   :  { %v7918_v61 = vpop.f32.mrf.mxu0 }
0x196c   :  { %v7426_v6 = vmul.f32 -1.442695, %v3727_v37  ;;  %v8166_v61 = vld [vmem:[%s10241_s1 + $0xa0] sm:$0xff]  }
0x196d   :  { %v3729_v0 = vpop.f32.mrf.mxu0 }
0x196e   :  { %8273 = vpow2.f32 %v7426_v6  ;;  %v3730_v7 = vadd.f32 %v7422_v3, %v3729_v0  ;;  %v7471_v6 = vld [vmem:[%s10244_s4 + $0x27] ss:$0 sm:$0xff] }
0x196f   :  { %v7919_v11 = vpop.f32.mrf.mxu0 }
0x1970   :  { %v7427_v1 = vmul.f32 -1.442695, %v3730_v7 }
0x1972   :  { %8275 = vpow2.f32 %v7427_v1 }
0x197b   :  { %v8274_v13 = vpop.eup %8273 }
0x197c   :  { %v3739_v16 = vadd.f32 1.0, %v8274_v13 }
0x197e   :  { %8277 = vrcp.f32 %v3739_v16 }
0x197f   :  { %v8276_v35 = vpop.eup %8275 }
0x1980   :  { %v3740_v18 = vadd.f32 1.0, %v8276_v35 }
0x1982   :  { %8279 = vrcp.f32 %v3740_v18 }
0x198b   :  { %v8278_v19 = vpop.eup %8277 }
0x198c   :  { %v3745_v46 = vmul.f32 %v8278_v19, %v3727_v37 }
0x198f   :  { %v8280_v24 = vpop.eup %8279 }
0x1990   :  { %v3746_v20 = vmul.f32 %v8280_v24, %v3730_v7 }
0x1992   :  { %v3756_v26 = vpack.c.bf16 %v3746_v20, %v3745_v46 }
0x1994   :  { %7929 = vmatmul.mubr.msk.bf16.vlgmr.msra.gmra.mxu0 %vm185_vm2, %v3756_v26 }
0x1995   :  { %7952 = vmatprep.mubr.msk.bf16.mxu0 %vm8384_vm1, %v8383_v15  ;;  %7949 = vmatpush3.bf16.msra.mxu0 %v8162_v8 }
0x1996   :  { %7950 = vmatprep.subr.bf16.mxu0 %v8383_v15 }
0x1999   :  { %7951 = vmatpush3.bf16.msra.mxu0 %v8164_v49 }
0x199a   :  { %7966 = vmatprep.subr.mxu0 %v8383_v15 }
0x1a54   :  { %v3823_v32 = vpop.f32.mrf.mxu0 }
0x1a55   :  { %v3824_v34 = vadd.f32 %v7437_v31, %v3823_v32 }
0x1a56   :  { %v7930_v39 = vpop.f32.mrf.mxu0 }
0x1a57   :  { %v3830_v40 = vmul.f32 0.5, %v3824_v34  ;;  %v7469_v34 = vld [vmem:[%s10244_s4 + $0x26] ss:$0 sm:$0xff] }
0x1a58   :  { %v3826_v44 = vpop.f32.mrf.mxu0 }
0x1a59   :  { %v9391_v62 = vadd.f32 %v3830_v40, %v9336_v36  ;;  %v3827_v50 = vadd.f32 %v7437_v31, %v3826_v44 }
0x1a5a   :  { %v7931_v10 = vpop.f32.mrf.mxu0 }
0x1a5b   :  { %v3831_v53 = vmul.f32 0.5, %v3827_v50  ;;  %v3836_v21 = vsel %vm26_vm0, %v9391_v62, 0.0 }
0x1a5c   :  { %3837 = vadd.xlane.f32.xlu1 %v3836_v21 }
0x1a5d   :  { %v9396_v5 = vadd.f32 %v3831_v53, %v9340_v45 }
0x1a5f   :  { %v3839_v14 = vsel %vm26_vm0, %v9396_v5, 0.0 }
0x1a60   :  { %3840 = vadd.xlane.f32.xlu0 %v3839_v14  ;;  %v7472_v14 = vld [vmem:[%s10243_s3 + $0x80] sm:$0xff] }
0x1ae5   :  { %v3838_v29 = vpop.xlane.xlu1 %3837 }
0x1ae6   :  { %v3842_v30 = vmul.f32 0.03125, %v3838_v29  ;;  %v7473_v29 = vld [vmem:[%s10243_s3 + $0x88] sm:$0xff] }
0x1ae8   :  { %v3844_v38 = vsub.f32 %v9391_v62, %v3842_v30 }
0x1ae9   :  { %v3841_v36 = vpop.xlane.xlu0 %3840 }
0x1aea   :  { %v3843_v43 = vmul.f32 0.03125, %v3841_v36  ;;  %v3846_v48 = vmul.f32 %v3844_v38, %v3844_v38 }
0x1aec   :  { %v3845_v52 = vsub.f32 %v9396_v5, %v3843_v43  ;;  %v3848_v22 = vsel %vm26_vm0, %v3846_v48, 0.0 }
0x1aed   :  { %3849 = vadd.xlane.f32.xlu1 %v3848_v22  ;;  %v7474_v22 = vld [vmem:[%s10243_s3 + $0x90] sm:$0xff] }
0x1aee   :  { %v3847_v25 = vmul.f32 %v3845_v52, %v3845_v52 }
0x1af0   :  { %v3851_v45 = vsel %vm26_vm0, %v3847_v25, 0.0 }
0x1af1   :  { %3852 = vadd.xlane.f32.xlu0 %v3851_v45 }
0x1b76   :  { %v3850_v2 = vpop.xlane.xlu1 %3849 }
0x1b77   :  { %v3854_v41 = vmul.f32 0.03125, %v3850_v2 }
0x1b79   :  { %v3856_v4 = vadd.f32 1e-05, %v3854_v41 }
0x1b7a   :  { %v3853_v17 = vpop.xlane.xlu0 %3852 }
0x1b7b   :  { %8281 = vrsqrt.f32 %v3856_v4  ;;  %v3855_v27 = vmul.f32 0.03125, %v3853_v17 }
0x1b7d   :  { %v3857_v12 = vadd.f32 1e-05, %v3855_v27 }
0x1b7f   :  { %8283 = vrsqrt.f32 %v3857_v12 }
0x1b88   :  { %v8282_v33 = vpop.eup %8281 }
0x1b89   :  { %v3860_v54 = vmul.f32 %v8282_v33, %v3844_v38 }
0x1b8b   :  { %v3866_v28 = vmul.f32 %v7445_v56, %v3860_v54 }
0x1b8c   :  { %v8284_v60 = vpop.eup %8283 }
0x1b8d   :  { %v3861_v59 = vmul.f32 %v8284_v60, %v3845_v52  ;;  %v3872_v63 = vadd.f32 %v7446_v51, %v3866_v28 }
0x1b8f   :  { %v3867_v23 = vmul.f32 %v7445_v56, %v3861_v59  ;;  %v7476_v56 = vld [vmem:[%s10243_s3 + $0xa0] sm:$0xff] }
0x1b91   :  { %v3873_v3 = vadd.f32 %v7446_v51, %v3867_v23 }
0x1b93   :  { %v3874_v37 = vpack.c.bf16 %v3873_v3, %v3872_v63 }
0x1b95   :  { %7937 = vmatmul.mubr.msk.bf16.vlgmr.msra.gmra.mxu1 %vm26_vm0, %v3874_v37  ;;  %7953 = vmatmul.mubr.msk.bf16.vlgmr.msra.gmra.mxu0 %vm26_vm0, %v3874_v37 }
0x1b96   :  { %7941 = vmatpush3.bf16.msra.mxu1 %v8165_v9  ;;  %7944 = vmatprep.mubr.msk.bf16.mxu1 %vm8384_vm1, %v8383_v15 }
0x1b97   :  { %7942 = vmatprep.subr.bf16.mxu1 %v8383_v15  ;;  %7968 = vmatprep.mubr.msk.f32.mxu0 %vm8384_vm1, %v8383_v15 }
0x1b9a   :  { %7943 = vmatpush3.bf16.msra.mxu1 %v8166_v61 }
0x1b9b   :  { %7956 = vmatprep.subr.mxu1 %v8383_v15 }
0x1b9d   :  { %7945 = vmatmul.mubr.msk.bf16.vlgmr.msra.gmra.mxu1 %vm26_vm0, %v3874_v37 }
0x1b9e   :  { %7958 = vmatprep.mubr.msk.f32.mxu1 %vm8384_vm1, %v8383_v15 }
0x1c55   :  { %v3929_v0 = vpop.f32.mrf.mxu1  ;;  %v9446_v7 = vpop.f32.mrf.mxu0 }
0x1c56   :  { %v4064_v11 = vadd.f32 %v7471_v6, %v3929_v0  ;;  %7967 = vmatpush3.msra.mxu0 %v9446_v7  ;;  %v9478_v38 = vadd.f32 %v7469_v34, %v3929_v0 }
0x1c57   :  { %v7938_v1 = vpop.f32.mrf.mxu1  ;;  %v7954_v13 = vpop.f32.mrf.mxu0  ;;  %7976 = vmatprep.subr.mxu0 %v8383_v15 }
0x1c58   :  { %v4077_v16 = vcombine.high %v4064_v11, %v4064_v11  ;;  %v4084_v35 = vrot.slane %v4064_v11, %v8548_v47 }
0x1c59   :  { %v3932_v18 = vpop.f32.mrf.mxu1  ;;  %v9451_v19 = vpop.f32.mrf.mxu0 }
0x1c5a   :  { %v9454_v24 = vrot.slane %v4077_v16, %v8548_v47  ;;  %v4092_v46 = vcombine.high %v4084_v35, %v4084_v35  ;;  %v4100_v20 = vrot.slane %v4084_v35, %v8548_v47  ;;  %v4065_v26 = vadd.f32 %v7471_v6, %v3932_v18 }
0x1c5b   :  { %v7939_v31 = vpop.f32.mrf.mxu1  ;;  %v7955_v32 = vpop.f32.mrf.mxu0  ;;  %v9508_v27 = vadd.f32 %v7469_v34, %v3932_v18 }
0x1c5c   :  { %v4114_v39 = vrot.slane %v4092_v46, %v8548_v47  ;;  %v4122_v40 = vcombine.high %v4100_v20, %v4100_v20  ;;  %v9463_v44 = vrot.slane %v9454_v24, %v8548_v47  ;;  %v4178_v50 = vrot.slane %v4100_v20, %v8553_v55  ;;  %v7475_v46 = vld [vmem:[%s10243_s3 + $0x98] sm:$0xff] }
0x1c5d   :  { %v4126_v10 = vcombine.high %v4065_v26, %v4065_v26  ;;  %v4133_v53 = vrot.slane %v4065_v26, %v8548_v47  ;;  %v9467_v21 = vpop.f32.mrf.mxu1  ;;  %v4093_v59 = vcombine.high %v9454_v24, %v9454_v24 }
0x1c5e   :  { %v4182_v30 = vrot.slane %v4114_v39, %v8553_v55  ;;  %7957 = vmatpush3.xpose.msk.msra.mxu1 %vm669_vm3, %v9467_v21  ;;  %v4186_v36 = vrot.slane %v4122_v40, %v8553_v55  ;;  %v9487_v45 = vmul.f32 %v7472_v14, %v4178_v50  ;;  %v4194_v8 = vrot.slane %v9463_v44, %v8553_v55 }
0x1c5f   :  { %v4140_v43 = vrot.slane %v4126_v10, %v8548_v47  ;;  %v4141_v48 = vcombine.high %v4133_v53, %v4133_v53  ;;  %v7946_v52 = vpop.f32.mrf.mxu1  ;;  %7961 = vmatprep.subr.mxu1 %v8383_v15  ;;  %v4149_v25 = vrot.slane %v4133_v53, %v8548_v47  ;;  %v4124_v28 = vcombine.high %v4114_v39, %v4114_v39  ;;  %v7477_v10 = vld [vmem:[%s10243_s3 + $0xa8] sm:$0xff] }
0x1c60   :  { %v9489_v58 = vmul.f32 %v7473_v29, %v4182_v30  ;;  %v4271_v41 = vsel %vm669_vm3, %v9487_v45, 0.0  ;;  %v9506_v17 = vmul.f32 %v7474_v22, %v4186_v36  ;;  %v9527_v9 = vmul.f32 %v7476_v56, %v4194_v8  ;;  %v7478_v52 = vld [vmem:[%s10243_s3 + $0xb0] sm:$0xff] }
0x1c61   :  { %v4163_v57 = vrot.slane %v4141_v48, %v8548_v47  ;;  %v9494_v49 = vpop.f32.mrf.mxu1  ;;  %7959 = vmatmul.mubr.msk.f32.vlgmr.msra.gmra.mxu1 %vm669_vm3, %v9478_v38  ;;  %v4171_v2 = vcombine.high %v4149_v25, %v4149_v25  ;;  %v4156_v12 = vrot.slane %v4140_v43, %v8548_v47  ;;  %4272 = vadd.xlane.f32.xlu1 %v4271_v41 }
0x1c62   :  { %7962 = vmatpush3.xpose.msk.msra.mxu1 %vm669_vm3, %v9494_v49  ;;  %v4274_v4 = vsel %vm669_vm3, %v9489_v58, 0.0  ;;  %7963 = vmatprep.mubr.msk.f32.mxu1 %vm8384_vm1, %v8383_v15  ;;  %v4142_v23 = vcombine.high %v4140_v43, %v4140_v43  ;;  %v4210_v63 = vrot.slane %v4149_v25, %v8553_v55  ;;  %v4277_v3 = vsel %vm669_vm3, %v9506_v17, 0.0 }
0x1c63   :  { %v4214_v33 = vrot.slane %v4163_v57, %v8553_v55  ;;  %v7947_v54 = vpop.f32.mrf.mxu1  ;;  %v4218_v60 = vrot.slane %v4171_v2, %v8553_v55  ;;  %4275 = vadd.xlane.f32.xlu0 %v4274_v4  ;;  %7971 = vmatprep.subr.mxu1 %v8383_v15  ;;  %v4173_v37 = vcombine.high %v4163_v57, %v4163_v57  ;;  %v4283_v1 = vsel %vm669_vm3, %v9527_v9, 0.0  ;;  %v7479_v4 = vld [vmem:[%s10243_s3 + $0xb8] sm:$0xff] }
0x1c64   :  { %v4226_v61 = vrot.slane %v4156_v12, %v8553_v55  ;;  %v4121_v11 = vrot.slane %v4093_v59, %v8548_v47  ;;  %v9540_v13 = vmul.f32 %v7472_v14, %v4210_v63  ;;  %v4190_v16 = vrot.slane %v4124_v28, %v8553_v55 }
0x1c65   :  { %7964 = vmatmul.mubr.msk.f32.vlgmr.msra.gmra.mxu1 %vm669_vm3, %v9508_v27  ;;  %v9521_v51 = vmul.f32 %v7473_v29, %v4214_v33  ;;  %4278 = vadd.xlane.f32.xlu1 %v4277_v3  ;;  %v9534_v0 = vmul.f32 %v7474_v22, %v4218_v60  ;;  %v4170_v35 = vrot.slane %v4142_v23, %v8548_v47 }
0x1c66   :  { %7972 = vmatpush3.msra.mxu1 %v9451_v19  ;;  %7973 = vmatprep.mubr.msk.f32.mxu1 %vm8384_vm1, %v8383_v15  ;;  %v9546_v24 = vmul.f32 %v7476_v56, %v4226_v61  ;;  %v4222_v20 = vrot.slane %v4173_v37, %v8553_v55  ;;  %v4123_v26 = vcombine.high %v9463_v44, %v9463_v44  ;;  %v4295_v31 = vsel %vm669_vm3, %v9540_v13, 0.0 }
0x1c67   :  { %v4298_v6 = vsel %vm669_vm3, %v9521_v51, 0.0  ;;  %7981 = vmatprep.subr.mxu1 %v8383_v15  ;;  %v4301_v18 = vsel %vm669_vm3, %v9534_v0, 0.0  ;;  %v9556_v32 = vmul.f32 %v7475_v46, %v4190_v16  ;;  %v4198_v34 = vrot.slane %v4121_v11, %v8553_v55 }
0x1c68   :  { %4299 = vadd.xlane.f32.xlu0 %v4298_v6  ;;  %v4172_v39 = vcombine.high %v4156_v12, %v4156_v12  ;;  %v4307_v40 = vsel %vm669_vm3, %v9546_v24, 0.0  ;;  %v9561_v50 = vmul.f32 %v7475_v46, %v4222_v20  ;;  %v4230_v44 = vrot.slane %v4170_v35, %v8553_v55 }
0x1c69   :  { %4284 = vadd.xlane.f32.xlu1 %v4283_v1  ;;  %v4125_v53 = vcombine.high %v4121_v11, %v4121_v11  ;;  %v4280_v14 = vsel %vm669_vm3, %v9556_v32, 0.0  ;;  %v9569_v29 = vmul.f32 %v7477_v10, %v4198_v34  ;;  %v4202_v30 = vrot.slane %v4123_v26, %v8553_v55 }
0x1c6a   :  { %v4174_v36 = vcombine.high %v4170_v35, %v4170_v35  ;;  %v4304_v43 = vsel %vm669_vm3, %v9561_v50, 0.0  ;;  %v9574_v48 = vmul.f32 %v7477_v10, %v4230_v44  ;;  %v4234_v22 = vrot.slane %v4172_v39, %v8553_v55 }
0x1c6b   :  { %v4286_v25 = vsel %vm669_vm3, %v9569_v29, 0.0  ;;  %v9582_v8 = vmul.f32 %v7478_v52, %v4202_v30  ;;  %v4206_v57 = vrot.slane %v4125_v53, %v8553_v55 }
0x1c6c   :  { %4302 = vadd.xlane.f32.xlu0 %v4301_v18  ;;  %v4310_v2 = vsel %vm669_vm3, %v9574_v48, 0.0  ;;  %v9587_v41 = vmul.f32 %v7478_v52, %v4234_v22  ;;  %v4238_v12 = vrot.slane %v4174_v36, %v8553_v55 }
0x1c6d   :  { %4296 = vadd.xlane.f32.xlu1 %v4295_v31  ;;  %v4289_v33 = vsel %vm669_vm3, %v9582_v8, 0.0  ;;  %v9595_v54 = vmul.f32 %v7479_v4, %v4206_v57 }
0x1c6e   :  { %v4313_v56 = vsel %vm669_vm3, %v9587_v41, 0.0  ;;  %v9599_v60 = vmul.f32 %v7479_v4, %v4238_v12 }
0x1c6f   :  { %v4292_v59 = vsel %vm669_vm3, %v9595_v54, 0.0 }
0x1c70   :  { %4308 = vadd.xlane.f32.xlu0 %v4307_v40  ;;  %v4316_v28 = vsel %vm669_vm3, %v9599_v60, 0.0 }
0x1c71   :  { %4281 = vadd.xlane.f32.xlu1 %v4280_v14 }
0x1c74   :  { %4305 = vadd.xlane.f32.xlu0 %v4304_v43 }
0x1c75   :  { %4287 = vadd.xlane.f32.xlu1 %v4286_v25 }
0x1c78   :  { %4311 = vadd.xlane.f32.xlu0 %v4310_v2 }
0x1c79   :  { %4290 = vadd.xlane.f32.xlu1 %v4289_v33 }
0x1c7c   :  { %4314 = vadd.xlane.f32.xlu0 %v4313_v56 }
0x1c7d   :  { %4293 = vadd.xlane.f32.xlu1 %v4292_v59 }
0x1c80   :  { %4317 = vadd.xlane.f32.xlu0 %v4316_v28 }
0x1cea   :  { %v4273_v23 = vpop.xlane.xlu1 %4272 }
0x1ceb   :  { %v4330_v31 = vrot.slane %v4273_v23, %v8543_v42 }
0x1cec   :  { %v4276_v63 = vpop.xlane.xlu0 %4275 }
0x1ced   :  { %v4334_v20 = vrot.slane %v4276_v63, %v8543_v42 }
0x1cee   :  { %v4279_v3 = vpop.xlane.xlu1 %4278 }
0x1cef   :  { %v4338_v34 = vrot.slane %v4279_v3, %v8543_v42  ;;  %v4359_v39 = vsel %vm760_vm4, %v4334_v20, %v4330_v31 }
0x1cf1   :  { %v4300_v37 = vpop.xlane.xlu0 %4299  ;;  %v4360_v14 = vsel %vm762_vm5, %v4338_v34, %v4359_v39 }
0x1cf2   :  { %v4285_v61 = vpop.xlane.xlu1 %4284  ;;  %v4458_v53 = vrot.slane %v4300_v37, %v8543_v42 }
0x1cf3   :  { %v4346_v25 = vrot.slane %v4285_v61, %v8543_v42 }
0x1cf5   :  { %v4303_v6 = vpop.xlane.xlu0 %4302 }
0x1cf6   :  { %v4297_v11 = vpop.xlane.xlu1 %4296  ;;  %v4462_v57 = vrot.slane %v4303_v6, %v8543_v42 }
0x1cf7   :  { %v4454_v40 = vrot.slane %v4297_v11, %v8543_v42 }
0x1cf9   :  { %v4309_v1 = vpop.xlane.xlu0 %4308  ;;  %v4483_v36 = vsel %vm760_vm4, %v4458_v53, %v4454_v40 }
0x1cfa   :  { %v4282_v16 = vpop.xlane.xlu1 %4281  ;;  %v4484_v12 = vsel %vm762_vm5, %v4462_v57, %v4483_v36  ;;  %v4470_v63 = vrot.slane %v4309_v1, %v8543_v42 }
0x1cfb   :  { %v4342_v10 = vrot.slane %v4282_v16, %v8543_v42 }
0x1cfd   :  { %v4306_v35 = vpop.xlane.xlu0 %4305  ;;  %v4361_v43 = vsel %vm764_vm6, %v4342_v10, %v4360_v14 }
0x1cfe   :  { %v4288_v18 = vpop.xlane.xlu1 %4287  ;;  %v4466_v52 = vrot.slane %v4306_v35, %v8543_v42  ;;  %v4362_v56 = vsel %vm766_vm7, %v4346_v25, %v4361_v43 }
0x1cff   :  { %v4350_v22 = vrot.slane %v4288_v18, %v8543_v42 }
0x1d00   :  { %v4485_v59 = vsel %vm764_vm6, %v4466_v52, %v4484_v12 }
0x1d01   :  { %v4312_v46 = vpop.xlane.xlu0 %4311  ;;  %v4363_v23 = vsel %vm768_vm8, %v4350_v22, %v4362_v56  ;;  %v4486_v35 = vsel %vm766_vm7, %v4470_v63, %v4485_v59 }
0x1d02   :  { %v4291_v26 = vpop.xlane.xlu1 %4290  ;;  %v4474_v28 = vrot.slane %v4312_v46, %v8543_v42 }
0x1d03   :  { %v4354_v2 = vrot.slane %v4291_v26, %v8543_v42 }
0x1d04   :  { %v4487_v20 = vsel %vm768_vm8, %v4474_v28, %v4486_v35 }
0x1d05   :  { %v4315_v44 = vpop.xlane.xlu0 %4314  ;;  %v4364_v37 = vsel %vm770_vm9, %v4354_v2, %v4363_v23 }
0x1d06   :  { %v4294_v30 = vpop.xlane.xlu1 %4293  ;;  %v4478_v3 = vrot.slane %v4315_v44, %v8543_v42 }
0x1d07   :  { %v4358_v4 = vrot.slane %v4294_v30, %v8543_v42 }
0x1d08   :  { %v4488_v26 = vsel %vm770_vm9, %v4478_v3, %v4487_v20 }
0x1d09   :  { %v4318_v33 = vpop.xlane.xlu0 %4317  ;;  %v4365_v6 = vsel %vm772_vm10, %v4358_v4, %v4364_v37 }
0x1d0a   :  { %v4482_v61 = vrot.slane %v4318_v33, %v8543_v42 }
0x1d0c   :  { %v4489_v1 = vsel %vm772_vm10, %v4482_v61, %v4488_v26 }
0x1d21   :  { %v4439_v11 = vpop.f32.mrf.mxu1 }
0x1d22   :  { %v4440_v16 = vadd.f32 %v4439_v11, %v4365_v6 }
0x1d23   :  { %v7960_v18 = vpop.f32.mrf.mxu1 }
0x1d24   :  { %v4567_v46 = vsel %vm669_vm3, %v4440_v16, -inf }
0x1d25   :  { %4568 = vmax.xlane.f32.xlu1 %v4567_v46  ;;  %v4563_v31 = vpop.f32.mrf.mxu1 }
0x1d26   :  { %v4564_v34 = vadd.f32 %v4563_v31, %v4489_v1 }
0x1d27   :  { %v7965_v39 = vpop.f32.mrf.mxu1 }
0x1d28   :  { %v4570_v40 = vsel %vm669_vm3, %v4564_v34, -inf }
0x1d29   :  { %4571 = vmax.xlane.f32.xlu0 %v4570_v40 }
0x1d36   :  { %4849 = vrot.lane.b32.xlu1 %v9467_v21, %s8386_s25 }
0x1dae   :  { %v4569_v10 = vpop.xlane.xlu1 %4568 }
0x1daf   :  { %v4573_v44 = vsub.f32 %v4440_v16, %v4569_v10 }
0x1db1   :  { %v4575_v53 = vmul.f32 1.442695, %v4573_v44 }
0x1db2   :  { %v4572_v14 = vpop.xlane.xlu0 %4571  ;;  %v4850_v57 = vpop.permute.xlu1 %4849 }
0x1db3   :  { %8285 = vpow2.f32 %v4575_v53  ;;  %v4574_v30 = vsub.f32 %v4564_v34, %v4572_v14 }
0x1db5   :  { %v4577_v36 = vmul.f32 1.442695, %v4574_v30 }
0x1db7   :  { %8287 = vpow2.f32 %v4577_v36 }
0x1dc0   :  { %v8286_v43 = vpop.eup %8285 }
0x1dc1   :  { %v4579_v52 = vsel %vm669_vm3, %v8286_v43, 0.0 }
0x1dc2   :  { %4580 = vadd.xlane.f32.xlu1 %v4579_v52 }
0x1dc4   :  { %v8288_v22 = vpop.eup %8287 }
0x1dc5   :  { %v4582_v25 = vsel %vm669_vm3, %v8288_v22, 0.0 }
0x1dc6   :  { %4583 = vadd.xlane.f32.xlu0 %v4582_v25 }
0x1dd3   :  { %4847 = vrot.lane.b32.xlu1 %v9478_v38, %s8386_s25 }
0x1dd7   :  { %4973 = vrot.lane.b32.xlu1 %v9508_v27, %s8386_s25 }
0x1ddb   :  { %4751 = vrot.lane.b32.xlu1 %v9487_v45, %s8386_s25 }
0x1ddc   :  { %4975 = vrot.lane.b32.xlu0 %v9494_v49, %s8386_s25 }
0x1ddf   :  { %4767 = vrot.lane.b32.xlu1 %v9540_v13, %s8386_s25 }
0x1de0   :  { %4753 = vrot.lane.b32.xlu0 %v9489_v58, %s8386_s25 }
0x1de3   :  { %4755 = vrot.lane.b32.xlu1 %v9506_v17, %s8386_s25 }
0x1de4   :  { %4769 = vrot.lane.b32.xlu0 %v9521_v51, %s8386_s25 }
0x1de7   :  { %4757 = vrot.lane.b32.xlu1 %v9556_v32, %s8386_s25 }
0x1de8   :  { %4771 = vrot.lane.b32.xlu0 %v9534_v0, %s8386_s25 }
0x1deb   :  { %4759 = vrot.lane.b32.xlu1 %v9527_v9, %s8386_s25 }
0x1dec   :  { %4773 = vrot.lane.b32.xlu0 %v9561_v50, %s8386_s25 }
0x1def   :  { %4761 = vrot.lane.b32.xlu1 %v9569_v29, %s8386_s25 }
0x1df0   :  { %4775 = vrot.lane.b32.xlu0 %v9546_v24, %s8386_s25 }
0x1df3   :  { %4763 = vrot.lane.b32.xlu1 %v9582_v8, %s8386_s25 }
0x1df4   :  { %4777 = vrot.lane.b32.xlu0 %v9574_v48, %s8386_s25 }
0x1df7   :  { %4765 = vrot.lane.b32.xlu1 %v9595_v54, %s8386_s25 }
0x1df8   :  { %4779 = vrot.lane.b32.xlu0 %v9587_v41, %s8386_s25 }
0x1dfc   :  { %4781 = vrot.lane.b32.xlu0 %v9599_v60, %s8386_s25 }
0x1e4b   :  { %v4581_v2 = vpop.xlane.xlu1 %4580 }
0x1e4c   :  { %8289 = vrcp.f32 %v4581_v2 }
0x1e4f   :  { %v4848_v4 = vpop.permute.xlu1 %4847  ;;  %v4584_v12 = vpop.xlane.xlu0 %4583 }
0x1e50   :  { %8291 = vrcp.f32 %v4584_v12 }
0x1e53   :  { %v4974_v33 = vpop.permute.xlu1 %4973  ;;  %v4976_v56 = vpop.permute.xlu0 %4975 }
0x1e57   :  { %v4752_v59 = vpop.permute.xlu1 %4751  ;;  %v4754_v28 = vpop.permute.xlu0 %4753 }
0x1e58   :  { %v4799_v23 = vsel %vm669_vm3, %v4752_v59, 0.0  ;;  %v4802_v63 = vsel %vm669_vm3, %v4754_v28, 0.0 }
0x1e59   :  { %v8290_v3 = vpop.eup %8289  ;;  %4800 = vadd.xlane.f32.xlu1 %v4799_v23  ;;  %4803 = vadd.xlane.f32.xlu0 %v4802_v63 }
0x1e5a   :  { %v4587_v37 = vmul.f32 %v8290_v3, %v8286_v43 }
0x1e5b   :  { %v4768_v61 = vpop.permute.xlu1 %4767  ;;  %v4770_v6 = vpop.permute.xlu0 %4769 }
0x1e5c   :  { %7969 = vmatmul.mubr.msk.f32.vlgmr.msra.gmra.mxu0 %vm669_vm3, %v4587_v37  ;;  %v4823_v11 = vsel %vm669_vm3, %v4768_v61, 0.0  ;;  %v4826_v26 = vsel %vm669_vm3, %v4770_v6, 0.0 }
0x1e5d   :  { %v8292_v16 = vpop.eup %8291  ;;  %7977 = vmatpush3.xpose.msk.msra.mxu0 %vm669_vm3, %v4850_v57  ;;  %4824 = vadd.xlane.f32.xlu0 %v4823_v11 }
0x1e5e   :  { %7978 = vmatprep.mubr.msk.f32.mxu0 %vm8384_vm1, %v8383_v15  ;;  %v4588_v35 = vmul.f32 %v8292_v16, %v8288_v22  ;;  %7986 = vmatprep.subr.mxu0 %v8383_v15 }
0x1e5f   :  { %v4756_v18 = vpop.permute.xlu1 %4755  ;;  %v4772_v20 = vpop.permute.xlu0 %4771 }
0x1e60   :  { %7974 = vmatmul.mubr.msk.f32.vlgmr.msra.gmra.mxu1 %vm669_vm3, %v4588_v35  ;;  %7979 = vmatmul.mubr.msk.f32.vlgmr.msra.gmra.mxu0 %vm669_vm3, %v4848_v4  ;;  %v4805_v46 = vsel %vm669_vm3, %v4756_v18, 0.0  ;;  %v4829_v39 = vsel %vm669_vm3, %v4772_v20, 0.0 }
0x1e61   :  { %7982 = vmatpush3.xpose.msk.msra.mxu1 %vm669_vm3, %v4976_v56  ;;  %4806 = vadd.xlane.f32.xlu1 %v4805_v46 }
0x1e62   :  { %4827 = vadd.xlane.f32.xlu0 %v4826_v26  ;;  %7983 = vmatprep.mubr.msk.f32.mxu1 %vm8384_vm1, %v8383_v15 }
0x1e63   :  { %v4758_v1 = vpop.permute.xlu1 %4757  ;;  %v4774_v31 = vpop.permute.xlu0 %4773  ;;  %7991 = vmatprep.subr.mxu1 %v8383_v15  ;;  %7988 = vmatprep.mubr.msk.f32.mxu0 %vm8384_vm1, %v8383_v15 }
0x1e64   :  { %7984 = vmatmul.mubr.msk.f32.vlgmr.msra.gmra.mxu1 %vm669_vm3, %v4974_v33  ;;  %v4808_v34 = vsel %vm669_vm3, %v4758_v1, 0.0  ;;  %v4832_v53 = vsel %vm669_vm3, %v4774_v31, 0.0 }
0x1e65   :  { %4809 = vadd.xlane.f32.xlu1 %v4808_v34  ;;  %7993 = vmatprep.mubr.msk.f32.mxu1 %vm8384_vm1, %v8383_v15 }
0x1e66   :  { %4830 = vadd.xlane.f32.xlu0 %v4829_v39 }
0x1e67   :  { %v4760_v40 = vpop.permute.xlu1 %4759  ;;  %v4776_v10 = vpop.permute.xlu0 %4775 }
0x1e68   :  { %v4811_v44 = vsel %vm669_vm3, %v4760_v40, 0.0  ;;  %v4835_v43 = vsel %vm669_vm3, %v4776_v10, 0.0 }
0x1e69   :  { %4812 = vadd.xlane.f32.xlu1 %v4811_v44 }
0x1e6a   :  { %4833 = vadd.xlane.f32.xlu0 %v4832_v53 }
0x1e6b   :  { %v4762_v14 = vpop.permute.xlu1 %4761  ;;  %v4778_v30 = vpop.permute.xlu0 %4777 }
0x1e6c   :  { %v4814_v36 = vsel %vm669_vm3, %v4762_v14, 0.0  ;;  %v4838_v57 = vsel %vm669_vm3, %v4778_v30, 0.0 }
0x1e6d   :  { %4815 = vadd.xlane.f32.xlu1 %v4814_v36 }
0x1e6e   :  { %4836 = vadd.xlane.f32.xlu0 %v4835_v43 }
0x1e6f   :  { %v4764_v52 = vpop.permute.xlu1 %4763  ;;  %v4780_v22 = vpop.permute.xlu0 %4779 }
0x1e70   :  { %v4817_v25 = vsel %vm669_vm3, %v4764_v52, 0.0  ;;  %v4841_v12 = vsel %vm669_vm3, %v4780_v22, 0.0 }
0x1e71   :  { %4818 = vadd.xlane.f32.xlu1 %v4817_v25 }
0x1e72   :  { %4839 = vadd.xlane.f32.xlu0 %v4838_v57 }
0x1e73   :  { %v4766_v2 = vpop.permute.xlu1 %4765  ;;  %v4782_v33 = vpop.permute.xlu0 %4781 }
0x1e74   :  { %v4820_v4 = vsel %vm669_vm3, %v4766_v2, 0.0  ;;  %v4844_v56 = vsel %vm669_vm3, %v4782_v33, 0.0 }
0x1e75   :  { %4821 = vadd.xlane.f32.xlu1 %v4820_v4 }
0x1e76   :  { %4842 = vadd.xlane.f32.xlu0 %v4841_v12 }
0x1e7a   :  { %4845 = vadd.xlane.f32.xlu0 %v4844_v56 }
0x1ee2   :  { %v4804_v59 = vpop.xlane.xlu0 %4803  ;;  %v4801_v23 = vpop.xlane.xlu1 %4800 }
0x1ee3   :  { %v4862_v46 = vrot.slane %v4801_v23, %v8543_v42  ;;  %v4866_v26 = vrot.slane %v4804_v59, %v8543_v42 }
0x1ee5   :  { %v4891_v10 = vsel %vm760_vm4, %v4866_v26, %v4862_v46 }
0x1ee6   :  { %v4825_v28 = vpop.xlane.xlu0 %4824 }
0x1ee7   :  { %v4988_v43 = vrot.slane %v4825_v28, %v8543_v42 }
0x1eea   :  { %v4807_v3 = vpop.xlane.xlu1 %4806 }
0x1eeb   :  { %v4828_v63 = vpop.xlane.xlu0 %4827  ;;  %v4870_v1 = vrot.slane %v4807_v3, %v8543_v42 }
0x1eec   :  { %v4992_v44 = vrot.slane %v4828_v63, %v8543_v42 }
0x1eed   :  { %v4892_v14 = vsel %vm762_vm5, %v4870_v1, %v4891_v10 }
0x1eee   :  { %v4810_v61 = vpop.xlane.xlu1 %4809  ;;  %v5017_v33 = vsel %vm760_vm4, %v4992_v44, %v4988_v43 }
0x1eef   :  { %v4831_v37 = vpop.xlane.xlu0 %4830  ;;  %v4874_v34 = vrot.slane %v4810_v61, %v8543_v42 }
0x1ef0   :  { %v4996_v30 = vrot.slane %v4831_v37, %v8543_v42 }
0x1ef1   :  { %v4893_v52 = vsel %vm764_vm6, %v4874_v34, %v4892_v14 }
0x1ef2   :  { %v4813_v11 = vpop.xlane.xlu1 %4812  ;;  %v5018_v23 = vsel %vm762_vm5, %v4996_v30, %v5017_v33 }
0x1ef3   :  { %v4834_v6 = vpop.xlane.xlu0 %4833  ;;  %v4878_v39 = vrot.slane %v4813_v11, %v8543_v42 }
0x1ef4   :  { %v5000_v22 = vrot.slane %v4834_v6, %v8543_v42 }
0x1ef5   :  { %v4894_v2 = vsel %vm766_vm7, %v4878_v39, %v4893_v52 }
0x1ef6   :  { %v4816_v35 = vpop.xlane.xlu1 %4815  ;;  %v5019_v37 = vsel %vm764_vm6, %v5000_v22, %v5018_v23 }
0x1ef7   :  { %v4837_v16 = vpop.xlane.xlu0 %4836  ;;  %v4882_v53 = vrot.slane %v4816_v35, %v8543_v42 }
0x1ef8   :  { %v5004_v4 = vrot.slane %v4837_v16, %v8543_v42 }
0x1ef9   :  { %v4895_v28 = vsel %vm768_vm8, %v4882_v53, %v4894_v2 }
0x1efa   :  { %v4819_v20 = vpop.xlane.xlu1 %4818  ;;  %v5020_v35 = vsel %vm766_vm7, %v5004_v4, %v5019_v37 }
0x1efb   :  { %v4840_v18 = vpop.xlane.xlu0 %4839  ;;  %v4886_v36 = vrot.slane %v4819_v20, %v8543_v42 }
0x1efc   :  { %v5008_v56 = vrot.slane %v4840_v18, %v8543_v42 }
0x1efd   :  { %v4896_v3 = vsel %vm770_vm9, %v4886_v36, %v4895_v28 }
0x1efe   :  { %v4822_v40 = vpop.xlane.xlu1 %4821  ;;  %v5021_v26 = vsel %vm768_vm8, %v5008_v56, %v5020_v35 }
0x1eff   :  { %v4843_v31 = vpop.xlane.xlu0 %4842  ;;  %v4890_v25 = vrot.slane %v4822_v40, %v8543_v42 }
0x1f00   :  { %v5012_v63 = vrot.slane %v4843_v31, %v8543_v42 }
0x1f01   :  { %v4897_v11 = vsel %vm772_vm10, %v4890_v25, %v4896_v3 }
0x1f02   :  { %v5022_v1 = vsel %vm770_vm9, %v5012_v63, %v5021_v26 }
0x1f03   :  { %v4846_v12 = vpop.xlane.xlu0 %4845 }
0x1f04   :  { %v5016_v61 = vrot.slane %v4846_v12, %v8543_v42 }
0x1f06   :  { %v5023_v34 = vsel %vm772_vm10, %v5016_v61, %v5022_v1 }
0x1f1c   :  { %v9726_v57 = vpop.f32.mrf.mxu0 }
0x1f1e   :  { %v7970_v59 = vpop.f32.mrf.mxu0 }
0x1f20   :  { %v9738_v6 = vpop.f32.mrf.mxu1  ;;  %v4969_v16 = vpop.f32.mrf.mxu0 }
0x1f21   :  { %v4970_v18 = vadd.f32 %v4969_v16, %v4897_v11 }
0x1f22   :  { %v7975_v20 = vpop.f32.mrf.mxu1  ;;  %v7980_v46 = vpop.f32.mrf.mxu0 }
0x1f23   :  { %v5099_v31 = vsel %vm669_vm3, %v4970_v18, -inf }
0x1f24   :  { %v5095_v39 = vpop.f32.mrf.mxu1  ;;  %5100 = vmax.xlane.f32.xlu1 %v5099_v31 }
0x1f25   :  { %v5096_v40 = vadd.f32 %v5095_v39, %v5023_v34 }
0x1f26   :  { %v7985_v10 = vpop.f32.mrf.mxu1 }
0x1f27   :  { %v5102_v44 = vsel %vm669_vm3, %v5096_v40, -inf }
0x1f28   :  { %5103 = vmax.xlane.f32.xlu0 %v5102_v44 }
0x1f35   :  { %5122 = vrot.lane.b32.xlu1 %v9446_v7, %s8386_s25 }
0x1fad   :  { %v5101_v53 = vpop.xlane.xlu1 %5100 }
0x1fae   :  { %v5105_v14 = vsub.f32 %v4970_v18, %v5101_v53 }
0x1fb0   :  { %v5107_v30 = vmul.f32 1.442695, %v5105_v14 }
0x1fb1   :  { %v5104_v36 = vpop.xlane.xlu0 %5103  ;;  %v5123_v43 = vpop.permute.xlu1 %5122 }
0x1fb2   :  { %8293 = vpow2.f32 %v5107_v30  ;;  %v5106_v52 = vsub.f32 %v5096_v40, %v5104_v36  ;;  %7987 = vmatpush3.msra.mxu0 %v5123_v43 }
0x1fb3   :  { %7996 = vmatprep.subr.mxu0 %v8383_v15 }
0x1fb4   :  { %v5109_v22 = vmul.f32 1.442695, %v5106_v52 }
0x1fb6   :  { %8295 = vpow2.f32 %v5109_v22 }
0x1fbf   :  { %v8294_v25 = vpop.eup %8293 }
0x1fc0   :  { %v5111_v2 = vsel %vm669_vm3, %v8294_v25, 0.0 }
0x1fc1   :  { %5112 = vadd.xlane.f32.xlu1 %v5111_v2 }
0x1fc3   :  { %v8296_v4 = vpop.eup %8295 }
0x1fc4   :  { %v5114_v12 = vsel %vm669_vm3, %v8296_v4, 0.0 }
0x1fc5   :  { %5115 = vadd.xlane.f32.xlu0 %v5114_v12 }
0x1fd2   :  { %5373 = vrot.lane.b32.xlu1 %v9467_v21, %s8387_s26 }
0x1fd6   :  { %5499 = vrot.lane.b32.xlu1 %v9494_v49, %s8387_s26 }
0x1fda   :  { %5371 = vrot.lane.b32.xlu1 %v9478_v38, %s8387_s26 }
0x1fdb   :  { %5199 = vrot.lane.b32.xlu0 %v9451_v19, %s8386_s25  ;;  %s7262_s25 = sshll.u32 %s8392_s15, 4  ;;  %s7263_s25 = int_to_ptr.vmem [resolvable:$true] %s7262_s25 }
0x1fdc   :  { %p8366_p1 = scmp.lt.s32.totalorder %s7263_s25, %s7263_s25 }
0x1fde   :  { %5275 = vrot.lane.b32.xlu1 %v9487_v45, %s8387_s26 }
0x1fdf   :  { %5497 = vrot.lane.b32.xlu0 %v9508_v27, %s8387_s26 }
0x1fe2   :  { %5291 = vrot.lane.b32.xlu1 %v9540_v13, %s8387_s26 }
0x1fe3   :  { %5277 = vrot.lane.b32.xlu0 %v9489_v58, %s8387_s26 }
0x1fe6   :  { %5279 = vrot.lane.b32.xlu1 %v9506_v17, %s8387_s26 }
0x1fe7   :  { %5293 = vrot.lane.b32.xlu0 %v9521_v51, %s8387_s26 }
0x1fea   :  { %5281 = vrot.lane.b32.xlu1 %v9556_v32, %s8387_s26 }
0x1feb   :  { %5295 = vrot.lane.b32.xlu0 %v9534_v0, %s8387_s26 }
0x1fee   :  { %5283 = vrot.lane.b32.xlu1 %v9527_v9, %s8387_s26 }
0x1fef   :  { %5297 = vrot.lane.b32.xlu0 %v9561_v50, %s8387_s26 }
0x1ff2   :  { %5285 = vrot.lane.b32.xlu1 %v9569_v29, %s8387_s26 }
0x1ff3   :  { %5299 = vrot.lane.b32.xlu0 %v9546_v24, %s8387_s26 }
0x1ff6   :  { %5287 = vrot.lane.b32.xlu1 %v9582_v8, %s8387_s26 }
0x1ff7   :  { %5301 = vrot.lane.b32.xlu0 %v9574_v48, %s8387_s26 }
0x1ffa   :  { %5289 = vrot.lane.b32.xlu1 %v9595_v54, %s8387_s26 }
0x1ffb   :  { %5303 = vrot.lane.b32.xlu0 %v9587_v41, %s8387_s26 }
0x1fff   :  { %5305 = vrot.lane.b32.xlu0 %v9599_v60, %s8387_s26 }
0x204a   :  { %v5113_v33 = vpop.xlane.xlu1 %5112 }
0x204b   :  { %8297 = vrcp.f32 %v5113_v33 }
0x204e   :  { %v5116_v56 = vpop.xlane.xlu0 %5115  ;;  %v5374_v59 = vpop.permute.xlu1 %5373 }
0x204f   :  { %8299 = vrcp.f32 %v5116_v56 }
0x2052   :  { %v5200_v28 = vpop.permute.xlu0 %5199  ;;  %v5500_v23 = vpop.permute.xlu1 %5499 }
0x2053   :  { %7992 = vmatpush3.msra.mxu1 %v5200_v28 }
0x2054   :  { %8001 = vmatprep.subr.mxu1 %v8383_v15 }
0x2056   :  { %v5498_v63 = vpop.permute.xlu0 %5497  ;;  %v5372_v3 = vpop.permute.xlu1 %5371 }
0x2058   :  { %v8298_v37 = vpop.eup %8297 }
0x2059   :  { %v5119_v61 = vmul.f32 %v8298_v37, %v8294_v25 }
0x205a   :  { %v5278_v11 = vpop.permute.xlu0 %5277  ;;  %v5276_v16 = vpop.permute.xlu1 %5275 }
0x205b   :  { %7989 = vmatmul.mubr.msk.f32.vlgmr.msra.gmra.mxu0 %vm669_vm3, %v5119_v61  ;;  %v5326_v35 = vsel %vm669_vm3, %v5278_v11, 0.0  ;;  %v5323_v18 = vsel %vm669_vm3, %v5276_v16, 0.0 }
0x205c   :  { %v8300_v20 = vpop.eup %8299  ;;  %7997 = vmatpush3.xpose.msk.msra.mxu0 %vm669_vm3, %v5374_v59  ;;  %5327 = vadd.xlane.f32.xlu0 %v5326_v35 }
0x205d   :  { %5324 = vadd.xlane.f32.xlu1 %v5323_v18  ;;  %7998 = vmatprep.mubr.msk.f32.mxu0 %vm8384_vm1, %v8383_v15  ;;  %v5120_v46 = vmul.f32 %v8300_v20, %v8296_v4 }
0x205e   :  { %v5294_v26 = vpop.permute.xlu0 %5293  ;;  %v5292_v1 = vpop.permute.xlu1 %5291  ;;  %8006 = vmatprep.subr.mxu0 %v8383_v15 }
0x205f   :  { %7994 = vmatmul.mubr.msk.f32.vlgmr.msra.gmra.mxu1 %vm669_vm3, %v5120_v46  ;;  %7999 = vmatmul.mubr.msk.f32.vlgmr.msra.gmra.mxu0 %vm669_vm3, %v5372_v3  ;;  %v5347_v31 = vsel %vm669_vm3, %v5292_v1, 0.0  ;;  %v5350_v10 = vsel %vm669_vm3, %v5294_v26, 0.0 }
0x2060   :  { %8002 = vmatpush3.xpose.msk.msra.mxu1 %vm669_vm3, %v5500_v23  ;;  %5348 = vadd.xlane.f32.xlu0 %v5347_v31 }
0x2061   :  { %8003 = vmatprep.mubr.msk.f32.mxu1 %vm8384_vm1, %v8383_v15  ;;  %8011 = vmatprep.subr.mxu1 %v8383_v15 }
0x2062   :  { %v5296_v34 = vpop.permute.xlu0 %5295  ;;  %v5280_v39 = vpop.permute.xlu1 %5279  ;;  %8008 = vmatprep.mubr.msk.f32.mxu0 %vm8384_vm1, %v8383_v15 }
0x2063   :  { %v5329_v40 = vsel %vm669_vm3, %v5280_v39, 0.0  ;;  %8004 = vmatmul.mubr.msk.f32.vlgmr.msra.gmra.mxu1 %vm669_vm3, %v5498_v63  ;;  %v5353_v30 = vsel %vm669_vm3, %v5296_v34, 0.0 }
0x2064   :  { %5351 = vadd.xlane.f32.xlu0 %v5350_v10  ;;  %5330 = vadd.xlane.f32.xlu1 %v5329_v40 }
0x2065   :  { %8013 = vmatprep.mubr.msk.f32.mxu1 %vm8384_vm1, %v8383_v15 }
0x2066   :  { %v5298_v44 = vpop.permute.xlu0 %5297  ;;  %v5282_v53 = vpop.permute.xlu1 %5281 }
0x2067   :  { %v5332_v14 = vsel %vm669_vm3, %v5282_v53, 0.0  ;;  %v5356_v52 = vsel %vm669_vm3, %v5298_v44, 0.0 }
0x2068   :  { %5354 = vadd.xlane.f32.xlu0 %v5353_v30  ;;  %5333 = vadd.xlane.f32.xlu1 %v5332_v14 }
0x206a   :  { %v5300_v36 = vpop.permute.xlu0 %5299  ;;  %v5284_v43 = vpop.permute.xlu1 %5283 }
0x206b   :  { %v5335_v22 = vsel %vm669_vm3, %v5284_v43, 0.0  ;;  %v5359_v4 = vsel %vm669_vm3, %v5300_v36, 0.0 }
0x206c   :  { %5357 = vadd.xlane.f32.xlu0 %v5356_v52  ;;  %5336 = vadd.xlane.f32.xlu1 %v5335_v22 }
0x206e   :  { %v5302_v25 = vpop.permute.xlu0 %5301  ;;  %v5286_v2 = vpop.permute.xlu1 %5285 }
0x206f   :  { %v5338_v12 = vsel %vm669_vm3, %v5286_v2, 0.0  ;;  %v5362_v59 = vsel %vm669_vm3, %v5302_v25, 0.0 }
0x2070   :  { %5360 = vadd.xlane.f32.xlu0 %v5359_v4  ;;  %5339 = vadd.xlane.f32.xlu1 %v5338_v12 }
0x2072   :  { %v5304_v33 = vpop.permute.xlu0 %5303  ;;  %v5288_v56 = vpop.permute.xlu1 %5287 }
0x2073   :  { %v5341_v28 = vsel %vm669_vm3, %v5288_v56, 0.0  ;;  %v5365_v63 = vsel %vm669_vm3, %v5304_v33, 0.0 }
0x2074   :  { %5363 = vadd.xlane.f32.xlu0 %v5362_v59  ;;  %5342 = vadd.xlane.f32.xlu1 %v5341_v28 }
0x2076   :  { %v5290_v23 = vpop.permute.xlu1 %5289  ;;  %v5306_v37 = vpop.permute.xlu0 %5305 }
0x2077   :  { %v5344_v3 = vsel %vm669_vm3, %v5290_v23, 0.0  ;;  %v5368_v61 = vsel %vm669_vm3, %v5306_v37, 0.0 }
0x2078   :  { %5366 = vadd.xlane.f32.xlu0 %v5365_v63  ;;  %5345 = vadd.xlane.f32.xlu1 %v5344_v3 }
0x207c   :  { %5369 = vadd.xlane.f32.xlu0 %v5368_v61 }
0x20e5   :  { %v5328_v11 = vpop.xlane.xlu0 %5327 }
0x20e6   :  { %v5325_v35 = vpop.xlane.xlu1 %5324  ;;  %v5390_v44 = vrot.slane %v5328_v11, %v8543_v42 }
0x20e7   :  { %v5386_v53 = vrot.slane %v5325_v35, %v8543_v42 }
0x20e9   :  { %v5349_v16 = vpop.xlane.xlu0 %5348  ;;  %v5415_v22 = vsel %vm760_vm4, %v5390_v44, %v5386_v53 }
0x20ea   :  { %v5512_v56 = vrot.slane %v5349_v16, %v8543_v42 }
0x20ed   :  { %v5352_v18 = vpop.xlane.xlu0 %5351  ;;  %v5331_v20 = vpop.xlane.xlu1 %5330 }
0x20ee   :  { %v5394_v14 = vrot.slane %v5331_v20, %v8543_v42  ;;  %v5516_v25 = vrot.slane %v5352_v18, %v8543_v42 }
0x20f0   :  { %v5416_v4 = vsel %vm762_vm5, %v5394_v14, %v5415_v22  ;;  %v5541_v11 = vsel %vm760_vm4, %v5516_v25, %v5512_v56 }
0x20f1   :  { %v5355_v46 = vpop.xlane.xlu0 %5354  ;;  %v5334_v26 = vpop.xlane.xlu1 %5333 }
0x20f2   :  { %v5398_v36 = vrot.slane %v5334_v26, %v8543_v42  ;;  %v5520_v12 = vrot.slane %v5355_v46, %v8543_v42 }
0x20f4   :  { %v5417_v59 = vsel %vm764_vm6, %v5398_v36, %v5416_v4  ;;  %v5542_v20 = vsel %vm762_vm5, %v5520_v12, %v5541_v11 }
0x20f5   :  { %v5358_v1 = vpop.xlane.xlu0 %5357  ;;  %v5337_v31 = vpop.xlane.xlu1 %5336 }
0x20f6   :  { %v5402_v43 = vrot.slane %v5337_v31, %v8543_v42  ;;  %v5524_v28 = vrot.slane %v5358_v1, %v8543_v42 }
0x20f8   :  { %v5418_v3 = vsel %vm766_vm7, %v5402_v43, %v5417_v59  ;;  %v5543_v1 = vsel %vm764_vm6, %v5524_v28, %v5542_v20 }
0x20f9   :  { %v5361_v34 = vpop.xlane.xlu0 %5360  ;;  %v5340_v39 = vpop.xlane.xlu1 %5339 }
0x20fa   :  { %v5406_v2 = vrot.slane %v5340_v39, %v8543_v42  ;;  %v5528_v37 = vrot.slane %v5361_v34, %v8543_v42 }
0x20fc   :  { %v5419_v35 = vsel %vm768_vm8, %v5406_v2, %v5418_v3  ;;  %v5544_v44 = vsel %vm766_vm7, %v5528_v37, %v5543_v1 }
0x20fd   :  { %v5364_v40 = vpop.xlane.xlu0 %5363  ;;  %v5343_v10 = vpop.xlane.xlu1 %5342 }
0x20fe   :  { %v5410_v33 = vrot.slane %v5343_v10, %v8543_v42  ;;  %v5532_v18 = vrot.slane %v5364_v40, %v8543_v42 }
0x2100   :  { %v5420_v26 = vsel %vm770_vm9, %v5410_v33, %v5419_v35  ;;  %v5545_v14 = vsel %vm768_vm8, %v5532_v18, %v5544_v44 }
0x2101   :  { %v5367_v30 = vpop.xlane.xlu0 %5366  ;;  %v5346_v52 = vpop.xlane.xlu1 %5345 }
0x2102   :  { %v5414_v23 = vrot.slane %v5346_v52, %v8543_v42  ;;  %v5536_v46 = vrot.slane %v5367_v30, %v8543_v42 }
0x2104   :  { %v5421_v34 = vsel %vm772_vm10, %v5414_v23, %v5420_v26  ;;  %v5546_v43 = vsel %vm770_vm9, %v5536_v46, %v5545_v14 }
0x2105   :  { %v5370_v61 = vpop.xlane.xlu0 %5369 }
0x2106   :  { %v5540_v31 = vrot.slane %v5370_v61, %v8543_v42 }
0x2108   :  { %v5547_v22 = vsel %vm772_vm10, %v5540_v31, %v5546_v43 }
0x211b   :  { %v9842_v63 = vpop.f32.mrf.mxu0 }
0x211d   :  { %v7990_v16 = vpop.f32.mrf.mxu0 }
0x211f   :  { %v9854_v39 = vpop.f32.mrf.mxu1  ;;  %v5493_v10 = vpop.f32.mrf.mxu0 }
0x2120   :  { %v8114_v40 = vpack.i.bf16 %v9854_v39, %v9842_v63  ;;  %v5494_v53 = vadd.f32 %v5493_v10, %v5421_v34 }
0x2121   :  { %v7995_v30 = vpop.f32.mrf.mxu1  ;;  %v8000_v36 = vpop.f32.mrf.mxu0 }
0x2122   :  { %v5623_v52 = vsel %vm669_vm3, %v5494_v53, -inf }
0x2123   :  { %v5619_v25 = vpop.f32.mrf.mxu1  ;;  %5624 = vmax.xlane.f32.xlu1 %v5623_v52 }
0x2124   :  { %v5620_v2 = vadd.f32 %v5619_v25, %v5547_v22 }
0x2125   :  { %v8005_v4 = vpop.f32.mrf.mxu1 }
0x2126   :  { %v5626_v12 = vsel %vm669_vm3, %v5620_v2, -inf }
0x2127   :  { %5627 = vmax.xlane.f32.xlu0 %v5626_v12 }
0x2134   :  { %5645 = vrot.lane.b32.xlu1 %v9446_v7, %s8387_s26 }
0x21ac   :  { %v5625_v33 = vpop.xlane.xlu1 %5624 }
0x21ad   :  { %v5629_v56 = vsub.f32 %v5494_v53, %v5625_v33 }
0x21af   :  { %v5631_v59 = vmul.f32 1.442695, %v5629_v56 }
0x21b0   :  { %v5628_v28 = vpop.xlane.xlu0 %5627  ;;  %v5646_v23 = vpop.permute.xlu1 %5645 }
0x21b1   :  { %8301 = vpow2.f32 %v5631_v59  ;;  %v5630_v3 = vsub.f32 %v5620_v2, %v5628_v28  ;;  %8007 = vmatpush3.msra.mxu0 %v5646_v23 }
0x21b2   :  { %8016 = vmatprep.subr.mxu0 %v8383_v15 }
0x21b3   :  { %v5633_v37 = vmul.f32 1.442695, %v5630_v3 }
0x21b5   :  { %8303 = vpow2.f32 %v5633_v37 }
0x21be   :  { %v8302_v61 = vpop.eup %8301 }
0x21bf   :  { %v5635_v11 = vsel %vm669_vm3, %v8302_v61, 0.0 }
0x21c0   :  { %5636 = vadd.xlane.f32.xlu1 %v5635_v11 }
0x21c2   :  { %v8304_v35 = vpop.eup %8303 }
0x21c3   :  { %v5638_v18 = vsel %vm669_vm3, %v8304_v35, 0.0 }
0x21c4   :  { %5639 = vadd.xlane.f32.xlu0 %v5638_v18 }
0x21d1   :  { %5895 = vrot.lane.b32.xlu1 %v9467_v21, %s8388_s27 }
0x21d5   :  { %6021 = vrot.lane.b32.xlu1 %v9494_v49, %s8388_s27 }
0x21d9   :  { %5893 = vrot.lane.b32.xlu1 %v9478_v38, %s8388_s27 }
0x21da   :  { %5721 = vrot.lane.b32.xlu0 %v9451_v19, %s8387_s26  ;;  %s8361_s26 = scalar_lea.vmem %s7263_s25, 256 }
0x21db   :  { %p8362_p0 = scmp.ne.s32.totalorder %s7263_s25, %s8361_s26  ;;  %p8367_p2 = scmp.lt.s32.totalorder %s8361_s26, %s8361_s26 }
0x21dd   :  { %5797 = vrot.lane.b32.xlu1 %v9487_v45, %s8388_s27  ;;  %p8368_p3 = por %p8367_p2, %p8366_p1 }
0x21de   :  { %6019 = vrot.lane.b32.xlu0 %v9508_v27, %s8388_s27 }
0x21df   :  { %p8369_p4 = pnand %p8368_p3, %p8362_p0 }
0x21e1   :  { %5813 = vrot.lane.b32.xlu1 %v9540_v13, %s8388_s27 }
0x21e2   :  { %5799 = vrot.lane.b32.xlu0 %v9489_v58, %s8388_s27 }
0x21e5   :  { %5801 = vrot.lane.b32.xlu1 %v9506_v17, %s8388_s27 }
0x21e6   :  { %5815 = vrot.lane.b32.xlu0 %v9521_v51, %s8388_s27 }
0x21e9   :  { %5803 = vrot.lane.b32.xlu1 %v9556_v32, %s8388_s27 }
0x21ea   :  { %5817 = vrot.lane.b32.xlu0 %v9534_v0, %s8388_s27 }
0x21ed   :  { %5805 = vrot.lane.b32.xlu1 %v9527_v9, %s8388_s27 }
0x21ee   :  { %5819 = vrot.lane.b32.xlu0 %v9561_v50, %s8388_s27 }
0x21f1   :  { %5807 = vrot.lane.b32.xlu1 %v9569_v29, %s8388_s27 }
0x21f2   :  { %5821 = vrot.lane.b32.xlu0 %v9546_v24, %s8388_s27 }
0x21f5   :  { %5809 = vrot.lane.b32.xlu1 %v9582_v8, %s8388_s27 }
0x21f6   :  { %5823 = vrot.lane.b32.xlu0 %v9574_v48, %s8388_s27 }
0x21f9   :  { %5811 = vrot.lane.b32.xlu1 %v9595_v54, %s8388_s27 }
0x21fa   :  { %5825 = vrot.lane.b32.xlu0 %v9587_v41, %s8388_s27 }
0x21fe   :  { %5827 = vrot.lane.b32.xlu0 %v9599_v60, %s8388_s27 }
0x2249   :  { %v5637_v21 = vpop.xlane.xlu1 %5636 }
0x224a   :  { %8305 = vrcp.f32 %v5637_v21 }
0x224d   :  { %v5640_v38 = vpop.xlane.xlu0 %5639  ;;  %v5896_v45 = vpop.permute.xlu1 %5895 }
0x224e   :  { %8307 = vrcp.f32 %v5640_v38 }
0x2251   :  { %v5722_v58 = vpop.permute.xlu0 %5721  ;;  %v6022_v49 = vpop.permute.xlu1 %6021 }
0x2252   :  { %8012 = vmatpush3.msra.mxu1 %v5722_v58 }
0x2253   :  { %8021 = vmatprep.subr.mxu1 %v8383_v15 }
0x2255   :  { %v6020_v17 = vpop.permute.xlu0 %6019  ;;  %v5894_v27 = vpop.permute.xlu1 %5893 }
0x2257   :  { %v8306_v51 = vpop.eup %8305 }
0x2258   :  { %v5643_v9 = vmul.f32 %v8306_v51, %v8302_v61 }
0x2259   :  { %v5800_v0 = vpop.permute.xlu0 %5799  ;;  %v5798_v13 = vpop.permute.xlu1 %5797 }
0x225a   :  { %v5848_v24 = vsel %vm669_vm3, %v5800_v0, 0.0  ;;  %v5845_v32 = vsel %vm669_vm3, %v5798_v13, 0.0  ;;  %8009 = vmatmul.mubr.msk.f32.vlgmr.msra.gmra.mxu0 %vm669_vm3, %v5643_v9 }
0x225b   :  { %v8308_v50 = vpop.eup %8307  ;;  %8017 = vmatpush3.xpose.msk.msra.mxu0 %vm669_vm3, %v5896_v45  ;;  %5849 = vadd.xlane.f32.xlu0 %v5848_v24 }
0x225c   :  { %5846 = vadd.xlane.f32.xlu1 %v5845_v32  ;;  %8018 = vmatprep.mubr.msk.f32.mxu0 %vm8384_vm1, %v8383_v15  ;;  %v5644_v29 = vmul.f32 %v8308_v50, %v8304_v35 }
0x225d   :  { %v5816_v48 = vpop.permute.xlu0 %5815  ;;  %v5814_v8 = vpop.permute.xlu1 %5813  ;;  %8026 = vmatprep.subr.mxu0 %v8383_v15 }
0x225e   :  { %v5869_v41 = vsel %vm669_vm3, %v5814_v8, 0.0  ;;  %8014 = vmatmul.mubr.msk.f32.vlgmr.msra.gmra.mxu1 %vm669_vm3, %v5644_v29  ;;  %8019 = vmatmul.mubr.msk.f32.vlgmr.msra.gmra.mxu0 %vm669_vm3, %v5894_v27  ;;  %v5872_v16 = vsel %vm669_vm3, %v5816_v48, 0.0 }
0x225f   :  { %8022 = vmatpush3.xpose.msk.msra.mxu1 %vm669_vm3, %v6022_v49  ;;  %5870 = vadd.xlane.f32.xlu0 %v5869_v41 }
0x2260   :  { %8023 = vmatprep.mubr.msk.f32.mxu1 %vm8384_vm1, %v8383_v15  ;;  %8031 = vmatprep.subr.mxu1 %v8383_v15 }
0x2261   :  { %v5818_v54 = vpop.permute.xlu0 %5817  ;;  %v5802_v60 = vpop.permute.xlu1 %5801  ;;  %8028 = vmatprep.mubr.msk.f32.mxu0 %vm8384_vm1, %v8383_v15 }
0x2262   :  { %v5851_v20 = vsel %vm669_vm3, %v5802_v60, 0.0  ;;  %8024 = vmatmul.mubr.msk.f32.vlgmr.msra.gmra.mxu1 %vm669_vm3, %v6020_v17  ;;  %v5875_v1 = vsel %vm669_vm3, %v5818_v54, 0.0 }
0x2263   :  { %5873 = vadd.xlane.f32.xlu0 %v5872_v16  ;;  %5852 = vadd.xlane.f32.xlu1 %v5851_v20 }
0x2264   :  { %8033 = vmatprep.mubr.msk.f32.mxu1 %vm8384_vm1, %v8383_v15 }
0x2265   :  { %v5820_v46 = vpop.permute.xlu0 %5819  ;;  %v5804_v26 = vpop.permute.xlu1 %5803 }
0x2266   :  { %v5854_v31 = vsel %vm669_vm3, %v5804_v26, 0.0  ;;  %v5878_v44 = vsel %vm669_vm3, %v5820_v46, 0.0 }
0x2267   :  { %5876 = vadd.xlane.f32.xlu0 %v5875_v1  ;;  %5855 = vadd.xlane.f32.xlu1 %v5854_v31 }
0x2269   :  { %v5822_v34 = vpop.permute.xlu0 %5821  ;;  %v5806_v10 = vpop.permute.xlu1 %5805 }
0x226a   :  { %v5857_v53 = vsel %vm669_vm3, %v5806_v10, 0.0  ;;  %v5881_v36 = vsel %vm669_vm3, %v5822_v34, 0.0 }
0x226b   :  { %5879 = vadd.xlane.f32.xlu0 %v5878_v44  ;;  %5858 = vadd.xlane.f32.xlu1 %v5857_v53 }
0x226d   :  { %v5824_v14 = vpop.permute.xlu0 %5823  ;;  %v5808_v30 = vpop.permute.xlu1 %5807 }
0x226e   :  { %v5860_v43 = vsel %vm669_vm3, %v5808_v30, 0.0  ;;  %v5884_v25 = vsel %vm669_vm3, %v5824_v14, 0.0 }
0x226f   :  { %5882 = vadd.xlane.f32.xlu0 %v5881_v36  ;;  %5861 = vadd.xlane.f32.xlu1 %v5860_v43 }
0x2271   :  { %v5826_v52 = vpop.permute.xlu0 %5825  ;;  %v5810_v22 = vpop.permute.xlu1 %5809 }
0x2272   :  { %v5863_v2 = vsel %vm669_vm3, %v5810_v22, 0.0  ;;  %v5887_v12 = vsel %vm669_vm3, %v5826_v52, 0.0 }
0x2273   :  { %5885 = vadd.xlane.f32.xlu0 %v5884_v25  ;;  %5864 = vadd.xlane.f32.xlu1 %v5863_v2 }
0x2275   :  { %v5812_v4 = vpop.permute.xlu1 %5811  ;;  %v5828_v56 = vpop.permute.xlu0 %5827 }
0x2276   :  { %v5866_v33 = vsel %vm669_vm3, %v5812_v4, 0.0  ;;  %v5890_v59 = vsel %vm669_vm3, %v5828_v56, 0.0 }
0x2277   :  { %5888 = vadd.xlane.f32.xlu0 %v5887_v12  ;;  %5867 = vadd.xlane.f32.xlu1 %v5866_v33 }
0x227b   :  { %5891 = vadd.xlane.f32.xlu0 %v5890_v59 }
0x22e4   :  { %v5850_v28 = vpop.xlane.xlu0 %5849 }
0x22e5   :  { %v5847_v3 = vpop.xlane.xlu1 %5846  ;;  %v5912_v17 = vrot.slane %v5850_v28, %v8543_v42 }
0x22e6   :  { %v5908_v27 = vrot.slane %v5847_v3, %v8543_v42 }
0x22e8   :  { %v5871_v23 = vpop.xlane.xlu0 %5870  ;;  %v5937_v32 = vsel %vm760_vm4, %v5912_v17, %v5908_v27 }
0x22e9   :  { %v6034_v54 = vrot.slane %v5871_v23, %v8543_v42 }
0x22ec   :  { %v5874_v37 = vpop.xlane.xlu0 %5873  ;;  %v5853_v61 = vpop.xlane.xlu1 %5852 }
0x22ed   :  { %v5916_v51 = vrot.slane %v5853_v61, %v8543_v42  ;;  %v6038_v50 = vrot.slane %v5874_v37, %v8543_v42 }
0x22ef   :  { %v5938_v48 = vsel %vm762_vm5, %v5916_v51, %v5937_v32  ;;  %v6063_v34 = vsel %vm760_vm4, %v6038_v50, %v6034_v54  ;;  %v8168_v50 = vld [vmem:[%s10241_s1 + $0xc0] sm:$0xff]  }
0x22f0   :  { %v5877_v11 = vpop.xlane.xlu0 %5876  ;;  %v5856_v35 = vpop.xlane.xlu1 %5855 }
0x22f1   :  { %v5920_v0 = vrot.slane %v5856_v35, %v8543_v42  ;;  %v6042_v8 = vrot.slane %v5877_v11, %v8543_v42 }
0x22f3   :  { %v5939_v60 = vsel %vm764_vm6, %v5920_v0, %v5938_v48  ;;  %v6064_v14 = vsel %vm762_vm5, %v6042_v8, %v6063_v34 }
0x22f4   :  { %v5880_v18 = vpop.xlane.xlu0 %5879  ;;  %v5859_v21 = vpop.xlane.xlu1 %5858 }
0x22f5   :  { %v5924_v13 = vrot.slane %v5859_v21, %v8543_v42  ;;  %v6046_v16 = vrot.slane %v5880_v18, %v8543_v42 }
0x22f7   :  { %v5940_v26 = vsel %vm766_vm7, %v5924_v13, %v5939_v60  ;;  %v6065_v43 = vsel %vm764_vm6, %v6046_v16, %v6064_v14 }
0x22f8   :  { %v5883_v38 = vpop.xlane.xlu0 %5882  ;;  %v5862_v45 = vpop.xlane.xlu1 %5861 }
0x22f9   :  { %v5928_v29 = vrot.slane %v5862_v45, %v8543_v42  ;;  %v6050_v1 = vrot.slane %v5883_v38, %v8543_v42 }
0x22fb   :  { %v5941_v10 = vsel %vm768_vm8, %v5928_v29, %v5940_v26  ;;  %v6066_v4 = vsel %vm766_vm7, %v6050_v1, %v6065_v43 }
0x22fc   :  { %v5886_v58 = vpop.xlane.xlu0 %5885  ;;  %v5865_v49 = vpop.xlane.xlu1 %5864 }
0x22fd   :  { %v5932_v41 = vrot.slane %v5865_v49, %v8543_v42  ;;  %v6054_v44 = vrot.slane %v5886_v58, %v8543_v42 }
0x22ff   :  { %v5942_v36 = vsel %vm770_vm9, %v5932_v41, %v5941_v10  ;;  %v6067_v56 = vsel %vm768_vm8, %v6054_v44, %v6066_v4 }
0x2300   :  { %v5889_v9 = vpop.xlane.xlu0 %5888  ;;  %v5868_v24 = vpop.xlane.xlu1 %5867 }
0x2301   :  { %v5936_v20 = vrot.slane %v5868_v24, %v8543_v42  ;;  %v6058_v30 = vrot.slane %v5889_v9, %v8543_v42 }
0x2303   :  { %v5943_v25 = vsel %vm772_vm10, %v5936_v20, %v5942_v36  ;;  %v6068_v23 = vsel %vm770_vm9, %v6058_v30, %v6067_v56 }
0x2304   :  { %v5892_v31 = vpop.xlane.xlu0 %5891 }
0x2305   :  { %v6062_v52 = vrot.slane %v5892_v31, %v8543_v42 }
0x2307   :  { %v6069_v37 = vsel %vm772_vm10, %v6062_v52, %v6068_v23 }
0x231a   :  { %v5717_v46 = vpop.f32.mrf.mxu0 }
0x231c   :  { %v8010_v53 = vpop.f32.mrf.mxu0 }
0x231e   :  { %v5793_v22 = vpop.f32.mrf.mxu1  ;;  %v6015_v2 = vpop.f32.mrf.mxu0 }
0x231f   :  { %v8119_v12 = vpack.i.bf16 %v5793_v22, %v5717_v46  ;;  %v6016_v33 = vadd.f32 %v6015_v2, %v5943_v25 }
0x2320   :  { %v8015_v59 = vpop.f32.mrf.mxu1  ;;  %v8020_v28 = vpop.f32.mrf.mxu0 }
0x2321   :  { %v6145_v3 = vsel %vm669_vm3, %v6016_v33, -inf }
0x2322   :  { %v6141_v61 = vpop.f32.mrf.mxu1  ;;  %6146 = vmax.xlane.f32.xlu1 %v6145_v3 }
0x2323   :  { %v6142_v42 = vadd.f32 %v6141_v61, %v6069_v37 }
0x2324   :  { %v8025_v11 = vpop.f32.mrf.mxu1 }
0x2325   :  { %v6148_v35 = vsel %vm669_vm3, %v6142_v42, -inf }
0x2326   :  { %6149 = vmax.xlane.f32.xlu0 %v6148_v35 }
0x23ab   :  { %v6147_v18 = vpop.xlane.xlu1 %6146 }
0x23ac   :  { %v6151_v21 = vsub.f32 %v6016_v33, %v6147_v18 }
0x23ae   :  { %v6153_v38 = vmul.f32 1.442695, %v6151_v21  ;;  %v8169_v21 = vld [vmem:[%s10241_s1 + $0xd8] sm:$0xff]  }
0x23af   :  { %v6150_v45 = vpop.xlane.xlu0 %6149 }
0x23b0   :  { %8309 = vpow2.f32 %v6153_v38  ;;  %v6152_v58 = vsub.f32 %v6142_v42, %v6150_v45  ;;  %v8170_v38 = vld [vmem:[%s10241_s1 + $0xe8] sm:$0xff]   ;;  %v8171_v45 = vld [vmem:[%s10241_s1 + $0xd0] sm:$0xff]  }
0x23b2   :  { %v6155_v49 = vmul.f32 1.442695, %v6152_v58  ;;  %v8172_v58 = vld [vmem:[%s10241_s1 + $0xe0] sm:$0xff]  }
0x23b4   :  { %8311 = vpow2.f32 %v6155_v49 }
0x23bd   :  { %v8310_v17 = vpop.eup %8309 }
0x23be   :  { %v6157_v27 = vsel %vm669_vm3, %v8310_v17, 0.0 }
0x23bf   :  { %6158 = vadd.xlane.f32.xlu1 %v6157_v27 }
0x23c1   :  { %v8312_v51 = vpop.eup %8311 }
0x23c2   :  { %v6160_v9 = vsel %vm669_vm3, %v8312_v51, 0.0 }
0x23c3   :  { %6161 = vadd.xlane.f32.xlu0 %v6160_v9 }
0x23d0   :  { %6167 = vrot.lane.b32.xlu1 %v9446_v7, %s8388_s27 }
0x23d4   :  { %8115 = vrot.lane.b32.xlu1 %v8114_v40, %s8389_s28  ;;  %v8167_v40 = vld [vmem:[%s10241_s1 + $0xc8] sm:$0xff]  }
0x23d8   :  { %8120 = vrot.lane.b32.xlu1 %v8119_v12, %s8390_s29 }
0x23d9   :  { %6243 = vrot.lane.b32.xlu0 %v9451_v19, %s8388_s27 }
0x2448   :  { %v6159_v0 = vpop.xlane.xlu1 %6158 }
0x2449   :  { %8313 = vrcp.f32 %v6159_v0 }
0x244c   :  { %v6162_v13 = vpop.xlane.xlu0 %6161  ;;  %v6168_v24 = vpop.permute.xlu1 %6167 }
0x244d   :  { %8315 = vrcp.f32 %v6162_v13  ;;  %8027 = vmatpush3.msra.mxu0 %v6168_v24 }
0x244e   :  { %8036 = vmatprep.subr.bf16.mxu0 %v8383_v15 }
0x2450   :  { %v6244_v32 = vpop.permute.xlu0 %6243  ;;  %v8116_v60 = vpop.permute.xlu1 %8115 }
0x2451   :  { %8032 = vmatpush3.msra.mxu1 %v6244_v32  ;;  %v8118_v20 = vunpack.i.h.bf16 %v8116_v60  ;;  %v8117_v46 = vunpack.i.l.bf16 %v8116_v60  ;;  %v7515_v32 = vld [vmem:[%s10244_s4 + $0x29] ss:$0 sm:$0xff] }
0x2452   :  { %8044 = vmatprep.subr.bf16.mxu1 %v8383_v15 }
0x2453   :  { %v6344_v34 = vsel %vm669_vm3, %v9738_v6, %v8118_v20  ;;  %v6343_v10 = vsel %vm669_vm3, %v9726_v57, %v8117_v46  ;;  %v7509_v57 = vld [vmem:[%s10244_s4 + $0x28] ss:$0 sm:$0xff] }
0x2454   :  { %v8121_v16 = vpop.permute.xlu1 %8120 }
0x2455   :  { %v8123_v26 = vunpack.i.h.bf16 %v8121_v16  ;;  %v8122_v1 = vunpack.i.l.bf16 %v8121_v16 }
0x2456   :  { %v8314_v7 = vpop.eup %8313 }
0x2457   :  { %v6165_v63 = vmul.f32 %v8314_v7, %v8310_v17  ;;  %v6345_v14 = vsel %vm2753_vm11, %v6343_v10, %v8122_v1  ;;  %v6346_v30 = vsel %vm2753_vm11, %v6344_v34, %v8123_v26 }
0x2459   :  { %8029 = vmatmul.mubr.msk.f32.vlgmr.msra.gmra.mxu0 %vm669_vm3, %v6165_v63 }
0x245a   :  { %v8316_v39 = vpop.eup %8315  ;;  %8040 = vmatprep.mubr.msk.bf16.mxu0 %vm8384_vm1, %v8383_v15  ;;  %8037 = vmatpush3.bf16.msra.mxu0 %v8167_v40 }
0x245b   :  { %v6166_v19 = vmul.f32 %v8316_v39, %v8312_v51  ;;  %8038 = vmatprep.subr.bf16.mxu0 %v8383_v15 }
0x245d   :  { %8034 = vmatmul.mubr.msk.f32.vlgmr.msra.gmra.mxu1 %vm669_vm3, %v6166_v19  ;;  %v7516_v19 = vld [vmem:[%s10244_s4 + $0x2a] ss:$0 sm:$0xff] }
0x245e   :  { %8048 = vmatprep.mubr.msk.bf16.mxu1 %vm8384_vm1, %v8383_v15  ;;  %8039 = vmatpush3.bf16.msra.mxu0 %v8168_v50 }
0x245f   :  { %8052 = vmatprep.subr.bf16.mxu0 %v8383_v15  ;;  %8045 = vmatpush3.bf16.msra.mxu1 %v8169_v21  ;;  %v7539_v21 = vld [vmem:[%s10243_s3 + $0xd0] sm:$0xff] }
0x2460   :  { %8046 = vmatprep.subr.bf16.mxu1 %v8383_v15 }
0x2463   :  { %8047 = vmatpush3.bf16.msra.mxu1 %v8171_v45 }
0x2464   :  { %8060 = vmatprep.subr.bf16.mxu1 %v8383_v15 }
0x2519   :  { %v6239_v29 = vpop.f32.mrf.mxu0 }
0x251b   :  { %v8030_v48 = vpop.f32.mrf.mxu0 }
0x251d   :  { %v6315_v8 = vpop.f32.mrf.mxu1 }
0x251e   :  { %v8124_v41 = vpack.i.bf16 %v6315_v8, %v6239_v29  ;;  %v7531_v8 = vld [vmem:[%s10244_s4 + $0x2c] ss:$0 sm:$0xff] }
0x251f   :  { %v8035_v54 = vpop.f32.mrf.mxu1 }
0x2520   :  { %8125 = vrot.lane.b32.xlu1 %v8124_v41, %s8391_s9 }
0x2592   :  { %v8126_v31 = vpop.permute.xlu1 %8125 }
0x2593   :  { %v8128_v44 = vunpack.i.h.bf16 %v8126_v31  ;;  %v8127_v53 = vunpack.i.l.bf16 %v8126_v31 }
0x2595   :  { %v6348_v36 = vsel %vm2756_vm12, %v6346_v30, %v8128_v44  ;;  %v6347_v43 = vsel %vm2756_vm12, %v6345_v14, %v8127_v53 }
0x2596   :  { %v6354_v52 = vpack.c.bf16 %v6348_v36, %v6347_v43  ;;  %v7522_v43 = vld [vmem:[%s10244_s4 + $0x2b] ss:$0 sm:$0xff] }
0x2598   :  { %8041 = vmatmul.mubr.msk.bf16.vlgmr.msra.gmra.mxu0 %vm26_vm0, %v6354_v52 }
0x2599   :  { %8056 = vmatprep.mubr.msk.bf16.mxu0 %vm8384_vm1, %v8383_v15  ;;  %8053 = vmatpush3.bf16.msra.mxu0 %v8170_v38 }
0x259a   :  { %8054 = vmatprep.subr.bf16.mxu0 %v8383_v15 }
0x259d   :  { %8055 = vmatpush3.bf16.msra.mxu0 %v8172_v58 }
0x259e   :  { %8068 = vmatprep.subr.bf16.mxu0 %v8383_v15 }
0x2658   :  { %v6409_v6 = vpop.f32.mrf.mxu0 }
0x2659   :  { %v6410_v22 = vadd.f32 %v7509_v57, %v6409_v6 }
0x265a   :  { %v8042_v25 = vpop.f32.mrf.mxu0 }
0x265b   :  { %v10020_v2 = vadd.f32 %v6410_v22, %v9391_v62 }
0x265c   :  { %v6412_v4 = vpop.f32.mrf.mxu0 }
0x265d   :  { %v6413_v12 = vadd.f32 %v7509_v57, %v6412_v4  ;;  %v6420_v33 = vsel %vm26_vm0, %v10020_v2, 0.0 }
0x265e   :  { %6421 = vadd.xlane.f32.xlu0 %v6420_v33  ;;  %v8043_v56 = vpop.f32.mrf.mxu0 }
0x265f   :  { %v10025_v59 = vadd.f32 %v6413_v12, %v9396_v5 }
0x2661   :  { %v6423_v28 = vsel %vm26_vm0, %v10025_v59, 0.0 }
0x2662   :  { %6424 = vadd.xlane.f32.xlu1 %v6423_v28 }
0x26e7   :  { %v6422_v23 = vpop.xlane.xlu0 %6421 }
0x26e8   :  { %v6426_v3 = vmul.f32 0.03125, %v6422_v23 }
0x26ea   :  { %v6428_v37 = vsub.f32 %v10020_v2, %v6426_v3 }
0x26eb   :  { %v6425_v62 = vpop.xlane.xlu1 %6424 }
0x26ec   :  { %v6427_v61 = vmul.f32 0.03125, %v6425_v62  ;;  %v6430_v42 = vmul.f32 %v6428_v37, %v6428_v37 }
0x26ee   :  { %v6429_v11 = vsub.f32 %v10025_v59, %v6427_v61  ;;  %v6432_v35 = vsel %vm26_vm0, %v6430_v42, 0.0 }
0x26ef   :  { %6433 = vadd.xlane.f32.xlu0 %v6432_v35 }
0x26f0   :  { %v6431_v18 = vmul.f32 %v6429_v11, %v6429_v11 }
0x26f2   :  { %v6435_v5 = vsel %vm26_vm0, %v6431_v18, 0.0 }
0x26f3   :  { %6436 = vadd.xlane.f32.xlu0 %v6435_v5  ;;  %v7538_v5 = vld [vmem:[%s10243_s3 + $0xc8] sm:$0xff] }
0x2778   :  { %v6434_v49 = vpop.xlane.xlu0 %6433 }
0x2779   :  { %v6438_v17 = vmul.f32 0.03125, %v6434_v49 }
0x277b   :  { %v6440_v27 = vadd.f32 1e-05, %v6438_v17 }
0x277c   :  { %v6437_v51 = vpop.xlane.xlu0 %6436 }
0x277d   :  { %8317 = vrsqrt.f32 %v6440_v27  ;;  %v6439_v9 = vmul.f32 0.03125, %v6437_v51 }
0x277f   :  { %v6441_v0 = vadd.f32 1e-05, %v6439_v9  ;;  %v7540_v9 = vld [vmem:[%s10243_s3 + $0xd8] sm:$0xff] }
0x2781   :  { %8319 = vrsqrt.f32 %v6441_v0 }
0x278a   :  { %v8318_v13 = vpop.eup %8317 }
0x278b   :  { %v6444_v24 = vmul.f32 %v8318_v13, %v6428_v37 }
0x278d   :  { %v6450_v39 = vmul.f32 %v7515_v32, %v6444_v24 }
0x278e   :  { %v8320_v7 = vpop.eup %8319 }
0x278f   :  { %v6445_v63 = vmul.f32 %v8320_v7, %v6429_v11  ;;  %v6456_v50 = vadd.f32 %v7516_v19, %v6450_v39  ;;  %v7537_v11 = vld [vmem:[%s10243_s3 + $0xc0] sm:$0xff] }
0x2791   :  { %v6451_v40 = vmul.f32 %v7515_v32, %v6445_v63  ;;  %v7541_v32 = vld [vmem:[%s10243_s3 + $0xe0] sm:$0xff] }
0x2793   :  { %v6457_v29 = vadd.f32 %v7516_v19, %v6451_v40  ;;  %v7542_v40 = vld [vmem:[%s10243_s3 + $0xe8] sm:$0xff] }
0x2795   :  { %v6458_v48 = vpack.c.bf16 %v6457_v29, %v6456_v50 }
0x2797   :  { %8049 = vmatmul.mubr.msk.bf16.vlgmr.msra.gmra.mxu1 %vm26_vm0, %v6458_v48  ;;  %8057 = vmatmul.mubr.msk.bf16.vlgmr.msra.gmra.mxu0 %vm26_vm0, %v6458_v48 }
0x2798   :  { %8064 = vmatprep.mubr.msk.bf16.mxu1 %vm8384_vm1, %v8383_v15  ;;  %8072 = vmatprep.mubr.msk.bf16.mxu0 %vm8384_vm1, %v8383_v15 }
0x2857   :  { %v6518_v41 = vpop.f32.mrf.mxu1  ;;  %v6581_v54 = vpop.f32.mrf.mxu0 }
0x2858   :  { %v6582_v60 = vadd.f32 %v7531_v8, %v6581_v54  ;;  %v6519_v52 = vadd.f32 %v7522_v43, %v6518_v41 }
0x2859   :  { %v8050_v16 = vpop.f32.mrf.mxu1  ;;  %v8058_v20 = vpop.f32.mrf.mxu0 }
0x285a   :  { %v7535_v46 = vmul.f32 -1.442695, %v6582_v60  ;;  %v7543_v16 = vld [vmem:[%s10243_s3 + $0xf0] sm:$0xff] }
0x285b   :  { %v6521_v26 = vpop.f32.mrf.mxu1  ;;  %v6584_v1 = vpop.f32.mrf.mxu0 }
0x285c   :  { %8321 = vpow2.f32 %v7535_v46  ;;  %v6585_v31 = vadd.f32 %v7531_v8, %v6584_v1  ;;  %v6522_v25 = vadd.f32 %v7522_v43, %v6521_v26  ;;  %v7544_v43 = vld [vmem:[%s10243_s3 + $0xf8] sm:$0xff] }
0x285d   :  { %v8051_v34 = vpop.f32.mrf.mxu1  ;;  %v8059_v10 = vpop.f32.mrf.mxu0 }
0x285e   :  { %v7536_v44 = vmul.f32 -1.442695, %v6585_v31 }
0x2860   :  { %8323 = vpow2.f32 %v7536_v44 }
0x2869   :  { %v8322_v53 = vpop.eup %8321 }
0x286a   :  { %v6594_v14 = vadd.f32 1.0, %v8322_v53 }
0x286c   :  { %8325 = vrcp.f32 %v6594_v14 }
0x286d   :  { %v8324_v30 = vpop.eup %8323 }
0x286e   :  { %v6595_v36 = vadd.f32 1.0, %v8324_v30 }
0x2870   :  { %8327 = vrcp.f32 %v6595_v36 }
0x2879   :  { %v8326_v57 = vpop.eup %8325 }
0x287a   :  { %v6600_v6 = vmul.f32 %v8326_v57, %v6519_v52 }
0x287c   :  { %v6611_v22 = vrot.slane %v6600_v6, %v8548_v47  ;;  %v6604_v4 = vcombine.high %v6600_v6, %v6600_v6 }
0x287d   :  { %v8328_v12 = vpop.eup %8327 }
0x287e   :  { %v6619_v33 = vcombine.high %v6611_v22, %v6611_v22  ;;  %v6627_v56 = vrot.slane %v6611_v22, %v8548_v47  ;;  %v6601_v28 = vmul.f32 %v8328_v12, %v6522_v25  ;;  %v6618_v23 = vrot.slane %v6604_v4, %v8548_v47 }
0x2880   :  { %v6660_v3 = vrot.slane %v6601_v28, %v8548_v47  ;;  %v6620_v37 = vcombine.high %v6618_v23, %v6618_v23  ;;  %v6634_v62 = vrot.slane %v6618_v23, %v8548_v47  ;;  %v6641_v61 = vrot.slane %v6619_v33, %v8548_v47 }
0x2881   :  { %v6649_v42 = vcombine.high %v6627_v56, %v6627_v56  ;;  %v6714_v35 = vrot.slane %v6627_v56, %v8553_v55  ;;  %v6653_v38 = vcombine.high %v6601_v28, %v6601_v28 }
0x2882   :  { %v6648_v18 = vrot.slane %v6620_v37, %v8548_v47  ;;  %v6668_v45 = vcombine.high %v6660_v3, %v6660_v3  ;;  %v6651_v58 = vcombine.high %v6641_v61, %v6641_v61  ;;  %v6718_v49 = vrot.slane %v6641_v61, %v8553_v55 }
0x2883   :  { %v6722_v17 = vrot.slane %v6649_v42, %v8553_v55  ;;  %v6650_v27 = vcombine.high %v6634_v62, %v6634_v62  ;;  %v6730_v0 = vrot.slane %v6634_v62, %v8553_v55  ;;  %v6791_v13 = vmul.f32 %v7537_v11, %v6714_v35 }
0x2884   :  { %v6652_v51 = vcombine.high %v6648_v18, %v6648_v18  ;;  %v6676_v24 = vrot.slane %v6660_v3, %v8548_v47  ;;  %v6726_v7 = vrot.slane %v6651_v58, %v8553_v55  ;;  %v6792_v63 = vmul.f32 %v7538_v5, %v6718_v49 }
0x2885   :  { %v6793_v39 = vmul.f32 %v7539_v21, %v6722_v17  ;;  %v6734_v19 = vrot.slane %v6648_v18, %v8553_v55  ;;  %v6807_v29 = vsel %vm26_vm0, %v6791_v13, 0.0  ;;  %v6738_v8 = vrot.slane %v6650_v27, %v8553_v55  ;;  %v7546_v27 = vld [vmem:[%s10244_s4 + $0x2d] ss:$0 sm:$0xff] }
0x2886   :  { %v6794_v50 = vmul.f32 %v7540_v9, %v6726_v7  ;;  %v6808_v48 = vsel %vm26_vm0, %v6792_v63, 0.0  ;;  %v6742_v41 = vrot.slane %v6652_v51, %v8553_v55  ;;  %v6795_v54 = vmul.f32 %v7541_v32, %v6730_v0 }
0x2887   :  { %v6809_v60 = vadd.f32 %v6808_v48, %v6807_v29  ;;  %v6810_v20 = vsel %vm26_vm0, %v6793_v39, 0.0  ;;  %v6667_v46 = vrot.slane %v6653_v38, %v8548_v47  ;;  %v6690_v26 = vrot.slane %v6668_v45, %v8548_v47 }
0x2888   :  { %v6698_v1 = vcombine.high %v6676_v24, %v6676_v24  ;;  %v6796_v31 = vmul.f32 %v7542_v40, %v6734_v19  ;;  %v6812_v10 = vsel %vm26_vm0, %v6794_v50, 0.0  ;;  %v6746_v44 = vrot.slane %v6676_v24, %v8553_v55 }
0x2889   :  { %v6811_v34 = vadd.f32 %v6810_v20, %v6809_v60  ;;  %v6669_v53 = vcombine.high %v6667_v46, %v6667_v46  ;;  %v6683_v14 = vrot.slane %v6667_v46, %v8548_v47  ;;  %v6700_v30 = vcombine.high %v6690_v26, %v6690_v26 }
0x288a   :  { %v6750_v36 = vrot.slane %v6690_v26, %v8553_v55  ;;  %v6797_v52 = vmul.f32 %v7543_v16, %v6738_v8  ;;  %v6754_v6 = vrot.slane %v6698_v1, %v8553_v55  ;;  %v6799_v22 = vmul.f32 %v7537_v11, %v6746_v44 }
0x288b   :  { %v6813_v57 = vadd.f32 %v6812_v10, %v6811_v34  ;;  %v6814_v25 = vsel %vm26_vm0, %v6795_v54, 0.0  ;;  %v6697_v4 = vrot.slane %v6669_v53, %v8548_v47  ;;  %v6699_v12 = vcombine.high %v6683_v14, %v6683_v14 }
0x288c   :  { %v6758_v33 = vrot.slane %v6700_v30, %v8553_v55  ;;  %v6762_v28 = vrot.slane %v6683_v14, %v8553_v55  ;;  %v6800_v23 = vmul.f32 %v7538_v5, %v6750_v36  ;;  %v6801_v3 = vmul.f32 %v7539_v21, %v6754_v6  ;;  %v8173_v30 = vld [vmem:[%s10241_s1 + $0xf8] sm:$0xff]   ;;  %v8174_v36 = vld [vmem:[%s10241_s1 + $0xf0] sm:$0xff]  }
0x288d   :  { %v6815_v56 = vadd.f32 %v6814_v25, %v6813_v57  ;;  %v6798_v37 = vmul.f32 %v7544_v43, %v6742_v41  ;;  %v6816_v62 = vsel %vm26_vm0, %v6796_v31, 0.0  ;;  %v6701_v61 = vcombine.high %v6697_v4, %v6697_v4  ;;  %8061 = vmatpush3.bf16.msra.mxu1 %v8173_v30 }
0x288e   :  { %v6822_v42 = vsel %vm26_vm0, %v6799_v22, 0.0  ;;  %v6766_v11 = vrot.slane %v6697_v4, %v8553_v55  ;;  %v6802_v18 = vmul.f32 %v7540_v9, %v6758_v33  ;;  %v6823_v47 = vsel %vm26_vm0, %v6800_v23, 0.0  ;;  %8062 = vmatprep.subr.bf16.mxu1 %v8383_v15 }
0x288f   :  { %v6817_v35 = vadd.f32 %v6816_v62, %v6815_v56  ;;  %v6818_v38 = vsel %vm26_vm0, %v6797_v52, 0.0  ;;  %v6824_v45 = vadd.f32 %v6823_v47, %v6822_v42  ;;  %v6770_v49 = vrot.slane %v6699_v12, %v8553_v55  ;;  %v7549_v12 = vld [vmem:[%s10244_s4 + $0x2e] ss:$0 sm:$0xff]  ;;  %v7550_v56 = vld [vmem:[%s10244_s4 + $0x2f] ss:$0 sm:$0xff] }
0x2890   :  { %v6803_v5 = vmul.f32 %v7541_v32, %v6762_v28  ;;  %v6825_v21 = vsel %vm26_vm0, %v6801_v3, 0.0  ;;  %v6820_v17 = vsel %vm26_vm0, %v6798_v37, 0.0  ;;  %v6774_v9 = vrot.slane %v6701_v61, %v8553_v55 }
0x2891   :  { %v6819_v58 = vadd.f32 %v6818_v38, %v6817_v35  ;;  %v6826_v51 = vadd.f32 %v6825_v21, %v6824_v45  ;;  %v6804_v13 = vmul.f32 %v7542_v40, %v6766_v11  ;;  %v6827_v24 = vsel %vm26_vm0, %v6802_v18, 0.0  ;;  %8063 = vmatpush3.bf16.msra.mxu1 %v8174_v36  ;;  %v7565_v36 = vld [vmem:[%s10244_s4 + $0x32] ss:$0 sm:$0xff] }
0x2892   :  { %v6805_v39 = vmul.f32 %v7543_v16, %v6770_v49  ;;  %v6829_v32 = vsel %vm26_vm0, %v6803_v5, 0.0  ;;  %v6806_v29 = vmul.f32 %v7544_v43, %v6774_v9  ;;  %8076 = vmatprep.subr.bf16.mxu1 %v8383_v15 }
0x2893   :  { %v6821_v0 = vadd.f32 %v6820_v17, %v6819_v58  ;;  %v6828_v7 = vadd.f32 %v6827_v24, %v6826_v51  ;;  %v6831_v48 = vsel %vm26_vm0, %v6804_v13, 0.0  ;;  %v7558_v17 = vld [vmem:[%s10244_s4 + $0x30] ss:$0 sm:$0xff] }
0x2894   :  { %v6833_v41 = vsel %vm26_vm0, %v6805_v39, 0.0  ;;  %v6835_v55 = vsel %vm26_vm0, %v6806_v29, 0.0 }
0x2895   :  { %v6842_v63 = vadd.f32 %v7546_v27, %v6821_v0  ;;  %v6830_v19 = vadd.f32 %v6829_v32, %v6828_v7 }
0x2897   :  { %v6846_v50 = vsel %vm26_vm0, %v6842_v63, 0.0  ;;  %v6832_v8 = vadd.f32 %v6831_v48, %v6830_v19 }
0x2898   :  { %6847 = vadd.xlane.f32.xlu0 %v6846_v50 }
0x2899   :  { %v6834_v54 = vadd.f32 %v6833_v41, %v6832_v8 }
0x289b   :  { %v6836_v40 = vadd.f32 %v6835_v55, %v6834_v54 }
0x289d   :  { %v6843_v60 = vadd.f32 %v7546_v27, %v6836_v40  ;;  %v8175_v40 = vld [vmem:[%s10241_s1 + $0x118] sm:$0xff]  }
0x289e   :  { %8069 = vmatpush3.bf16.msra.mxu0 %v8175_v40 }
0x289f   :  { %v6849_v20 = vsel %vm26_vm0, %v6843_v60, 0.0  ;;  %8070 = vmatprep.subr.bf16.mxu0 %v8383_v15 }
0x28a0   :  { %6850 = vadd.xlane.f32.xlu1 %v6849_v20 }
0x2921   :  { %v6848_v16 = vpop.xlane.xlu0 %6847 }
0x2922   :  { %v6852_v46 = vmul.f32 0.03125, %v6848_v16 }
0x2924   :  { %v6854_v26 = vsub.f32 %v6842_v63, %v6852_v46 }
0x2926   :  { %v6856_v1 = vmul.f32 %v6854_v26, %v6854_v26 }
0x2928   :  { %v6858_v31 = vsel %vm26_vm0, %v6856_v1, 0.0 }
0x2929   :  { %6859 = vadd.xlane.f32.xlu0 %v6858_v31  ;;  %v6851_v34 = vpop.xlane.xlu1 %6850 }
0x292a   :  { %v6853_v10 = vmul.f32 0.03125, %v6851_v34 }
0x292c   :  { %v6855_v44 = vsub.f32 %v6843_v60, %v6853_v10  ;;  %v8176_v60 = vld [vmem:[%s10241_s1 + $0x110] sm:$0xff]  }
0x292d   :  { %8071 = vmatpush3.bf16.msra.mxu0 %v8176_v60 }
0x292e   :  { %v6857_v53 = vmul.f32 %v6855_v44, %v6855_v44 }
0x2930   :  { %v6861_v14 = vsel %vm26_vm0, %v6857_v53, 0.0 }
0x2931   :  { %6862 = vadd.xlane.f32.xlu1 %v6861_v14 }
0x29b2   :  { %v6860_v43 = vpop.xlane.xlu0 %6859 }
0x29b3   :  { %v6864_v52 = vmul.f32 0.03125, %v6860_v43 }
0x29b5   :  { %v6866_v57 = vadd.f32 1e-05, %v6864_v52 }
0x29b7   :  { %8329 = vrsqrt.f32 %v6866_v57 }
0x29ba   :  { %v6863_v6 = vpop.xlane.xlu1 %6862 }
0x29bb   :  { %v6865_v22 = vmul.f32 0.03125, %v6863_v6 }
0x29bd   :  { %v6867_v25 = vadd.f32 1e-05, %v6865_v22  ;;  %v8177_v22 = vld [vmem:[%s10242_s2 + $0x78] sm:$0xff]  }
0x29bf   :  { %8331 = vrsqrt.f32 %v6867_v25  ;;  %v8178_v25 = vld [vmem:[%s10242_s2 + $0x70] sm:$0xff]  }
0x29c4   :  { %v8330_v4 = vpop.eup %8329 }
0x29c5   :  { %v6870_v33 = vmul.f32 %v8330_v4, %v6854_v26  ;;  %v8179_v4 = vld [vmem:[%s10242_s2 + $0x68] sm:$0xff]  }
0x29c7   :  { %v6876_v28 = vmul.f32 %v7549_v12, %v6870_v33  ;;  %v7571_v33 = vld [vmem:[%s10244_s4 + $0x33] ss:$0 sm:$0xff] }
0x29c9   :  { %v6882_v23 = vadd.f32 %v7550_v56, %v6876_v28 }
0x29cb   :  { %v7551_v3 = vmul.f32 -1.442695, %v6882_v23 }
0x29cc   :  { %v8332_v37 = vpop.eup %8331 }
0x29cd   :  { %v6871_v62 = vmul.f32 %v8332_v37, %v6855_v44  ;;  %8333 = vpow2.f32 %v7551_v3  ;;  %v7564_v44 = vld [vmem:[%s10244_s4 + $0x31] ss:$0 sm:$0xff] }
0x29cf   :  { %v6877_v61 = vmul.f32 %v7549_v12, %v6871_v62  ;;  %v8180_v12 = vld [vmem:[%s10242_s2 + $0x60] sm:$0xff]  }
0x29d1   :  { %v6883_v42 = vadd.f32 %v7550_v56, %v6877_v61 }
0x29d3   :  { %v7552_v35 = vmul.f32 -1.442695, %v6883_v42 }
0x29d5   :  { %8335 = vpow2.f32 %v7552_v35 }
0x29da   :  { %v8334_v11 = vpop.eup %8333 }
0x29db   :  { %v6890_v18 = vadd.f32 1.0, %v8334_v11 }
0x29dd   :  { %8337 = vrcp.f32 %v6890_v18 }
0x29e2   :  { %v8336_v47 = vpop.eup %8335 }
0x29e3   :  { %v6891_v38 = vadd.f32 1.0, %v8336_v47 }
0x29e5   :  { %8339 = vrcp.f32 %v6891_v38 }
0x29ea   :  { %v8338_v45 = vpop.eup %8337 }
0x29eb   :  { %v6896_v49 = vmul.f32 %v8338_v45, %v6882_v23 }
0x29f2   :  { %v8340_v58 = vpop.eup %8339 }
0x29f3   :  { %v6897_v5 = vmul.f32 %v8340_v58, %v6883_v42 }
0x29f5   :  { %v6903_v21 = vpack.c.bf16 %v6897_v5, %v6896_v49  ;;  %v7586_v5 = vld [vmem:[%s10244_s4 + $0x34] ss:$0 sm:$0xff] }
0x29f7   :  { %8065 = vmatmul.mubr.msk.bf16.vlgmr.msra.gmra.mxu1 %vm26_vm0, %v6903_v21 }
0x29f8   :  { %8084 = vmatprep.mubr.msk.bf16.mxu1 %vm8384_vm1, %v8383_v15  ;;  %8077 = vmatpush3.bf16.msra.mxu1 %v8177_v22 }
0x29f9   :  { %8078 = vmatprep.subr.bf16.mxu1 %v8383_v15 }
0x29fc   :  { %8079 = vmatpush3.bf16.msra.mxu1 %v8178_v25 }
0x29fd   :  { %8080 = vmatprep.subr.bf16.mxu1 %v8383_v15 }
0x2a00   :  { %8081 = vmatpush3.bf16.msra.mxu1 %v8179_v4 }
0x2a01   :  { %8082 = vmatprep.subr.bf16.mxu1 %v8383_v15 }
0x2a04   :  { %8083 = vmatpush3.bf16.msra.mxu1 %v8180_v12 }
0x2ab7   :  { %v6958_v27 = vpop.f32.mrf.mxu1 }
0x2ab8   :  { %v6959_v51 = vadd.f32 %v7558_v17, %v6958_v27 }
0x2ab9   :  { %v8066_v0 = vpop.f32.mrf.mxu1 }
0x2aba   :  { %v10163_v9 = vadd.f32 %v6959_v51, %v10020_v2 }
0x2abb   :  { %v6961_v13 = vpop.f32.mrf.mxu1 }
0x2abc   :  { %v6962_v24 = vadd.f32 %v7558_v17, %v6961_v13  ;;  %v6969_v7 = vsel %vm26_vm0, %v10163_v9, 0.0 }
0x2abd   :  { %6970 = vadd.xlane.f32.xlu0 %v6969_v7  ;;  %v8067_v63 = vpop.f32.mrf.mxu1 }
0x2abe   :  { %v10168_v39 = vadd.f32 %v6962_v24, %v10025_v59 }
0x2ac0   :  { %v6972_v32 = vsel %vm26_vm0, %v10168_v39, 0.0 }
0x2ac1   :  { %6973 = vadd.xlane.f32.xlu1 %v6972_v32 }
0x2b46   :  { %v6971_v19 = vpop.xlane.xlu0 %6970 }
0x2b47   :  { %v6975_v50 = vmul.f32 0.03125, %v6971_v19 }
0x2b49   :  { %v6977_v29 = vsub.f32 %v10163_v9, %v6975_v50 }
0x2b4a   :  { %v6974_v2 = vpop.xlane.xlu1 %6973 }
0x2b4b   :  { %v6976_v48 = vmul.f32 0.03125, %v6974_v2  ;;  %v6979_v8 = vmul.f32 %v6977_v29, %v6977_v29 }
0x2b4d   :  { %v6978_v41 = vsub.f32 %v10168_v39, %v6976_v48  ;;  %v6981_v54 = vsel %vm26_vm0, %v6979_v8, 0.0 }
0x2b4e   :  { %6982 = vadd.xlane.f32.xlu0 %v6981_v54 }
0x2b4f   :  { %v6980_v55 = vmul.f32 %v6978_v41, %v6978_v41 }
0x2b51   :  { %v6984_v59 = vsel %vm26_vm0, %v6980_v55, 0.0 }
0x2b52   :  { %6985 = vadd.xlane.f32.xlu1 %v6984_v59 }
0x2bd7   :  { %v6983_v20 = vpop.xlane.xlu0 %6982 }
0x2bd8   :  { %v6987_v16 = vmul.f32 0.03125, %v6983_v20 }
0x2bda   :  { %v6989_v46 = vadd.f32 1e-05, %v6987_v16 }
0x2bdb   :  { %v6986_v26 = vpop.xlane.xlu1 %6985 }
0x2bdc   :  { %8341 = vrsqrt.f32 %v6989_v46  ;;  %v6988_v1 = vmul.f32 0.03125, %v6986_v26 }
0x2bde   :  { %v6990_v31 = vadd.f32 1e-05, %v6988_v1 }
0x2be0   :  { %8343 = vrsqrt.f32 %v6990_v31  ;;  %v7594_v31 = vld [vmem:[%s10244_s4 + $0x35] ss:$0 sm:$0xff] }
0x2be9   :  { %v8342_v34 = vpop.eup %8341 }
0x2bea   :  { %v6993_v10 = vmul.f32 %v8342_v34, %v6977_v29 }
0x2bec   :  { %v6999_v30 = vmul.f32 %v7564_v44, %v6993_v10  ;;  %v7595_v10 = vld [vmem:[%s10244_s4 + $0x36] ss:$0 sm:$0xff] }
0x2bed   :  { %v8344_v53 = vpop.eup %8343 }
0x2bee   :  { %v6994_v14 = vmul.f32 %v8344_v53, %v6978_v41  ;;  %v7005_v52 = vadd.f32 %v7565_v36, %v6999_v30 }
0x2bf0   :  { %v7000_v43 = vmul.f32 %v7564_v44, %v6994_v14 }
0x2bf2   :  { %v7006_v57 = vadd.f32 %v7565_v36, %v7000_v43 }
0x2bf4   :  { %v7012_v6 = vpack.c.bf16 %v7006_v57, %v7005_v52 }
0x2bf6   :  { %8073 = vmatmul.mubr.msk.bf16.vlgmr.msra.gmra.mxu0 %vm26_vm0, %v7012_v6 }
0x2cb6   :  { %v7067_v56 = vpop.f32.mrf.mxu0 }
0x2cb7   :  { %v7068_v28 = vadd.f32 %v7571_v33, %v7067_v56 }
0x2cb8   :  { %v8074_v23 = vpop.f32.mrf.mxu0 }
0x2cb9   :  { %v7575_v3 = vmul.f32 -1.442695, %v7068_v28 }
0x2cba   :  { %v7070_v37 = vpop.f32.mrf.mxu0 }
0x2cbb   :  { %8345 = vpow2.f32 %v7575_v3  ;;  %v7071_v62 = vadd.f32 %v7571_v33, %v7070_v37 }
0x2cbc   :  { %v8075_v61 = vpop.f32.mrf.mxu0 }
0x2cbd   :  { %v7576_v42 = vmul.f32 -1.442695, %v7071_v62 }
0x2cbf   :  { %8347 = vpow2.f32 %v7576_v42 }
0x2cc8   :  { %v8346_v15 = vpop.eup %8345 }
0x2cc9   :  { %v7080_v35 = vadd.f32 1.0, %v8346_v15 }
0x2ccb   :  { %8349 = vrcp.f32 %v7080_v35 }
0x2ccc   :  { %v8348_v11 = vpop.eup %8347 }
0x2ccd   :  { %v7081_v18 = vadd.f32 1.0, %v8348_v11 }
0x2ccf   :  { %8351 = vrcp.f32 %v7081_v18  ;;  %v7596_v18 = vld [vmem:[%s10244_s4 + $0x17] ss:$0 sm:$0xff] }
0x2cd8   :  { %v8350_v47 = vpop.eup %8349 }
0x2cd9   :  { %v7086_v45 = vmul.f32 %v8350_v47, %v7068_v28 }
0x2cdc   :  { %v8352_v38 = vpop.eup %8351 }
0x2cdd   :  { %v7087_v58 = vmul.f32 %v8352_v38, %v7071_v62  ;;  %v7597_v38 = vld [vmem:[%s10244_s4 + $0x18] ss:$0 sm:$0xff] }
0x2cdf   :  { %v7097_v49 = vpack.c.bf16 %v7087_v58, %v7086_v45 }
0x2ce1   :  { %8085 = vmatmul.mubr.msk.bf16.vlgmr.msra.gmra.mxu1 %vm185_vm2, %v7097_v49 }
0x2da1   :  { %v7164_v21 = vpop.f32.mrf.mxu1 }
0x2da2   :  { %v7165_v17 = vadd.f32 %v7586_v5, %v7164_v21 }
0x2da3   :  { %v8086_v27 = vpop.f32.mrf.mxu1 }
0x2da4   :  { %v7171_v51 = vmul.f32 0.5, %v7165_v17 }
0x2da5   :  { %v7167_v0 = vpop.f32.mrf.mxu1 }
0x2da6   :  { %v7173_v13 = vadd.f32 %v7171_v51, %v10163_v9  ;;  %v7168_v24 = vadd.f32 %v7586_v5, %v7167_v0 }
0x2da7   :  { %v8087_v7 = vpop.f32.mrf.mxu1 }
0x2da8   :  { %v7172_v63 = vmul.f32 0.5, %v7168_v24  ;;  %v7177_v32 = vsel %vm26_vm0, %v7173_v13, 0.0 }
0x2da9   :  { %7178 = vadd.xlane.f32.xlu0 %v7177_v32 }
0x2daa   :  { %v7174_v19 = vadd.f32 %v7172_v63, %v10168_v39 }
0x2dac   :  { %v7180_v50 = vsel %vm26_vm0, %v7174_v19, 0.0 }
0x2dad   :  { %7181 = vadd.xlane.f32.xlu1 %v7180_v50 }
0x2e32   :  { %v7179_v29 = vpop.xlane.xlu0 %7178 }
0x2e33   :  { %v7183_v2 = vmul.f32 0.03125, %v7179_v29 }
0x2e35   :  { %v7185_v48 = vsub.f32 %v7173_v13, %v7183_v2 }
0x2e36   :  { %v7182_v8 = vpop.xlane.xlu1 %7181 }
0x2e37   :  { %v7184_v41 = vmul.f32 0.03125, %v7182_v8  ;;  %v7187_v54 = vmul.f32 %v7185_v48, %v7185_v48 }
0x2e39   :  { %v7186_v55 = vsub.f32 %v7174_v19, %v7184_v41  ;;  %v7189_v9 = vsel %vm26_vm0, %v7187_v54, 0.0 }
0x2e3a   :  { %7190 = vadd.xlane.f32.xlu0 %v7189_v9 }
0x2e3b   :  { %v7188_v59 = vmul.f32 %v7186_v55, %v7186_v55 }
0x2e3d   :  { %v7192_v40 = vsel %vm26_vm0, %v7188_v59, 0.0 }
0x2e3e   :  { %7193 = vadd.xlane.f32.xlu1 %v7192_v40 }
0x2ec3   :  { %v7191_v60 = vpop.xlane.xlu0 %7190 }
0x2ec4   :  { %v7195_v20 = vmul.f32 0.03125, %v7191_v60 }
0x2ec6   :  { %v7197_v39 = vadd.f32 1e-05, %v7195_v20 }
0x2ec7   :  { %v7194_v16 = vpop.xlane.xlu1 %7193 }
0x2ec8   :  { %8353 = vrsqrt.f32 %v7197_v39  ;;  %v7196_v46 = vmul.f32 0.03125, %v7194_v16 }
0x2eca   :  { %v7198_v26 = vadd.f32 1e-05, %v7196_v46 }
0x2ecc   :  { %8355 = vrsqrt.f32 %v7198_v26 }
0x2ed5   :  { %v8354_v1 = vpop.eup %8353 }
0x2ed6   :  { %v7201_v34 = vmul.f32 %v8354_v1, %v7185_v48 }
0x2ed8   :  { %v7207_v44 = vmul.f32 %v7594_v31, %v7201_v34 }
0x2ed9   :  { %v8356_v53 = vpop.eup %8355 }
0x2eda   :  { %v7213_v14 = vadd.f32 %v7595_v10, %v7207_v44  ;;  %v7202_v30 = vmul.f32 %v8356_v53, %v7186_v55 }
0x2edc   :  { %v7217_v36 = vsel %vm26_vm0, %v7213_v14, 0.0  ;;  %v7208_v43 = vmul.f32 %v7594_v31, %v7202_v30 }
0x2edd   :  { %7218 = vadd.xlane.f32.xlu0 %v7217_v36 }
0x2ede   :  { %v7214_v52 = vadd.f32 %v7595_v10, %v7208_v43 }
0x2ee0   :  { %v7220_v57 = vsel %vm26_vm0, %v7214_v52, 0.0 }
0x2ee1   :  { %7221 = vadd.xlane.f32.xlu1 %v7220_v57 }
0x2f66   :  { %v7219_v6 = vpop.xlane.xlu0 %7218 }
0x2f67   :  { %v7223_v22 = vmul.f32 0.03125, %v7219_v6 }
0x2f69   :  { %v7225_v25 = vsub.f32 %v7213_v14, %v7223_v22 }
0x2f6a   :  { %v7222_v4 = vpop.xlane.xlu1 %7221 }
0x2f6b   :  { %v7224_v12 = vmul.f32 0.03125, %v7222_v4  ;;  %v7227_v33 = vmul.f32 %v7225_v25, %v7225_v25 }
0x2f6d   :  { %v7226_v56 = vsub.f32 %v7214_v52, %v7224_v12  ;;  %v7229_v28 = vsel %vm26_vm0, %v7227_v33, 0.0 }
0x2f6e   :  { %7230 = vadd.xlane.f32.xlu0 %v7229_v28 }
0x2f6f   :  { %v7228_v23 = vmul.f32 %v7226_v56, %v7226_v56 }
0x2f71   :  { %v7232_v3 = vsel %vm26_vm0, %v7228_v23, 0.0 }
0x2f72   :  { %7233 = vadd.xlane.f32.xlu1 %v7232_v3 }
0x2ff7   :  { %v7231_v37 = vpop.xlane.xlu0 %7230 }
0x2ff8   :  { %v7235_v62 = vmul.f32 0.03125, %v7231_v37 }
0x2ffa   :  { %v7237_v61 = vadd.f32 1e-06, %v7235_v62 }
0x2ffb   :  { %v7234_v42 = vpop.xlane.xlu1 %7233 }
0x2ffc   :  { %8357 = vrsqrt.f32 %v7237_v61  ;;  %v7236_v15 = vmul.f32 0.03125, %v7234_v42 }
0x2ffe   :  { %v7238_v35 = vadd.f32 1e-06, %v7236_v15 }
0x3000   :  { %8359 = vrsqrt.f32 %v7238_v35 }
0x3009   :  { %v8358_v11 = vpop.eup %8357 }
0x300a   :  { %v7241_v47 = vmul.f32 %v8358_v11, %v7225_v25 }
0x300c   :  { %v7247_v45 = vmul.f32 %v7596_v18, %v7241_v47 }
0x300d   :  { %v8360_v58 = vpop.eup %8359 }
0x300e   :  { %v7242_v49 = vmul.f32 %v8360_v58, %v7226_v56  ;;  %v7253_v5 = vadd.f32 %v7597_v38, %v7247_v45 }
0x3010   :  { %v7248_v21 = vmul.f32 %v7596_v18, %v7242_v49  ;;  %7255 = vst.msk [vmem:[#allocation2] sm:$0xff] %vm26_vm0, %v7253_v5 }
0x3012   :  { %v7254_v17 = vadd.f32 %v7597_v38, %v7248_v21 }
0x3014   :  { %7256 = vst.msk [vmem:[#allocation2 + $0x8] sm:$0xff] %vm26_vm0, %v7254_v17 }
0x3015   :  { %8372 = shalt.err (!%p8369_p4)
}
0x3016   :  { %s8393_s4 = smov 128  }
0x3017   :  { %7268 = dma.vmem_to_hbm [thread:$0]  %s7263_s25, 256, %s10245_s5, [#allocation3], %s8393_s4, %s8393_s4, %s8389_s28  }
0x3018   :  { %8381 = dma.done.wait [#allocation3], 256  }
0x3019   :  { %8382 = vsyncadd [#allocation3], 4294967040 }
0x301a   :  { %7272 = vsyncpa [#allocation3], 1 }

</bundles_post_ra>
